<compile_context>
chip_gen: v7x
topology: tpu7x:2x2x1
jax: 0.10.0
libtpu: 0.0.40
codegen_flags: <defaults>
</compile_context>

<pallas_src>
import math

import jax
import jax.numpy as jnp
from jax.experimental import pallas as pl
from jax.experimental.pallas import tpu as pltpu

# ---------------- model hyper-parameters ------------------------------------------
BATCH = 2
NUM_NODES = 8          # N
INPUT_DIM = 32         # D, divisible by NUM_HEADS
NUM_HEADS = 8          # K
CUTS = 3
CUT_SIZE = 4
NO_PROXIES = 2
SEQ_LEN = CUTS * CUT_SIZE
NW = 10                # per-linear packed weights (see __main__):
# 0: temporal key   1: temporal value   2: temporal proj1  3: temporal proj2
# 4: spatial  key   5: spatial  value   6: spatial  proj1  7: spatial  proj2
# 8: aggregator l1  9: aggregator l2


# ----------------------------- Pallas kernel ---------------------------------------
def _layer_kernel(x_ref, prox_ref, wsq_ref, bsq_ref, wdbl_ref, bdbl_ref,
                  wtri_ref, btri_ref, g_ref, gt_ref, o_ref):
    """One grid step == one batch element; all CUTS processed in an unrolled loop."""
    _, L, N, D = x_ref.shape
    P = NO_PROXIES
    CS = CUT_SIZE
    K = NUM_HEADS
    hs = D // K
    T = P + CS
    inv_sqrt_hs = 1.0 / math.sqrt(hs)

    # ---- hoisted loads (once per invocation, loop-invariant) ----
    x_all = x_ref[...]                         # [1, L, N, D]
    prox_all = prox_ref[...]                   # [1, CUTS*P, N, D]
    w_kv_t, b_kv_t = wdbl_ref[0], bdbl_ref[0]  # temporal key|value       [D,2D],[1,2D]
    w_s2a1, b_s2a1 = wdbl_ref[1], bdbl_ref[1]  # spatial proj2 | agg L1   [D,2D],[1,2D]
    w_t1, b_t1 = wsq_ref[0], bsq_ref[0]        # temporal proj1
    w_s1, b_s1 = wsq_ref[1], bsq_ref[1]        # spatial proj1
    w_a2, b_a2 = wsq_ref[2], bsq_ref[2]        # aggregator L2
    w_t2kv, b_t2kv = wtri_ref[...], btri_ref[...]  # t-proj2 | s-key | s-val [D,3D],[1,3D]
    G = g_ref[...]                             # [D, K] head-grouping one-hot
    GT = gt_ref[...]                           # [K, D]

    def mm(x2d, w, b):
        return jnp.dot(x2d, w, preferred_element_type=jnp.float32) + b

    def attend(qk, v_exp):
        # qk: [1, P, R, N, D] (element-wise q*k products); softmax/contract over R.
        shp = qk.shape
        s = jnp.dot(qk.reshape(-1, D), G,
                    preferred_element_type=jnp.float32) * inv_sqrt_hs    # MXU head-sum
        s = s.reshape(shp[:-1] + (K,))                                   # [1,P,R,N,K]
        m = jnp.max(s, axis=2, keepdims=True)                            # cross-vreg
        e = jnp.exp(s - m)
        a = e * pl.reciprocal(jnp.sum(e, axis=2, keepdims=True), approx=True)
        a_d = jnp.dot(a.reshape(-1, K), GT,
                      preferred_element_type=jnp.float32).reshape(shp)   # expand heads
        return jnp.sum(a_d * v_exp, axis=2)                              # [1,P,N,D]

    out_prev = jnp.zeros((1, 1, N, D), jnp.float32)      # running `out = 0`
    chunks = []
    for i in range(CUTS):                                # unrolled in-kernel cut loop
        xc = x_all[:, i * CS:(i + 1) * CS]               # [1,CS,N,D]
        prox = prox_all[:, i * P:(i + 1) * P] + out_prev # [1,P,N,D]
        t = jnp.concatenate([prox, xc], axis=1)          # [1,T,N,D]

        # ---- temporal attention (queries = proxy steps) ----
        kv = mm(t.reshape(-1, D), w_kv_t, b_kv_t)        # fused K|V: [T*N, 2D]
        k_t = kv[:, :D].reshape(1, T, N, D)
        v_t = kv[:, D:].reshape(1, T, N, D)
        qk_t = prox[:, :, None, :, :] * k_t[:, None, :, :, :]    # [1,P,T,N,D]
        o = attend(qk_t, v_t[:, None, :, :, :])                  # [1,P,N,D]

        # proj1 -> relu -> fused {proj2 | spatial K | spatial V} in one MXU push
        h = jnp.maximum(mm(o.reshape(-1, D), w_t1, b_t1), 0.0)   # [P*N, D]
        fused = mm(h, w_t2kv, b_t2kv)                            # [P*N, 3D]
        o2 = fused[:, :D]                                        # spatial query
        k_s = fused[:, D:2 * D].reshape(1, P, N, D)
        v_s = fused[:, 2 * D:].reshape(1, P, N, D)

        # ---- spatial attention (over nodes) ----
        q_s = o2.reshape(1, P, N, D)
        qk_s = q_s[:, :, None, :, :] * k_s[:, :, :, None, :]     # [1,P,M,N,D]
        o = attend(qk_s, v_s[:, :, :, None, :])                  # [1,P,N,D]

        # proj1 -> relu -> fused {proj2 | aggregator L1} in one MXU push
        h = jnp.maximum(mm(o.reshape(-1, D), w_s1, b_s1), 0.0)   # [P*N, D]
        fused = mm(h, w_s2a1, b_s2a1)                            # [P*N, 2D]
        o2 = fused[:, :D]
        z1 = fused[:, D:]

        # ---- aggregator gate (Linear-ReLU-Linear-Sigmoid), sum over proxy axis ----
        g = jax.nn.sigmoid(mm(jnp.maximum(z1, 0.0), w_a2, b_a2))
        gated = (g * o2).reshape(1, P, N, D)
        out_prev = jnp.sum(gated, axis=1, keepdims=True)         # [1,1,N,D]
        chunks.append(out_prev)

    o_ref[...] = jnp.concatenate(chunks, axis=1)                 # single store [1,CUTS,N,D]


# ----------------------------- wrapper ----------------------------------------------
def layer_forward(x, proxies, w_pack, b_pack):
    B, L, N, D = x.shape
    K = NUM_HEADS
    hs = D // K

    w = [w_pack[i] for i in range(NW)]
    b = [b_pack[i] for i in range(NW)]            # each [1, D]

    # Temporal key|value fused into [D, 2D] (one MXU push instead of two).
    w_kv_t = jnp.concatenate([w[0], w[1]], axis=1)
    b_kv_t = jnp.concatenate([b[0], b[1]], axis=1)

    # Fold temporal proj2 into the spatial K/V projections (one-time weight products):
    #   o2 = h @ w3 + b3 ;  k_s = o2 @ w4 + b4 = h @ (w3 @ w4) + (b3 @ w4 + b4)
    w_t2kv = jnp.concatenate([w[3], w[3] @ w[4], w[3] @ w[5]], axis=1)        # [D, 3D]
    b_t2kv = jnp.concatenate([b[3], b[3] @ w[4] + b[4], b[3] @ w[5] + b[5]], axis=1)

    # Fold spatial proj2 into aggregator L1.
    w_s2a1 = jnp.concatenate([w[7], w[7] @ w[8]], axis=1)                     # [D, 2D]
    b_s2a1 = jnp.concatenate([b[7], b[7] @ w[8] + b[8]], axis=1)

    w_sq = jnp.stack([w[2], w[6], w[9]], axis=0)       # [3, D, D]
    b_sq = jnp.stack([b[2], b[6], b[9]], axis=0)       # [3, 1, D]
    w_dbl = jnp.stack([w_kv_t, w_s2a1], axis=0)        # [2, D, 2D]
    b_dbl = jnp.stack([b_kv_t, b_s2a1], axis=0)        # [2, 1, 2D]

    # Static head-grouping matrix: moves per-head reductions onto the MXU.
    head_of = jnp.arange(D, dtype=jnp.int32) // hs
    G = (head_of[:, None] == jnp.arange(K, dtype=jnp.int32)[None, :]).astype(jnp.float32)
    GT = jnp.transpose(G)

    grid_spec = pltpu.PrefetchScalarGridSpec(
        num_scalar_prefetch=0,
        grid=(B,),   # batches independent -> parallel (2nd TC on v7x; no-op otherwise)
        in_specs=[
            pl.BlockSpec((1, L, N, D), lambda bi: (bi, 0, 0, 0)),
            pl.BlockSpec((1, CUTS * NO_PROXIES, N, D), lambda bi: (0, 0, 0, 0)),
            pl.BlockSpec((3, D, D), lambda bi: (0, 0, 0)),
            pl.BlockSpec((3, 1, D), lambda bi: (0, 0, 0)),
            pl.BlockSpec((2, D, 2 * D), lambda bi: (0, 0, 0)),
            pl.BlockSpec((2, 1, 2 * D), lambda bi: (0, 0, 0)),
            pl.BlockSpec((D, 3 * D), lambda bi: (0, 0)),
            pl.BlockSpec((1, 3 * D), lambda bi: (0, 0)),
            pl.BlockSpec((D, K), lambda bi: (0, 0)),
            pl.BlockSpec((K, D), lambda bi: (0, 0)),
        ],
        out_specs=pl.BlockSpec((1, CUTS, N, D), lambda bi: (bi, 0, 0, 0)),
    )
    return pl.pallas_call(
        _layer_kernel,
        out_shape=jax.ShapeDtypeStruct((B, CUTS, N, D), jnp.float32),
        grid_spec=grid_spec,
        compiler_params=pltpu.CompilerParams(dimension_semantics=("parallel",)),
    )(x, proxies, w_sq, b_sq, w_dbl, b_dbl, w_t2kv, b_t2kv, G, GT)


# ----------------------- pure-JAX reference (for verification) ----------------------
def layer_reference(x, proxies, w_pack, b_pack):
    B, L, N, D = x.shape
    K, hs = NUM_HEADS, INPUT_DIM // NUM_HEADS

    def linear(v, k):
        return v @ w_pack[k] + b_pack[k][0]

    def softmax(s, axis):
        s = s - jnp.max(s, axis=axis, keepdims=True)
        e = jnp.exp(s)
        return e / jnp.sum(e, axis=axis, keepdims=True)

    def attend_time(q, key, val):
        outs = []
        for h in range(K):
            qh, kh, vh = (a[..., h * hs:(h + 1) * hs] for a in (q, key, val))
            s = jnp.einsum('bpnh,btnh->bpnt', qh, kh) / math.sqrt(hs)
            a = softmax(s, axis=-1)
            outs.append(jnp.einsum('bpnt,btnh->bpnh', a, vh))
        return jnp.concatenate(outs, axis=-1)

    def attend_space(q, key, val):
        outs = []
        for h in range(K):
            qh, kh, vh = (a[..., h * hs:(h + 1) * hs] for a in (q, key, val))
            s = jnp.einsum('bpnh,bpmh->bpnm', qh, kh) / math.sqrt(hs)
            a = softmax(s, axis=-1)
            outs.append(jnp.einsum('bpnm,bpmh->bpnh', a, vh))
        return jnp.concatenate(outs, axis=-1)

    out = jnp.zeros((B, 1, N, D), jnp.float32)
    chunks = []
    for i in range(CUTS):
        t_cut = x[:, i * CUT_SIZE:(i + 1) * CUT_SIZE]
        prox = proxies[:, i * NO_PROXIES:(i + 1) * NO_PROXIES] + out
        t = jnp.concatenate([prox, t_cut], axis=1)
        o = attend_time(t[:, :NO_PROXIES], linear(t, 0), linear(t, 1))
        o = linear(jax.nn.relu(linear(o, 2)), 3)
        o = attend_space(o, linear(o, 4), linear(o, 5))
        o = linear(jax.nn.relu(linear(o, 6)), 7)
        g = jax.nn.sigmoid(linear(jax.nn.relu(linear(o, 8)), 9))
        out = jnp.sum(g * o, axis=1, keepdims=True)
        chunks.append(out)
    return jnp.concatenate(chunks, axis=1)


# ----------------------------------- main --------------------------------------------
if __name__ == "__main__":
    key = jax.random.PRNGKey(0)
    ks = jax.random.split(key, 5)
    d = INPUT_DIM
    scale = 1.0 / math.sqrt(d)

    x = jax.random.normal(ks[0], (BATCH, SEQ_LEN, NUM_NODES, d), jnp.float32)
    proxies = jax.random.normal(ks[1], (1, CUTS * NO_PROXIES, NUM_NODES, d), jnp.float32)

    # ParameterGenerator (FC branch) key/value weights ~ U(0,1) (scaled for numerics),
    # attention projections & aggregator ~ N(0, 1/D).
    w_rand = jax.random.uniform(ks[2], (4, d, d), jnp.float32) * scale   # t_key,t_val,s_key,s_val
    w_norm = jax.random.normal(ks[3], (6, d, d), jnp.float32) * scale    # projections + aggregator
    w_pack = jnp.stack([
        w_rand[0], w_rand[1], w_norm[0], w_norm[1],
        w_rand[2], w_rand[3], w_norm[2], w_norm[3],
        w_norm[4], w_norm[5],
    ], axis=0)                                                           # [NW, D, D]
    b_pack = jax.random.normal(ks[4], (NW, 1, d), jnp.float32) * 0.1     # [NW, 1, D]

    out = layer_forward(x, proxies, w_pack, b_pack)
    out = jax.block_until_ready(out)

    assert out.shape == (BATCH, CUTS, NUM_NODES, INPUT_DIM), out.shape
    ref = layer_reference(x, proxies, w_pack, b_pack)
    max_err = float(jnp.max(jnp.abs(out - ref)))
    assert jnp.allclose(out, ref, rtol=5e-2, atol=5e-2), f"max abs err = {max_err}"

    print("KERNEL_OK")
</pallas_src>

<mosaic_0001>
module attributes {stable_mosaic.version = 11 : i64} {
  func.func @_layer_kernel(%arg0: i32, %arg1: memref<1x12x8x32xf32, #tpu.memory_space<vmem>>, %arg2: memref<1x6x8x32xf32, #tpu.memory_space<vmem>>, %arg3: memref<3x32x32xf32, #tpu.memory_space<vmem>>, %arg4: memref<3x1x32xf32, #tpu.memory_space<vmem>>, %arg5: memref<2x32x64xf32, #tpu.memory_space<vmem>>, %arg6: memref<2x1x64xf32, #tpu.memory_space<vmem>>, %arg7: memref<32x96xf32, #tpu.memory_space<vmem>>, %arg8: memref<1x96xf32, #tpu.memory_space<vmem>>, %arg9: memref<32x8xf32, #tpu.memory_space<vmem>>, %arg10: memref<8x32xf32, #tpu.memory_space<vmem>>, %arg11: memref<1x3x8x32xf32, #tpu.memory_space<vmem>>) attributes {dimension_semantics = [#tpu.dimension_semantics<parallel>], iteration_bounds = array<i64: 2>, scalar_prefetch = 0 : i64, scratch_operands = 0 : i64, tpu.core_type = #tpu.core_type<tc>, window_params = [{transform_indices = @transform_0, window_bounds = array<i64: 1, 12, 8, 32>}, {pipeline_mode = #tpu.pipeline_mode<synchronous>, transform_indices = @transform_1, window_bounds = array<i64: 1, 6, 8, 32>}, {pipeline_mode = #tpu.pipeline_mode<synchronous>, transform_indices = @transform_2, window_bounds = array<i64: 3, 32, 32>}, {pipeline_mode = #tpu.pipeline_mode<synchronous>, transform_indices = @transform_3, window_bounds = array<i64: 3, 1, 32>}, {pipeline_mode = #tpu.pipeline_mode<synchronous>, transform_indices = @transform_4, window_bounds = array<i64: 2, 32, 64>}, {pipeline_mode = #tpu.pipeline_mode<synchronous>, transform_indices = @transform_5, window_bounds = array<i64: 2, 1, 64>}, {pipeline_mode = #tpu.pipeline_mode<synchronous>, transform_indices = @transform_6, window_bounds = array<i64: 32, 96>}, {pipeline_mode = #tpu.pipeline_mode<synchronous>, transform_indices = @transform_7, window_bounds = array<i64: 1, 96>}, {pipeline_mode = #tpu.pipeline_mode<synchronous>, transform_indices = @transform_8, window_bounds = array<i64: 32, 8>}, {pipeline_mode = #tpu.pipeline_mode<synchronous>, transform_indices = @transform_9, window_bounds = array<i64: 8, 32>}, {transform_indices = @transform_10, window_bounds = array<i64: 1, 3, 8, 32>}]} {
    %c0 = arith.constant 0 : index
    %c0_0 = arith.constant 0 : index
    %c0_1 = arith.constant 0 : index
    %c0_2 = arith.constant 0 : index
    %0 = vector.load %arg1[%c0, %c0_0, %c0_1, %c0_2] : memref<1x12x8x32xf32, #tpu.memory_space<vmem>>, vector<1x12x8x32xf32>
    %c0_3 = arith.constant 0 : index
    %c0_4 = arith.constant 0 : index
    %c0_5 = arith.constant 0 : index
    %c0_6 = arith.constant 0 : index
    %1 = vector.load %arg2[%c0_3, %c0_4, %c0_5, %c0_6] : memref<1x6x8x32xf32, #tpu.memory_space<vmem>>, vector<1x6x8x32xf32>
    %c0_7 = arith.constant 0 : index
    %c0_8 = arith.constant 0 : index
    %c0_9 = arith.constant 0 : index
    %2 = vector.load %arg5[%c0_7, %c0_8, %c0_9] : memref<2x32x64xf32, #tpu.memory_space<vmem>>, vector<1x32x64xf32>
    %3 = vector.shape_cast %2 : vector<1x32x64xf32> to vector<32x64xf32>
    %c0_10 = arith.constant 0 : index
    %c0_11 = arith.constant 0 : index
    %c0_12 = arith.constant 0 : index
    %4 = vector.load %arg6[%c0_10, %c0_11, %c0_12] : memref<2x1x64xf32, #tpu.memory_space<vmem>>, vector<1x1x64xf32>
    %5 = vector.shape_cast %4 : vector<1x1x64xf32> to vector<1x64xf32>
    %c1 = arith.constant 1 : index
    %c0_13 = arith.constant 0 : index
    %c0_14 = arith.constant 0 : index
    %6 = vector.load %arg5[%c1, %c0_13, %c0_14] : memref<2x32x64xf32, #tpu.memory_space<vmem>>, vector<1x32x64xf32>
    %7 = vector.shape_cast %6 : vector<1x32x64xf32> to vector<32x64xf32>
    %c1_15 = arith.constant 1 : index
    %c0_16 = arith.constant 0 : index
    %c0_17 = arith.constant 0 : index
    %8 = vector.load %arg6[%c1_15, %c0_16, %c0_17] : memref<2x1x64xf32, #tpu.memory_space<vmem>>, vector<1x1x64xf32>
    %9 = vector.shape_cast %8 : vector<1x1x64xf32> to vector<1x64xf32>
    %c0_18 = arith.constant 0 : index
    %c0_19 = arith.constant 0 : index
    %c0_20 = arith.constant 0 : index
    %10 = vector.load %arg3[%c0_18, %c0_19, %c0_20] : memref<3x32x32xf32, #tpu.memory_space<vmem>>, vector<1x32x32xf32>
    %11 = vector.shape_cast %10 : vector<1x32x32xf32> to vector<32x32xf32>
    %c0_21 = arith.constant 0 : index
    %c0_22 = arith.constant 0 : index
    %c0_23 = arith.constant 0 : index
    %12 = vector.load %arg4[%c0_21, %c0_22, %c0_23] : memref<3x1x32xf32, #tpu.memory_space<vmem>>, vector<1x1x32xf32>
    %13 = vector.shape_cast %12 : vector<1x1x32xf32> to vector<1x32xf32>
    %c1_24 = arith.constant 1 : index
    %c0_25 = arith.constant 0 : index
    %c0_26 = arith.constant 0 : index
    %14 = vector.load %arg3[%c1_24, %c0_25, %c0_26] : memref<3x32x32xf32, #tpu.memory_space<vmem>>, vector<1x32x32xf32>
    %15 = vector.shape_cast %14 : vector<1x32x32xf32> to vector<32x32xf32>
    %c1_27 = arith.constant 1 : index
    %c0_28 = arith.constant 0 : index
    %c0_29 = arith.constant 0 : index
    %16 = vector.load %arg4[%c1_27, %c0_28, %c0_29] : memref<3x1x32xf32, #tpu.memory_space<vmem>>, vector<1x1x32xf32>
    %17 = vector.shape_cast %16 : vector<1x1x32xf32> to vector<1x32xf32>
    %c2 = arith.constant 2 : index
    %c0_30 = arith.constant 0 : index
    %c0_31 = arith.constant 0 : index
    %18 = vector.load %arg3[%c2, %c0_30, %c0_31] : memref<3x32x32xf32, #tpu.memory_space<vmem>>, vector<1x32x32xf32>
    %19 = vector.shape_cast %18 : vector<1x32x32xf32> to vector<32x32xf32>
    %c2_32 = arith.constant 2 : index
    %c0_33 = arith.constant 0 : index
    %c0_34 = arith.constant 0 : index
    %20 = vector.load %arg4[%c2_32, %c0_33, %c0_34] : memref<3x1x32xf32, #tpu.memory_space<vmem>>, vector<1x1x32xf32>
    %21 = vector.shape_cast %20 : vector<1x1x32xf32> to vector<1x32xf32>
    %c0_35 = arith.constant 0 : index
    %c0_36 = arith.constant 0 : index
    %22 = vector.load %arg7[%c0_35, %c0_36] : memref<32x96xf32, #tpu.memory_space<vmem>>, vector<32x96xf32>
    %c0_37 = arith.constant 0 : index
    %c0_38 = arith.constant 0 : index
    %23 = vector.load %arg8[%c0_37, %c0_38] : memref<1x96xf32, #tpu.memory_space<vmem>>, vector<1x96xf32>
    %c0_39 = arith.constant 0 : index
    %c0_40 = arith.constant 0 : index
    %24 = vector.load %arg9[%c0_39, %c0_40] : memref<32x8xf32, #tpu.memory_space<vmem>>, vector<32x8xf32>
    %c0_41 = arith.constant 0 : index
    %c0_42 = arith.constant 0 : index
    %25 = vector.load %arg10[%c0_41, %c0_42] : memref<8x32xf32, #tpu.memory_space<vmem>>, vector<8x32xf32>
    %cst = arith.constant 0.000000e+00 : f32
    %26 = vector.broadcast %cst : f32 to vector<1x1x8x32xf32>
    %27 = vector.extract_strided_slice %0 {offsets = [0, 0, 0, 0], sizes = [1, 4, 8, 32], strides = [1, 1, 1, 1]} : vector<1x12x8x32xf32> to vector<1x4x8x32xf32>
    %28 = vector.extract_strided_slice %1 {offsets = [0, 0, 0, 0], sizes = [1, 2, 8, 32], strides = [1, 1, 1, 1]} : vector<1x6x8x32xf32> to vector<1x2x8x32xf32>
    %29 = vector.broadcast %26 : vector<1x1x8x32xf32> to vector<1x2x8x32xf32>
    %30 = arith.addf %28, %29 : vector<1x2x8x32xf32>
    %31 = tpu.concatenate %30, %27 in 1 : vector<1x2x8x32xf32>, vector<1x4x8x32xf32> -> vector<1x6x8x32xf32>
    %32 = vector.shape_cast %31 : vector<1x6x8x32xf32> to vector<48x32xf32>
    %cst_43 = arith.constant dense<0.000000e+00> : vector<48x64xf32>
    %33 = tpu.matmul %32, %3, %cst_43 {dimension_numbers = #tpu.dot_dimension_numbers<[1], [0], [0], [1], [0, 0, 1, 1], [], []>} : vector<48x32xf32>, vector<32x64xf32>, vector<48x64xf32> -> vector<48x64xf32>
    %34 = vector.broadcast %5 : vector<1x64xf32> to vector<48x64xf32>
    %35 = arith.addf %33, %34 : vector<48x64xf32>
    %36 = vector.extract_strided_slice %35 {offsets = [0, 0], sizes = [48, 32], strides = [1, 1]} : vector<48x64xf32> to vector<48x32xf32>
    %37 = vector.shape_cast %36 : vector<48x32xf32> to vector<1x6x8x32xf32>
    %38 = vector.extract_strided_slice %35 {offsets = [0, 32], sizes = [48, 32], strides = [1, 1]} : vector<48x64xf32> to vector<48x32xf32>
    %39 = vector.shape_cast %38 : vector<48x32xf32> to vector<1x6x8x32xf32>
    %40 = vector.shape_cast %30 : vector<1x2x8x32xf32> to vector<1x2x1x8x32xf32>
    %41 = vector.shape_cast %37 : vector<1x6x8x32xf32> to vector<1x1x6x8x32xf32>
    %42 = vector.broadcast %40 : vector<1x2x1x8x32xf32> to vector<1x2x6x8x32xf32>
    %43 = vector.broadcast %41 : vector<1x1x6x8x32xf32> to vector<1x2x6x8x32xf32>
    %44 = arith.mulf %42, %43 : vector<1x2x6x8x32xf32>
    %45 = vector.shape_cast %39 : vector<1x6x8x32xf32> to vector<1x1x6x8x32xf32>
    %46 = vector.shape_cast %44 : vector<1x2x6x8x32xf32> to vector<96x32xf32>
    %cst_44 = arith.constant dense<0.000000e+00> : vector<96x8xf32>
    %47 = tpu.matmul %46, %24, %cst_44 {dimension_numbers = #tpu.dot_dimension_numbers<[1], [0], [0], [1], [0, 0, 1, 1], [], []>} : vector<96x32xf32>, vector<32x8xf32>, vector<96x8xf32> -> vector<96x8xf32>
    %cst_45 = arith.constant 5.000000e-01 : f32
    %48 = vector.broadcast %cst_45 : f32 to vector<96x8xf32>
    %49 = arith.mulf %47, %48 : vector<96x8xf32>
    %50 = vector.shape_cast %49 : vector<96x8xf32> to vector<1x2x6x8x8xf32>
    %cst_46 = arith.constant dense<0xFF800000> : vector<1x2x8x8xf32>
    %51 = vector.multi_reduction <maximumf>, %50, %cst_46 [2] : vector<1x2x6x8x8xf32> to vector<1x2x8x8xf32>
    %52 = vector.shape_cast %51 : vector<1x2x8x8xf32> to vector<1x2x1x8x8xf32>
    %53 = vector.broadcast %52 : vector<1x2x1x8x8xf32> to vector<1x2x6x8x8xf32>
    %54 = arith.subf %50, %53 : vector<1x2x6x8x8xf32>
    %55 = math.exp %54 : vector<1x2x6x8x8xf32>
    %cst_47 = arith.constant dense<0.000000e+00> : vector<1x2x8x8xf32>
    %56 = vector.multi_reduction <add>, %55, %cst_47 [2] : vector<1x2x6x8x8xf32> to vector<1x2x8x8xf32>
    %57 = vector.shape_cast %56 : vector<1x2x8x8xf32> to vector<1x2x1x8x8xf32>
    %58 = tpu.reciprocal %57 {approx = true} : vector<1x2x1x8x8xf32> -> vector<1x2x1x8x8xf32>
    %59 = vector.broadcast %58 : vector<1x2x1x8x8xf32> to vector<1x2x6x8x8xf32>
    %60 = arith.mulf %55, %59 : vector<1x2x6x8x8xf32>
    %61 = vector.shape_cast %60 : vector<1x2x6x8x8xf32> to vector<96x8xf32>
    %cst_48 = arith.constant dense<0.000000e+00> : vector<96x32xf32>
    %62 = tpu.matmul %61, %25, %cst_48 {dimension_numbers = #tpu.dot_dimension_numbers<[1], [0], [0], [1], [0, 0, 1, 1], [], []>} : vector<96x8xf32>, vector<8x32xf32>, vector<96x32xf32> -> vector<96x32xf32>
    %63 = vector.shape_cast %62 : vector<96x32xf32> to vector<1x2x6x8x32xf32>
    %64 = vector.broadcast %45 : vector<1x1x6x8x32xf32> to vector<1x2x6x8x32xf32>
    %65 = arith.mulf %63, %64 : vector<1x2x6x8x32xf32>
    %cst_49 = arith.constant dense<0.000000e+00> : vector<1x2x8x32xf32>
    %66 = vector.multi_reduction <add>, %65, %cst_49 [2] : vector<1x2x6x8x32xf32> to vector<1x2x8x32xf32>
    %67 = vector.shape_cast %66 : vector<1x2x8x32xf32> to vector<16x32xf32>
    %cst_50 = arith.constant dense<0.000000e+00> : vector<16x32xf32>
    %68 = tpu.matmul %67, %11, %cst_50 {dimension_numbers = #tpu.dot_dimension_numbers<[1], [0], [0], [1], [0, 0, 1, 1], [], []>} : vector<16x32xf32>, vector<32x32xf32>, vector<16x32xf32> -> vector<16x32xf32>
    %69 = vector.broadcast %13 : vector<1x32xf32> to vector<16x32xf32>
    %70 = arith.addf %68, %69 : vector<16x32xf32>
    %cst_51 = arith.constant 0.000000e+00 : f32
    %71 = vector.broadcast %cst_51 : f32 to vector<16x32xf32>
    %72 = arith.maximumf %70, %71 : vector<16x32xf32>
    %cst_52 = arith.constant dense<0.000000e+00> : vector<16x96xf32>
    %73 = tpu.matmul %72, %22, %cst_52 {dimension_numbers = #tpu.dot_dimension_numbers<[1], [0], [0], [1], [0, 0, 1, 1], [], []>} : vector<16x32xf32>, vector<32x96xf32>, vector<16x96xf32> -> vector<16x96xf32>
    %74 = vector.broadcast %23 : vector<1x96xf32> to vector<16x96xf32>
    %75 = arith.addf %73, %74 : vector<16x96xf32>
    %76 = vector.extract_strided_slice %75 {offsets = [0, 0], sizes = [16, 32], strides = [1, 1]} : vector<16x96xf32> to vector<16x32xf32>
    %77 = vector.extract_strided_slice %75 {offsets = [0, 32], sizes = [16, 32], strides = [1, 1]} : vector<16x96xf32> to vector<16x32xf32>
    %78 = vector.shape_cast %77 : vector<16x32xf32> to vector<1x2x8x32xf32>
    %79 = vector.extract_strided_slice %75 {offsets = [0, 64], sizes = [16, 32], strides = [1, 1]} : vector<16x96xf32> to vector<16x32xf32>
    %80 = vector.shape_cast %79 : vector<16x32xf32> to vector<1x2x8x32xf32>
    %81 = vector.shape_cast %76 : vector<16x32xf32> to vector<1x2x8x32xf32>
    %82 = vector.shape_cast %81 : vector<1x2x8x32xf32> to vector<1x2x1x8x32xf32>
    %83 = vector.shape_cast %78 : vector<1x2x8x32xf32> to vector<1x2x8x1x32xf32>
    %84 = vector.broadcast %82 : vector<1x2x1x8x32xf32> to vector<1x2x8x8x32xf32>
    %85 = vector.broadcast %83 : vector<1x2x8x1x32xf32> to vector<1x2x8x8x32xf32>
    %86 = arith.mulf %84, %85 : vector<1x2x8x8x32xf32>
    %87 = vector.shape_cast %80 : vector<1x2x8x32xf32> to vector<1x2x8x1x32xf32>
    %88 = vector.shape_cast %86 : vector<1x2x8x8x32xf32> to vector<128x32xf32>
    %cst_53 = arith.constant dense<0.000000e+00> : vector<128x8xf32>
    %89 = tpu.matmul %88, %24, %cst_53 {dimension_numbers = #tpu.dot_dimension_numbers<[1], [0], [0], [1], [0, 0, 1, 1], [], []>} : vector<128x32xf32>, vector<32x8xf32>, vector<128x8xf32> -> vector<128x8xf32>
    %cst_54 = arith.constant 5.000000e-01 : f32
    %90 = vector.broadcast %cst_54 : f32 to vector<128x8xf32>
    %91 = arith.mulf %89, %90 : vector<128x8xf32>
    %92 = vector.shape_cast %91 : vector<128x8xf32> to vector<1x2x8x8x8xf32>
    %cst_55 = arith.constant dense<0xFF800000> : vector<1x2x8x8xf32>
    %93 = vector.multi_reduction <maximumf>, %92, %cst_55 [2] : vector<1x2x8x8x8xf32> to vector<1x2x8x8xf32>
    %94 = vector.shape_cast %93 : vector<1x2x8x8xf32> to vector<1x2x1x8x8xf32>
    %95 = vector.broadcast %94 : vector<1x2x1x8x8xf32> to vector<1x2x8x8x8xf32>
    %96 = arith.subf %92, %95 : vector<1x2x8x8x8xf32>
    %97 = math.exp %96 : vector<1x2x8x8x8xf32>
    %cst_56 = arith.constant dense<0.000000e+00> : vector<1x2x8x8xf32>
    %98 = vector.multi_reduction <add>, %97, %cst_56 [2] : vector<1x2x8x8x8xf32> to vector<1x2x8x8xf32>
    %99 = vector.shape_cast %98 : vector<1x2x8x8xf32> to vector<1x2x1x8x8xf32>
    %100 = tpu.reciprocal %99 {approx = true} : vector<1x2x1x8x8xf32> -> vector<1x2x1x8x8xf32>
    %101 = vector.broadcast %100 : vector<1x2x1x8x8xf32> to vector<1x2x8x8x8xf32>
    %102 = arith.mulf %97, %101 : vector<1x2x8x8x8xf32>
    %103 = vector.shape_cast %102 : vector<1x2x8x8x8xf32> to vector<128x8xf32>
    %cst_57 = arith.constant dense<0.000000e+00> : vector<128x32xf32>
    %104 = tpu.matmul %103, %25, %cst_57 {dimension_numbers = #tpu.dot_dimension_numbers<[1], [0], [0], [1], [0, 0, 1, 1], [], []>} : vector<128x8xf32>, vector<8x32xf32>, vector<128x32xf32> -> vector<128x32xf32>
    %105 = vector.shape_cast %104 : vector<128x32xf32> to vector<1x2x8x8x32xf32>
    %106 = vector.broadcast %87 : vector<1x2x8x1x32xf32> to vector<1x2x8x8x32xf32>
    %107 = arith.mulf %105, %106 : vector<1x2x8x8x32xf32>
    %cst_58 = arith.constant dense<0.000000e+00> : vector<1x2x8x32xf32>
    %108 = vector.multi_reduction <add>, %107, %cst_58 [2] : vector<1x2x8x8x32xf32> to vector<1x2x8x32xf32>
    %109 = vector.shape_cast %108 : vector<1x2x8x32xf32> to vector<16x32xf32>
    %cst_59 = arith.constant dense<0.000000e+00> : vector<16x32xf32>
    %110 = tpu.matmul %109, %15, %cst_59 {dimension_numbers = #tpu.dot_dimension_numbers<[1], [0], [0], [1], [0, 0, 1, 1], [], []>} : vector<16x32xf32>, vector<32x32xf32>, vector<16x32xf32> -> vector<16x32xf32>
    %111 = vector.broadcast %17 : vector<1x32xf32> to vector<16x32xf32>
    %112 = arith.addf %110, %111 : vector<16x32xf32>
    %cst_60 = arith.constant 0.000000e+00 : f32
    %113 = vector.broadcast %cst_60 : f32 to vector<16x32xf32>
    %114 = arith.maximumf %112, %113 : vector<16x32xf32>
    %cst_61 = arith.constant dense<0.000000e+00> : vector<16x64xf32>
    %115 = tpu.matmul %114, %7, %cst_61 {dimension_numbers = #tpu.dot_dimension_numbers<[1], [0], [0], [1], [0, 0, 1, 1], [], []>} : vector<16x32xf32>, vector<32x64xf32>, vector<16x64xf32> -> vector<16x64xf32>
    %116 = vector.broadcast %9 : vector<1x64xf32> to vector<16x64xf32>
    %117 = arith.addf %115, %116 : vector<16x64xf32>
    %118 = vector.extract_strided_slice %117 {offsets = [0, 0], sizes = [16, 32], strides = [1, 1]} : vector<16x64xf32> to vector<16x32xf32>
    %119 = vector.extract_strided_slice %117 {offsets = [0, 32], sizes = [16, 32], strides = [1, 1]} : vector<16x64xf32> to vector<16x32xf32>
    %cst_62 = arith.constant 0.000000e+00 : f32
    %120 = vector.broadcast %cst_62 : f32 to vector<16x32xf32>
    %121 = arith.maximumf %119, %120 : vector<16x32xf32>
    %cst_63 = arith.constant dense<0.000000e+00> : vector<16x32xf32>
    %122 = tpu.matmul %121, %19, %cst_63 {dimension_numbers = #tpu.dot_dimension_numbers<[1], [0], [0], [1], [0, 0, 1, 1], [], []>} : vector<16x32xf32>, vector<32x32xf32>, vector<16x32xf32> -> vector<16x32xf32>
    %123 = vector.broadcast %21 : vector<1x32xf32> to vector<16x32xf32>
    %124 = arith.addf %122, %123 : vector<16x32xf32>
    %125 = arith.negf %124 : vector<16x32xf32>
    %126 = math.exp %125 : vector<16x32xf32>
    %cst_64 = arith.constant 1.000000e+00 : f32
    %127 = vector.broadcast %cst_64 : f32 to vector<16x32xf32>
    %128 = arith.addf %127, %126 : vector<16x32xf32>
    %129 = arith.divf %127, %128 : vector<16x32xf32>
    %130 = arith.mulf %129, %118 : vector<16x32xf32>
    %131 = vector.shape_cast %130 : vector<16x32xf32> to vector<1x2x8x32xf32>
    %cst_65 = arith.constant dense<0.000000e+00> : vector<1x8x32xf32>
    %132 = vector.multi_reduction <add>, %131, %cst_65 [1] : vector<1x2x8x32xf32> to vector<1x8x32xf32>
    %133 = vector.shape_cast %132 : vector<1x8x32xf32> to vector<1x1x8x32xf32>
    %134 = vector.extract_strided_slice %0 {offsets = [0, 4, 0, 0], sizes = [1, 4, 8, 32], strides = [1, 1, 1, 1]} : vector<1x12x8x32xf32> to vector<1x4x8x32xf32>
    %135 = vector.extract_strided_slice %1 {offsets = [0, 2, 0, 0], sizes = [1, 2, 8, 32], strides = [1, 1, 1, 1]} : vector<1x6x8x32xf32> to vector<1x2x8x32xf32>
    %136 = vector.broadcast %133 : vector<1x1x8x32xf32> to vector<1x2x8x32xf32>
    %137 = arith.addf %135, %136 : vector<1x2x8x32xf32>
    %138 = tpu.concatenate %137, %134 in 1 : vector<1x2x8x32xf32>, vector<1x4x8x32xf32> -> vector<1x6x8x32xf32>
    %139 = vector.shape_cast %138 : vector<1x6x8x32xf32> to vector<48x32xf32>
    %cst_66 = arith.constant dense<0.000000e+00> : vector<48x64xf32>
    %140 = tpu.matmul %139, %3, %cst_66 {dimension_numbers = #tpu.dot_dimension_numbers<[1], [0], [0], [1], [0, 0, 1, 1], [], []>} : vector<48x32xf32>, vector<32x64xf32>, vector<48x64xf32> -> vector<48x64xf32>
    %141 = vector.broadcast %5 : vector<1x64xf32> to vector<48x64xf32>
    %142 = arith.addf %140, %141 : vector<48x64xf32>
    %143 = vector.extract_strided_slice %142 {offsets = [0, 0], sizes = [48, 32], strides = [1, 1]} : vector<48x64xf32> to vector<48x32xf32>
    %144 = vector.shape_cast %143 : vector<48x32xf32> to vector<1x6x8x32xf32>
    %145 = vector.extract_strided_slice %142 {offsets = [0, 32], sizes = [48, 32], strides = [1, 1]} : vector<48x64xf32> to vector<48x32xf32>
    %146 = vector.shape_cast %145 : vector<48x32xf32> to vector<1x6x8x32xf32>
    %147 = vector.shape_cast %137 : vector<1x2x8x32xf32> to vector<1x2x1x8x32xf32>
    %148 = vector.shape_cast %144 : vector<1x6x8x32xf32> to vector<1x1x6x8x32xf32>
    %149 = vector.broadcast %147 : vector<1x2x1x8x32xf32> to vector<1x2x6x8x32xf32>
    %150 = vector.broadcast %148 : vector<1x1x6x8x32xf32> to vector<1x2x6x8x32xf32>
    %151 = arith.mulf %149, %150 : vector<1x2x6x8x32xf32>
    %152 = vector.shape_cast %146 : vector<1x6x8x32xf32> to vector<1x1x6x8x32xf32>
    %153 = vector.shape_cast %151 : vector<1x2x6x8x32xf32> to vector<96x32xf32>
    %cst_67 = arith.constant dense<0.000000e+00> : vector<96x8xf32>
    %154 = tpu.matmul %153, %24, %cst_67 {dimension_numbers = #tpu.dot_dimension_numbers<[1], [0], [0], [1], [0, 0, 1, 1], [], []>} : vector<96x32xf32>, vector<32x8xf32>, vector<96x8xf32> -> vector<96x8xf32>
    %cst_68 = arith.constant 5.000000e-01 : f32
    %155 = vector.broadcast %cst_68 : f32 to vector<96x8xf32>
    %156 = arith.mulf %154, %155 : vector<96x8xf32>
    %157 = vector.shape_cast %156 : vector<96x8xf32> to vector<1x2x6x8x8xf32>
    %cst_69 = arith.constant dense<0xFF800000> : vector<1x2x8x8xf32>
    %158 = vector.multi_reduction <maximumf>, %157, %cst_69 [2] : vector<1x2x6x8x8xf32> to vector<1x2x8x8xf32>
    %159 = vector.shape_cast %158 : vector<1x2x8x8xf32> to vector<1x2x1x8x8xf32>
    %160 = vector.broadcast %159 : vector<1x2x1x8x8xf32> to vector<1x2x6x8x8xf32>
    %161 = arith.subf %157, %160 : vector<1x2x6x8x8xf32>
    %162 = math.exp %161 : vector<1x2x6x8x8xf32>
    %cst_70 = arith.constant dense<0.000000e+00> : vector<1x2x8x8xf32>
    %163 = vector.multi_reduction <add>, %162, %cst_70 [2] : vector<1x2x6x8x8xf32> to vector<1x2x8x8xf32>
    %164 = vector.shape_cast %163 : vector<1x2x8x8xf32> to vector<1x2x1x8x8xf32>
    %165 = tpu.reciprocal %164 {approx = true} : vector<1x2x1x8x8xf32> -> vector<1x2x1x8x8xf32>
    %166 = vector.broadcast %165 : vector<1x2x1x8x8xf32> to vector<1x2x6x8x8xf32>
    %167 = arith.mulf %162, %166 : vector<1x2x6x8x8xf32>
    %168 = vector.shape_cast %167 : vector<1x2x6x8x8xf32> to vector<96x8xf32>
    %cst_71 = arith.constant dense<0.000000e+00> : vector<96x32xf32>
    %169 = tpu.matmul %168, %25, %cst_71 {dimension_numbers = #tpu.dot_dimension_numbers<[1], [0], [0], [1], [0, 0, 1, 1], [], []>} : vector<96x8xf32>, vector<8x32xf32>, vector<96x32xf32> -> vector<96x32xf32>
    %170 = vector.shape_cast %169 : vector<96x32xf32> to vector<1x2x6x8x32xf32>
    %171 = vector.broadcast %152 : vector<1x1x6x8x32xf32> to vector<1x2x6x8x32xf32>
    %172 = arith.mulf %170, %171 : vector<1x2x6x8x32xf32>
    %cst_72 = arith.constant dense<0.000000e+00> : vector<1x2x8x32xf32>
    %173 = vector.multi_reduction <add>, %172, %cst_72 [2] : vector<1x2x6x8x32xf32> to vector<1x2x8x32xf32>
    %174 = vector.shape_cast %173 : vector<1x2x8x32xf32> to vector<16x32xf32>
    %cst_73 = arith.constant dense<0.000000e+00> : vector<16x32xf32>
    %175 = tpu.matmul %174, %11, %cst_73 {dimension_numbers = #tpu.dot_dimension_numbers<[1], [0], [0], [1], [0, 0, 1, 1], [], []>} : vector<16x32xf32>, vector<32x32xf32>, vector<16x32xf32> -> vector<16x32xf32>
    %176 = vector.broadcast %13 : vector<1x32xf32> to vector<16x32xf32>
    %177 = arith.addf %175, %176 : vector<16x32xf32>
    %cst_74 = arith.constant 0.000000e+00 : f32
    %178 = vector.broadcast %cst_74 : f32 to vector<16x32xf32>
    %179 = arith.maximumf %177, %178 : vector<16x32xf32>
    %cst_75 = arith.constant dense<0.000000e+00> : vector<16x96xf32>
    %180 = tpu.matmul %179, %22, %cst_75 {dimension_numbers = #tpu.dot_dimension_numbers<[1], [0], [0], [1], [0, 0, 1, 1], [], []>} : vector<16x32xf32>, vector<32x96xf32>, vector<16x96xf32> -> vector<16x96xf32>
    %181 = vector.broadcast %23 : vector<1x96xf32> to vector<16x96xf32>
    %182 = arith.addf %180, %181 : vector<16x96xf32>
    %183 = vector.extract_strided_slice %182 {offsets = [0, 0], sizes = [16, 32], strides = [1, 1]} : vector<16x96xf32> to vector<16x32xf32>
    %184 = vector.extract_strided_slice %182 {offsets = [0, 32], sizes = [16, 32], strides = [1, 1]} : vector<16x96xf32> to vector<16x32xf32>
    %185 = vector.shape_cast %184 : vector<16x32xf32> to vector<1x2x8x32xf32>
    %186 = vector.extract_strided_slice %182 {offsets = [0, 64], sizes = [16, 32], strides = [1, 1]} : vector<16x96xf32> to vector<16x32xf32>
    %187 = vector.shape_cast %186 : vector<16x32xf32> to vector<1x2x8x32xf32>
    %188 = vector.shape_cast %183 : vector<16x32xf32> to vector<1x2x8x32xf32>
    %189 = vector.shape_cast %188 : vector<1x2x8x32xf32> to vector<1x2x1x8x32xf32>
    %190 = vector.shape_cast %185 : vector<1x2x8x32xf32> to vector<1x2x8x1x32xf32>
    %191 = vector.broadcast %189 : vector<1x2x1x8x32xf32> to vector<1x2x8x8x32xf32>
    %192 = vector.broadcast %190 : vector<1x2x8x1x32xf32> to vector<1x2x8x8x32xf32>
    %193 = arith.mulf %191, %192 : vector<1x2x8x8x32xf32>
    %194 = vector.shape_cast %187 : vector<1x2x8x32xf32> to vector<1x2x8x1x32xf32>
    %195 = vector.shape_cast %193 : vector<1x2x8x8x32xf32> to vector<128x32xf32>
    %cst_76 = arith.constant dense<0.000000e+00> : vector<128x8xf32>
    %196 = tpu.matmul %195, %24, %cst_76 {dimension_numbers = #tpu.dot_dimension_numbers<[1], [0], [0], [1], [0, 0, 1, 1], [], []>} : vector<128x32xf32>, vector<32x8xf32>, vector<128x8xf32> -> vector<128x8xf32>
    %cst_77 = arith.constant 5.000000e-01 : f32
    %197 = vector.broadcast %cst_77 : f32 to vector<128x8xf32>
    %198 = arith.mulf %196, %197 : vector<128x8xf32>
    %199 = vector.shape_cast %198 : vector<128x8xf32> to vector<1x2x8x8x8xf32>
    %cst_78 = arith.constant dense<0xFF800000> : vector<1x2x8x8xf32>
    %200 = vector.multi_reduction <maximumf>, %199, %cst_78 [2] : vector<1x2x8x8x8xf32> to vector<1x2x8x8xf32>
    %201 = vector.shape_cast %200 : vector<1x2x8x8xf32> to vector<1x2x1x8x8xf32>
    %202 = vector.broadcast %201 : vector<1x2x1x8x8xf32> to vector<1x2x8x8x8xf32>
    %203 = arith.subf %199, %202 : vector<1x2x8x8x8xf32>
    %204 = math.exp %203 : vector<1x2x8x8x8xf32>
    %cst_79 = arith.constant dense<0.000000e+00> : vector<1x2x8x8xf32>
    %205 = vector.multi_reduction <add>, %204, %cst_79 [2] : vector<1x2x8x8x8xf32> to vector<1x2x8x8xf32>
    %206 = vector.shape_cast %205 : vector<1x2x8x8xf32> to vector<1x2x1x8x8xf32>
    %207 = tpu.reciprocal %206 {approx = true} : vector<1x2x1x8x8xf32> -> vector<1x2x1x8x8xf32>
    %208 = vector.broadcast %207 : vector<1x2x1x8x8xf32> to vector<1x2x8x8x8xf32>
    %209 = arith.mulf %204, %208 : vector<1x2x8x8x8xf32>
    %210 = vector.shape_cast %209 : vector<1x2x8x8x8xf32> to vector<128x8xf32>
    %cst_80 = arith.constant dense<0.000000e+00> : vector<128x32xf32>
    %211 = tpu.matmul %210, %25, %cst_80 {dimension_numbers = #tpu.dot_dimension_numbers<[1], [0], [0], [1], [0, 0, 1, 1], [], []>} : vector<128x8xf32>, vector<8x32xf32>, vector<128x32xf32> -> vector<128x32xf32>
    %212 = vector.shape_cast %211 : vector<128x32xf32> to vector<1x2x8x8x32xf32>
    %213 = vector.broadcast %194 : vector<1x2x8x1x32xf32> to vector<1x2x8x8x32xf32>
    %214 = arith.mulf %212, %213 : vector<1x2x8x8x32xf32>
    %cst_81 = arith.constant dense<0.000000e+00> : vector<1x2x8x32xf32>
    %215 = vector.multi_reduction <add>, %214, %cst_81 [2] : vector<1x2x8x8x32xf32> to vector<1x2x8x32xf32>
    %216 = vector.shape_cast %215 : vector<1x2x8x32xf32> to vector<16x32xf32>
    %cst_82 = arith.constant dense<0.000000e+00> : vector<16x32xf32>
    %217 = tpu.matmul %216, %15, %cst_82 {dimension_numbers = #tpu.dot_dimension_numbers<[1], [0], [0], [1], [0, 0, 1, 1], [], []>} : vector<16x32xf32>, vector<32x32xf32>, vector<16x32xf32> -> vector<16x32xf32>
    %218 = vector.broadcast %17 : vector<1x32xf32> to vector<16x32xf32>
    %219 = arith.addf %217, %218 : vector<16x32xf32>
    %cst_83 = arith.constant 0.000000e+00 : f32
    %220 = vector.broadcast %cst_83 : f32 to vector<16x32xf32>
    %221 = arith.maximumf %219, %220 : vector<16x32xf32>
    %cst_84 = arith.constant dense<0.000000e+00> : vector<16x64xf32>
    %222 = tpu.matmul %221, %7, %cst_84 {dimension_numbers = #tpu.dot_dimension_numbers<[1], [0], [0], [1], [0, 0, 1, 1], [], []>} : vector<16x32xf32>, vector<32x64xf32>, vector<16x64xf32> -> vector<16x64xf32>
    %223 = vector.broadcast %9 : vector<1x64xf32> to vector<16x64xf32>
    %224 = arith.addf %222, %223 : vector<16x64xf32>
    %225 = vector.extract_strided_slice %224 {offsets = [0, 0], sizes = [16, 32], strides = [1, 1]} : vector<16x64xf32> to vector<16x32xf32>
    %226 = vector.extract_strided_slice %224 {offsets = [0, 32], sizes = [16, 32], strides = [1, 1]} : vector<16x64xf32> to vector<16x32xf32>
    %cst_85 = arith.constant 0.000000e+00 : f32
    %227 = vector.broadcast %cst_85 : f32 to vector<16x32xf32>
    %228 = arith.maximumf %226, %227 : vector<16x32xf32>
    %cst_86 = arith.constant dense<0.000000e+00> : vector<16x32xf32>
    %229 = tpu.matmul %228, %19, %cst_86 {dimension_numbers = #tpu.dot_dimension_numbers<[1], [0], [0], [1], [0, 0, 1, 1], [], []>} : vector<16x32xf32>, vector<32x32xf32>, vector<16x32xf32> -> vector<16x32xf32>
    %230 = vector.broadcast %21 : vector<1x32xf32> to vector<16x32xf32>
    %231 = arith.addf %229, %230 : vector<16x32xf32>
    %232 = arith.negf %231 : vector<16x32xf32>
    %233 = math.exp %232 : vector<16x32xf32>
    %cst_87 = arith.constant 1.000000e+00 : f32
    %234 = vector.broadcast %cst_87 : f32 to vector<16x32xf32>
    %235 = arith.addf %234, %233 : vector<16x32xf32>
    %236 = arith.divf %234, %235 : vector<16x32xf32>
    %237 = arith.mulf %236, %225 : vector<16x32xf32>
    %238 = vector.shape_cast %237 : vector<16x32xf32> to vector<1x2x8x32xf32>
    %cst_88 = arith.constant dense<0.000000e+00> : vector<1x8x32xf32>
    %239 = vector.multi_reduction <add>, %238, %cst_88 [1] : vector<1x2x8x32xf32> to vector<1x8x32xf32>
    %240 = vector.shape_cast %239 : vector<1x8x32xf32> to vector<1x1x8x32xf32>
    %241 = vector.extract_strided_slice %0 {offsets = [0, 8, 0, 0], sizes = [1, 4, 8, 32], strides = [1, 1, 1, 1]} : vector<1x12x8x32xf32> to vector<1x4x8x32xf32>
    %242 = vector.extract_strided_slice %1 {offsets = [0, 4, 0, 0], sizes = [1, 2, 8, 32], strides = [1, 1, 1, 1]} : vector<1x6x8x32xf32> to vector<1x2x8x32xf32>
    %243 = vector.broadcast %240 : vector<1x1x8x32xf32> to vector<1x2x8x32xf32>
    %244 = arith.addf %242, %243 : vector<1x2x8x32xf32>
    %245 = tpu.concatenate %244, %241 in 1 : vector<1x2x8x32xf32>, vector<1x4x8x32xf32> -> vector<1x6x8x32xf32>
    %246 = vector.shape_cast %245 : vector<1x6x8x32xf32> to vector<48x32xf32>
    %cst_89 = arith.constant dense<0.000000e+00> : vector<48x64xf32>
    %247 = tpu.matmul %246, %3, %cst_89 {dimension_numbers = #tpu.dot_dimension_numbers<[1], [0], [0], [1], [0, 0, 1, 1], [], []>} : vector<48x32xf32>, vector<32x64xf32>, vector<48x64xf32> -> vector<48x64xf32>
    %248 = vector.broadcast %5 : vector<1x64xf32> to vector<48x64xf32>
    %249 = arith.addf %247, %248 : vector<48x64xf32>
    %250 = vector.extract_strided_slice %249 {offsets = [0, 0], sizes = [48, 32], strides = [1, 1]} : vector<48x64xf32> to vector<48x32xf32>
    %251 = vector.shape_cast %250 : vector<48x32xf32> to vector<1x6x8x32xf32>
    %252 = vector.extract_strided_slice %249 {offsets = [0, 32], sizes = [48, 32], strides = [1, 1]} : vector<48x64xf32> to vector<48x32xf32>
    %253 = vector.shape_cast %252 : vector<48x32xf32> to vector<1x6x8x32xf32>
    %254 = vector.shape_cast %244 : vector<1x2x8x32xf32> to vector<1x2x1x8x32xf32>
    %255 = vector.shape_cast %251 : vector<1x6x8x32xf32> to vector<1x1x6x8x32xf32>
    %256 = vector.broadcast %254 : vector<1x2x1x8x32xf32> to vector<1x2x6x8x32xf32>
    %257 = vector.broadcast %255 : vector<1x1x6x8x32xf32> to vector<1x2x6x8x32xf32>
    %258 = arith.mulf %256, %257 : vector<1x2x6x8x32xf32>
    %259 = vector.shape_cast %253 : vector<1x6x8x32xf32> to vector<1x1x6x8x32xf32>
    %260 = vector.shape_cast %258 : vector<1x2x6x8x32xf32> to vector<96x32xf32>
    %cst_90 = arith.constant dense<0.000000e+00> : vector<96x8xf32>
    %261 = tpu.matmul %260, %24, %cst_90 {dimension_numbers = #tpu.dot_dimension_numbers<[1], [0], [0], [1], [0, 0, 1, 1], [], []>} : vector<96x32xf32>, vector<32x8xf32>, vector<96x8xf32> -> vector<96x8xf32>
    %cst_91 = arith.constant 5.000000e-01 : f32
    %262 = vector.broadcast %cst_91 : f32 to vector<96x8xf32>
    %263 = arith.mulf %261, %262 : vector<96x8xf32>
    %264 = vector.shape_cast %263 : vector<96x8xf32> to vector<1x2x6x8x8xf32>
    %cst_92 = arith.constant dense<0xFF800000> : vector<1x2x8x8xf32>
    %265 = vector.multi_reduction <maximumf>, %264, %cst_92 [2] : vector<1x2x6x8x8xf32> to vector<1x2x8x8xf32>
    %266 = vector.shape_cast %265 : vector<1x2x8x8xf32> to vector<1x2x1x8x8xf32>
    %267 = vector.broadcast %266 : vector<1x2x1x8x8xf32> to vector<1x2x6x8x8xf32>
    %268 = arith.subf %264, %267 : vector<1x2x6x8x8xf32>
    %269 = math.exp %268 : vector<1x2x6x8x8xf32>
    %cst_93 = arith.constant dense<0.000000e+00> : vector<1x2x8x8xf32>
    %270 = vector.multi_reduction <add>, %269, %cst_93 [2] : vector<1x2x6x8x8xf32> to vector<1x2x8x8xf32>
    %271 = vector.shape_cast %270 : vector<1x2x8x8xf32> to vector<1x2x1x8x8xf32>
    %272 = tpu.reciprocal %271 {approx = true} : vector<1x2x1x8x8xf32> -> vector<1x2x1x8x8xf32>
    %273 = vector.broadcast %272 : vector<1x2x1x8x8xf32> to vector<1x2x6x8x8xf32>
    %274 = arith.mulf %269, %273 : vector<1x2x6x8x8xf32>
    %275 = vector.shape_cast %274 : vector<1x2x6x8x8xf32> to vector<96x8xf32>
    %cst_94 = arith.constant dense<0.000000e+00> : vector<96x32xf32>
    %276 = tpu.matmul %275, %25, %cst_94 {dimension_numbers = #tpu.dot_dimension_numbers<[1], [0], [0], [1], [0, 0, 1, 1], [], []>} : vector<96x8xf32>, vector<8x32xf32>, vector<96x32xf32> -> vector<96x32xf32>
    %277 = vector.shape_cast %276 : vector<96x32xf32> to vector<1x2x6x8x32xf32>
    %278 = vector.broadcast %259 : vector<1x1x6x8x32xf32> to vector<1x2x6x8x32xf32>
    %279 = arith.mulf %277, %278 : vector<1x2x6x8x32xf32>
    %cst_95 = arith.constant dense<0.000000e+00> : vector<1x2x8x32xf32>
    %280 = vector.multi_reduction <add>, %279, %cst_95 [2] : vector<1x2x6x8x32xf32> to vector<1x2x8x32xf32>
    %281 = vector.shape_cast %280 : vector<1x2x8x32xf32> to vector<16x32xf32>
    %cst_96 = arith.constant dense<0.000000e+00> : vector<16x32xf32>
    %282 = tpu.matmul %281, %11, %cst_96 {dimension_numbers = #tpu.dot_dimension_numbers<[1], [0], [0], [1], [0, 0, 1, 1], [], []>} : vector<16x32xf32>, vector<32x32xf32>, vector<16x32xf32> -> vector<16x32xf32>
    %283 = vector.broadcast %13 : vector<1x32xf32> to vector<16x32xf32>
    %284 = arith.addf %282, %283 : vector<16x32xf32>
    %cst_97 = arith.constant 0.000000e+00 : f32
    %285 = vector.broadcast %cst_97 : f32 to vector<16x32xf32>
    %286 = arith.maximumf %284, %285 : vector<16x32xf32>
    %cst_98 = arith.constant dense<0.000000e+00> : vector<16x96xf32>
    %287 = tpu.matmul %286, %22, %cst_98 {dimension_numbers = #tpu.dot_dimension_numbers<[1], [0], [0], [1], [0, 0, 1, 1], [], []>} : vector<16x32xf32>, vector<32x96xf32>, vector<16x96xf32> -> vector<16x96xf32>
    %288 = vector.broadcast %23 : vector<1x96xf32> to vector<16x96xf32>
    %289 = arith.addf %287, %288 : vector<16x96xf32>
    %290 = vector.extract_strided_slice %289 {offsets = [0, 0], sizes = [16, 32], strides = [1, 1]} : vector<16x96xf32> to vector<16x32xf32>
    %291 = vector.extract_strided_slice %289 {offsets = [0, 32], sizes = [16, 32], strides = [1, 1]} : vector<16x96xf32> to vector<16x32xf32>
    %292 = vector.shape_cast %291 : vector<16x32xf32> to vector<1x2x8x32xf32>
    %293 = vector.extract_strided_slice %289 {offsets = [0, 64], sizes = [16, 32], strides = [1, 1]} : vector<16x96xf32> to vector<16x32xf32>
    %294 = vector.shape_cast %293 : vector<16x32xf32> to vector<1x2x8x32xf32>
    %295 = vector.shape_cast %290 : vector<16x32xf32> to vector<1x2x8x32xf32>
    %296 = vector.shape_cast %295 : vector<1x2x8x32xf32> to vector<1x2x1x8x32xf32>
    %297 = vector.shape_cast %292 : vector<1x2x8x32xf32> to vector<1x2x8x1x32xf32>
    %298 = vector.broadcast %296 : vector<1x2x1x8x32xf32> to vector<1x2x8x8x32xf32>
    %299 = vector.broadcast %297 : vector<1x2x8x1x32xf32> to vector<1x2x8x8x32xf32>
    %300 = arith.mulf %298, %299 : vector<1x2x8x8x32xf32>
    %301 = vector.shape_cast %294 : vector<1x2x8x32xf32> to vector<1x2x8x1x32xf32>
    %302 = vector.shape_cast %300 : vector<1x2x8x8x32xf32> to vector<128x32xf32>
    %cst_99 = arith.constant dense<0.000000e+00> : vector<128x8xf32>
    %303 = tpu.matmul %302, %24, %cst_99 {dimension_numbers = #tpu.dot_dimension_numbers<[1], [0], [0], [1], [0, 0, 1, 1], [], []>} : vector<128x32xf32>, vector<32x8xf32>, vector<128x8xf32> -> vector<128x8xf32>
    %cst_100 = arith.constant 5.000000e-01 : f32
    %304 = vector.broadcast %cst_100 : f32 to vector<128x8xf32>
    %305 = arith.mulf %303, %304 : vector<128x8xf32>
    %306 = vector.shape_cast %305 : vector<128x8xf32> to vector<1x2x8x8x8xf32>
    %cst_101 = arith.constant dense<0xFF800000> : vector<1x2x8x8xf32>
    %307 = vector.multi_reduction <maximumf>, %306, %cst_101 [2] : vector<1x2x8x8x8xf32> to vector<1x2x8x8xf32>
    %308 = vector.shape_cast %307 : vector<1x2x8x8xf32> to vector<1x2x1x8x8xf32>
    %309 = vector.broadcast %308 : vector<1x2x1x8x8xf32> to vector<1x2x8x8x8xf32>
    %310 = arith.subf %306, %309 : vector<1x2x8x8x8xf32>
    %311 = math.exp %310 : vector<1x2x8x8x8xf32>
    %cst_102 = arith.constant dense<0.000000e+00> : vector<1x2x8x8xf32>
    %312 = vector.multi_reduction <add>, %311, %cst_102 [2] : vector<1x2x8x8x8xf32> to vector<1x2x8x8xf32>
    %313 = vector.shape_cast %312 : vector<1x2x8x8xf32> to vector<1x2x1x8x8xf32>
    %314 = tpu.reciprocal %313 {approx = true} : vector<1x2x1x8x8xf32> -> vector<1x2x1x8x8xf32>
    %315 = vector.broadcast %314 : vector<1x2x1x8x8xf32> to vector<1x2x8x8x8xf32>
    %316 = arith.mulf %311, %315 : vector<1x2x8x8x8xf32>
    %317 = vector.shape_cast %316 : vector<1x2x8x8x8xf32> to vector<128x8xf32>
    %cst_103 = arith.constant dense<0.000000e+00> : vector<128x32xf32>
    %318 = tpu.matmul %317, %25, %cst_103 {dimension_numbers = #tpu.dot_dimension_numbers<[1], [0], [0], [1], [0, 0, 1, 1], [], []>} : vector<128x8xf32>, vector<8x32xf32>, vector<128x32xf32> -> vector<128x32xf32>
    %319 = vector.shape_cast %318 : vector<128x32xf32> to vector<1x2x8x8x32xf32>
    %320 = vector.broadcast %301 : vector<1x2x8x1x32xf32> to vector<1x2x8x8x32xf32>
    %321 = arith.mulf %319, %320 : vector<1x2x8x8x32xf32>
    %cst_104 = arith.constant dense<0.000000e+00> : vector<1x2x8x32xf32>
    %322 = vector.multi_reduction <add>, %321, %cst_104 [2] : vector<1x2x8x8x32xf32> to vector<1x2x8x32xf32>
    %323 = vector.shape_cast %322 : vector<1x2x8x32xf32> to vector<16x32xf32>
    %cst_105 = arith.constant dense<0.000000e+00> : vector<16x32xf32>
    %324 = tpu.matmul %323, %15, %cst_105 {dimension_numbers = #tpu.dot_dimension_numbers<[1], [0], [0], [1], [0, 0, 1, 1], [], []>} : vector<16x32xf32>, vector<32x32xf32>, vector<16x32xf32> -> vector<16x32xf32>
    %325 = vector.broadcast %17 : vector<1x32xf32> to vector<16x32xf32>
    %326 = arith.addf %324, %325 : vector<16x32xf32>
    %cst_106 = arith.constant 0.000000e+00 : f32
    %327 = vector.broadcast %cst_106 : f32 to vector<16x32xf32>
    %328 = arith.maximumf %326, %327 : vector<16x32xf32>
    %cst_107 = arith.constant dense<0.000000e+00> : vector<16x64xf32>
    %329 = tpu.matmul %328, %7, %cst_107 {dimension_numbers = #tpu.dot_dimension_numbers<[1], [0], [0], [1], [0, 0, 1, 1], [], []>} : vector<16x32xf32>, vector<32x64xf32>, vector<16x64xf32> -> vector<16x64xf32>
    %330 = vector.broadcast %9 : vector<1x64xf32> to vector<16x64xf32>
    %331 = arith.addf %329, %330 : vector<16x64xf32>
    %332 = vector.extract_strided_slice %331 {offsets = [0, 0], sizes = [16, 32], strides = [1, 1]} : vector<16x64xf32> to vector<16x32xf32>
    %333 = vector.extract_strided_slice %331 {offsets = [0, 32], sizes = [16, 32], strides = [1, 1]} : vector<16x64xf32> to vector<16x32xf32>
    %cst_108 = arith.constant 0.000000e+00 : f32
    %334 = vector.broadcast %cst_108 : f32 to vector<16x32xf32>
    %335 = arith.maximumf %333, %334 : vector<16x32xf32>
    %cst_109 = arith.constant dense<0.000000e+00> : vector<16x32xf32>
    %336 = tpu.matmul %335, %19, %cst_109 {dimension_numbers = #tpu.dot_dimension_numbers<[1], [0], [0], [1], [0, 0, 1, 1], [], []>} : vector<16x32xf32>, vector<32x32xf32>, vector<16x32xf32> -> vector<16x32xf32>
    %337 = vector.broadcast %21 : vector<1x32xf32> to vector<16x32xf32>
    %338 = arith.addf %336, %337 : vector<16x32xf32>
    %339 = arith.negf %338 : vector<16x32xf32>
    %340 = math.exp %339 : vector<16x32xf32>
    %cst_110 = arith.constant 1.000000e+00 : f32
    %341 = vector.broadcast %cst_110 : f32 to vector<16x32xf32>
    %342 = arith.addf %341, %340 : vector<16x32xf32>
    %343 = arith.divf %341, %342 : vector<16x32xf32>
    %344 = arith.mulf %343, %332 : vector<16x32xf32>
    %345 = vector.shape_cast %344 : vector<16x32xf32> to vector<1x2x8x32xf32>
    %cst_111 = arith.constant dense<0.000000e+00> : vector<1x8x32xf32>
    %346 = vector.multi_reduction <add>, %345, %cst_111 [1] : vector<1x2x8x32xf32> to vector<1x8x32xf32>
    %347 = vector.shape_cast %346 : vector<1x8x32xf32> to vector<1x1x8x32xf32>
    %348 = tpu.concatenate %133, %240, %347 in 1 : vector<1x1x8x32xf32>, vector<1x1x8x32xf32>, vector<1x1x8x32xf32> -> vector<1x3x8x32xf32>
    %c0_112 = arith.constant 0 : index
    %c0_113 = arith.constant 0 : index
    %c0_114 = arith.constant 0 : index
    %c0_115 = arith.constant 0 : index
    %349 = vector.load %arg11[%c0_112, %c0_113, %c0_114, %c0_115] : memref<1x3x8x32xf32, #tpu.memory_space<vmem>>, vector<1x3x8x32xf32>
    tpu.vector_store %arg11[%c0_112, %c0_113, %c0_114, %c0_115], %348 {strides = array<i32>} : memref<1x3x8x32xf32, #tpu.memory_space<vmem>>, vector<1x3x8x32xf32>,
    return
  }
  func.func @transform_0(%arg0: i32) -> (i32, i32, i32, i32) {
    %c0_i32 = arith.constant 0 : i32
    %c0_i32_0 = arith.constant 0 : i32
    %c0_i32_1 = arith.constant 0 : i32
    %c0_i32_2 = arith.constant 0 : i32
    return %arg0, %c0_i32, %c0_i32_0, %c0_i32_1 : i32, i32, i32, i32
  }
  func.func @transform_1(%arg0: i32) -> (i32, i32, i32, i32) {
    %c0_i32 = arith.constant 0 : i32
    %c0_i32_0 = arith.constant 0 : i32
    %c0_i32_1 = arith.constant 0 : i32
    %c0_i32_2 = arith.constant 0 : i32
    %c0_i32_3 = arith.constant 0 : i32
    return %c0_i32, %c0_i32_0, %c0_i32_1, %c0_i32_2 : i32, i32, i32, i32
  }
  func.func @transform_2(%arg0: i32) -> (i32, i32, i32) {
    %c0_i32 = arith.constant 0 : i32
    %c0_i32_0 = arith.constant 0 : i32
    %c0_i32_1 = arith.constant 0 : i32
    %c0_i32_2 = arith.constant 0 : i32
    return %c0_i32, %c0_i32_0, %c0_i32_1 : i32, i32, i32
  }
  func.func @transform_3(%arg0: i32) -> (i32, i32, i32) {
    %c0_i32 = arith.constant 0 : i32
    %c0_i32_0 = arith.constant 0 : i32
    %c0_i32_1 = arith.constant 0 : i32
    %c0_i32_2 = arith.constant 0 : i32
    return %c0_i32, %c0_i32_0, %c0_i32_1 : i32, i32, i32
  }
  func.func @transform_4(%arg0: i32) -> (i32, i32, i32) {
    %c0_i32 = arith.constant 0 : i32
    %c0_i32_0 = arith.constant 0 : i32
    %c0_i32_1 = arith.constant 0 : i32
    %c0_i32_2 = arith.constant 0 : i32
    return %c0_i32, %c0_i32_0, %c0_i32_1 : i32, i32, i32
  }
  func.func @transform_5(%arg0: i32) -> (i32, i32, i32) {
    %c0_i32 = arith.constant 0 : i32
    %c0_i32_0 = arith.constant 0 : i32
    %c0_i32_1 = arith.constant 0 : i32
    %c0_i32_2 = arith.constant 0 : i32
    return %c0_i32, %c0_i32_0, %c0_i32_1 : i32, i32, i32
  }
  func.func @transform_6(%arg0: i32) -> (i32, i32) {
    %c0_i32 = arith.constant 0 : i32
    %c0_i32_0 = arith.constant 0 : i32
    %c0_i32_1 = arith.constant 0 : i32
    return %c0_i32, %c0_i32_0 : i32, i32
  }
  func.func @transform_7(%arg0: i32) -> (i32, i32) {
    %c0_i32 = arith.constant 0 : i32
    %c0_i32_0 = arith.constant 0 : i32
    %c0_i32_1 = arith.constant 0 : i32
    return %c0_i32, %c0_i32_0 : i32, i32
  }
  func.func @transform_8(%arg0: i32) -> (i32, i32) {
    %c0_i32 = arith.constant 0 : i32
    %c0_i32_0 = arith.constant 0 : i32
    %c0_i32_1 = arith.constant 0 : i32
    return %c0_i32, %c0_i32_0 : i32, i32
  }
  func.func @transform_9(%arg0: i32) -> (i32, i32) {
    %c0_i32 = arith.constant 0 : i32
    %c0_i32_0 = arith.constant 0 : i32
    %c0_i32_1 = arith.constant 0 : i32
    return %c0_i32, %c0_i32_0 : i32, i32
  }
  func.func @transform_10(%arg0: i32) -> (i32, i32, i32, i32) {
    %c0_i32 = arith.constant 0 : i32
    %c0_i32_0 = arith.constant 0 : i32
    %c0_i32_1 = arith.constant 0 : i32
    %c0_i32_2 = arith.constant 0 : i32
    return %arg0, %c0_i32, %c0_i32_0, %c0_i32_1 : i32, i32, i32, i32
  }
}

</mosaic_0001>

<bundles_post_ra>
// kernel: tpu_custom_call.1
= control target key start
LH: loop header
LB: loop body
LE: loop exit
PB: predicated region body
PF: predicated region fallthrough
CT: control target
= control target key end

     0   :  { %s9555_s0 = inlined_call_operand.hbm [shape: f32[2,12,8,32], index: 0, kind: input, shape index: {}]   ;;  %s9556_s1 = inlined_call_operand.hbm [shape: f32[1,6,8,32], index: 1, kind: input, shape index: {}]   ;;  %s9557_s2 = inlined_call_operand.hbm [shape: f32[3,32,32], index: 2, kind: input, shape index: {}]   ;;  %s9558_s3 = inlined_call_operand.vmem [shape: f32[3,1,32], index: 3, kind: input, shape index: {}]   ;;  %s9559_s4 = inlined_call_operand.hbm [shape: f32[2,32,64], index: 4, kind: input, shape index: {}]   ;;  %s9560_s5 = inlined_call_operand.vmem [shape: f32[2,1,64], index: 5, kind: input, shape index: {}]   ;;  %s9561_s6 = inlined_call_operand.vmem [shape: f32[32,96], index: 6, kind: input, shape index: {}]   ;;  %s9562_s7 = inlined_call_operand.vmem [shape: f32[1,96], index: 7, kind: input, shape index: {}]   ;;  %s9563_s8 = inlined_call_operand.vmem [shape: f32[32,8], index: 8, kind: input, shape index: {}]   ;;  %s9564_s9 = inlined_call_operand.vmem [shape: f32[8,32], index: 9, kind: input, shape index: {}]   ;;  %s9565_s10 = inlined_call_operand.hbm [shape: f32[2,3,8,32], index: 10, kind: output, shape index: {}]  }
   0x1   :  { %9575 = sst [smem:[#allocation17_spill]] %s9562_s7 }
   0x2   :  { %9576 = sst [smem:[#allocation18_spill]] %s9565_s10 }
   0x3   :  { %15 = vsyncpa [#allocation3], 0 }
   0x4   :  { %17 = vsyncpa [#allocation3 + $0x1], 0 }
   0x5   :  { %18 = vsyncpa [#allocation6], 0 }
   0x6   :  { %19 = vsyncpa [#allocation9], 0 }
   0x7   :  { %20 = vsyncpa [#allocation4], 0 }
   0x8   :  { %22 = vsyncpa [#allocation4 + $0x1], 0  ;;  %s8186_s13 = smov 0   ;;  %s8188_s14 = smov 0  }
   0x9   :  { %s8190_s15 = smov 0   ;;  %s8192_s16 = smov 0  }
   0xa LB: > { %9577 = sst [smem:[#allocation15_spill]] %s8105_s13  ;;  %s8207_s17 = sadd.s32 4294967295, %s8117_s16   ;;  %s8117_s16 = sphi %s8192_s16, %s9605_s16   ;;  %s8113_s15 = sphi %s8190_s15, %s9604_s15   ;;  %s8109_s14 = sphi %s8188_s14, %s9603_s14   ;;  %s8105_s13 = sphi %s8186_s13, %s9602_s13  }
   0xb   : > { %s6323_s18 = sadd.s32 4294967294, %s8117_s16   ;;  %p48_p0 = scmp.ne.s32.totalorder %s8109_s14, %s8105_s13 }
   0xc   : > { %p9566_p1 = scmp.eq.s32.totalorder %s8207_s17, 0  ;;  %p267_p3 = scmp.eq.s32.totalorder %s6323_s18, 1 }
   0xd   : > { %p6324_p5 = scmp.ge.s32.totalorder %s8117_s16, 1  ;;  %p274_p7 = scmp.lt.s32.totalorder %s8117_s16, 3 }
   0xe   : > { %p8216_p4 = por %p9566_p1, %p48_p0  ;;  %p8221_p6 = por %p267_p3, %p48_p0 }
   0xf   : > { %p8226_p8 = pnand %p6324_p5, %p274_p7  ;;  %s8119_s22 = smov [#allocation5]  }
  0x10   : > { %s9578_s19 = scalar_select %p8216_p4, 1, 0 }
  0x11   : > { %s9579_s20 = scalar_select %p8221_p6, 1, 0 }
  0x12   : > { %s9581_s21 = scalar_select %p8226_p8, 1, 0 }
  0x13   : > { %9580 = sst [smem:[#allocation16_spill]] %s9579_s20  ;;  %s286_s23 = sshll.u32 %s8119_s22, 4  ;;  %s8230_s23 = int_to_ptr.vmem [resolvable:$true] %s286_s23 }
  0x14   : > { %p7631_p9 = pneg %p8226_p8  ;;  %s8120_s25 = smov [#allocation7]  }
  0x15   : > { %s299_s26 = sshll.u32 %s8120_s25, 4  ;;  %s8121_s27 = smov [#allocation8]   ;;  %s8241_s26 = int_to_ptr.vmem [resolvable:$true] %s299_s26 }
  0x16   : > { %p8237_p11 = pnand %p7631_p9, %p9566_p1  ;;  %s8243_s28 = sshll.u32 %s8121_s27, 4  ;;  %s316_s28 = int_to_ptr.vmem [resolvable:$true] %s8243_s28 }
  0x17   : > { %s7929_s11 = scalar_lea.hbm %s9556_s1, 768 }
  0x18   : > { %p7930_p12 = scmp.ne.s32.totalorder %s9556_s1, %s7929_s11  ;;  %p8253_p13 = pneg %p8237_p11 }
  0x19   : > { %p7936_p5 = scmp.lt.u32.totalorder %s7929_s11, %s9556_s1 }
  0x1a   : > { %p7932_p0 = pnand %p8253_p13, %p7930_p12 }
  0x1c   : > { %p7933_p3 = pneg %p7932_p0 }
  0x1e   : > { %p7938_p7 = pnand %p7936_p5, %p7933_p3 }
  0x20   : > { %7941 = shalt.err (!%p7938_p7)
}
  0x21   : > { %s7942_s29 = scalar_lea.vmem %s8230_s23, 768  ;;  %p7950_p2 = scmp.lt.s32.totalorder %s8230_s23, %s8230_s23 }
  0x22   : > { %p7943_p9 = scmp.ne.s32.totalorder %s8230_s23, %s7942_s29  ;;  %p7951_p6 = scmp.lt.s32.totalorder %s7942_s29, %s7942_s29 }
  0x24   : > { %p7945_p10 = pnand %p7943_p9, %p8253_p13  ;;  %p7952_p12 = por %p7951_p6, %p7950_p2 }
  0x26   : > { %p7946_p1 = pneg %p7945_p10 }
  0x28   : > { %p7953_p0 = pnand %p7952_p12, %p7946_p1 }
  0x2a   : > { %7956 = shalt.err (!%p7953_p0)
}
  0x2b   : > { %s9573_s30 = smov 128   ;;  %s9574_s11 = smov 8  }
  0x2c   : > { %7634 = dma.hbm_to_vmem [thread:$0]  (!%p8237_p11), %s9556_s1, 768, %s8230_s23, [#allocation6], %s9573_s30, %s9573_s30, %s9574_s11  }
  0x2d   : > { %s7957_s29 = scalar_lea.hbm %s9557_s2, 1536 }
  0x2e   : > { %p7958_p1 = scmp.ne.s32.totalorder %s9557_s2, %s7957_s29  ;;  %p7964_p10 = scmp.lt.u32.totalorder %s7957_s29, %s9557_s2 }
  0x30   : > { %p7960_p2 = pnand %p7958_p1, %p8253_p13 }
  0x32   : > { %p7961_p6 = pneg %p7960_p2 }
  0x34   : > { %p7966_p3 = pnand %p7964_p10, %p7961_p6 }
  0x36   : > { %7969 = shalt.err (!%p7966_p3)
}
  0x37   : > { %s7970_s23 = scalar_lea.vmem %s8241_s26, 1536  ;;  %p7978_p12 = scmp.lt.s32.totalorder %s8241_s26, %s8241_s26 }
  0x38   : > { %p7971_p5 = scmp.ne.s32.totalorder %s8241_s26, %s7970_s23  ;;  %p7979_p0 = scmp.lt.s32.totalorder %s7970_s23, %s7970_s23 }
  0x3a   : > { %p7973_p7 = pnand %p7971_p5, %p8253_p13  ;;  %p7980_p1 = por %p7979_p0, %p7978_p12 }
  0x3c   : > { %p7974_p9 = pneg %p7973_p7 }
  0x3e   : > { %p7981_p2 = pnand %p7980_p1, %p7974_p9 }
  0x40   : > { %7984 = shalt.err (!%p7981_p2)
}
  0x41   : > { %7637 = dma.hbm_to_vmem [thread:$0]  (!%p8237_p11), %s9557_s2, 1536, %s8241_s26, [#allocation6], %s9573_s30, %s9573_s30, %s9574_s11  }
  0x42   : > { %s7985_s12 = scalar_lea.hbm %s9559_s4, 1024 }
  0x43   : > { %p7986_p6 = scmp.ne.s32.totalorder %s9559_s4, %s7985_s12  ;;  %p7992_p5 = scmp.lt.u32.totalorder %s7985_s12, %s9559_s4 }
  0x45   : > { %p7988_p10 = pnand %p7986_p6, %p8253_p13 }
  0x47   : > { %p7989_p3 = pneg %p7988_p10 }
  0x49   : > { %p7994_p7 = pnand %p7992_p5, %p7989_p3 }
  0x4b   : > { %7997 = shalt.err (!%p7994_p7)
}
  0x4c   : > { %s7998_s23 = scalar_lea.vmem %s316_s28, 1024  ;;  %p8006_p1 = scmp.lt.s32.totalorder %s316_s28, %s316_s28 }
  0x4d   : > { %p7999_p9 = scmp.ne.s32.totalorder %s316_s28, %s7998_s23  ;;  %p8007_p2 = scmp.lt.s32.totalorder %s7998_s23, %s7998_s23 }
  0x4f   : > { %p8001_p12 = pnand %p7999_p9, %p8253_p13  ;;  %p8008_p4 = por %p8007_p2, %p8006_p1 }
  0x51   : > { %p8002_p0 = pneg %p8001_p12 }
  0x53   : > { %p8009_p8 = pnand %p8008_p4, %p8002_p0 }
  0x55   : > { %8012 = shalt.err (!%p8009_p8)
}
  0x56   : > { %7640 = dma.hbm_to_vmem [thread:$0]  (!%p8237_p11), %s9559_s4, 1024, %s316_s28, [#allocation9], %s9573_s30, %s9573_s30, %s9574_s11  }
  0x57   : > { %s8326_s22 = sadd.s32 1, %s8117_s16   ;;  %s35_s10 = sadd.s32 1, %s8113_s15 }
  0x58   : > { %s32_s24 = ssub.s32 %s8117_s16, %s8326_s22  ;;  %p42_p8 = scmp.ne.s32.totalorder %s8113_s15, %s8109_s14 }
  0x59   : > { %p33_p4 = scmp.eq.s32.totalorder %s32_s24, 0  ;;  %p43_p13 = scmp.eq.s32.totalorder %s8117_s16, 0 }
  0x5a   : > { %p7652_p6 = scmp.lt.s32.totalorder %s8117_s16, 2  ;;  %p9584_p3 = scmp.eq.s32.totalorder %s8207_s17, 1 }
  0x5b   : > { %s8336_s13 = scalar_select %p33_p4, %s8113_s15, %s35_s10  }
  0x5c   : > { %p44_p10 = por %p43_p13, %p42_p8  ;;  %p8340_p5 = por %p9584_p3, %p42_p8 }
  0x5d   : > { %s344_s12 = sand.u32 1, %s8113_s15   ;;  %s7611_s18 = smul.u32 1536, %s8117_s16 }
  0x5e   : > { %s7610_s28 = smul.u32 96, %s344_s12  ;;  %p8346_p11 = pnand %p7652_p6, %p44_p10 }
  0x5f   : > { %s8353_s23 = scalar_lea.hbm %s9555_s0, %s7611_s18  ;;  %s8357_s24 = scalar_lea.sflag [#allocation3], %s344_s12 }
  0x60   : > { %s348_s26 = scalar_lea.vmem [#allocation2], %s7610_s28  ;;  %s8013_s10 = scalar_lea.hbm %s8353_s23, 1536 }
  0x61   : > { %s355_s7 = sshll.u32 %s348_s26, 4  ;;  %p8014_p7 = scmp.ne.s32.totalorder %s8353_s23, %s8013_s10  ;;  %s8355_s7 = int_to_ptr.vmem [resolvable:$true] %s355_s7 }
  0x62   : > { %p8015_p9 = pneg %p8346_p11  ;;  %s8018_s29 = scalar_lea.hbm %s9555_s0, 3072 }
  0x63   : > { %p8019_p1 = scmp.lt.u32.totalorder %s8353_s23, %s9555_s0  ;;  %p8020_p2 = scmp.lt.u32.totalorder %s8018_s29, %s8013_s10 }
  0x64   : > { %p8016_p12 = pnand %p8015_p9, %p8014_p7  ;;  %p8022_p8 = scmp.lt.u32.totalorder %s8013_s10, %s8353_s23 }
  0x65   : > { %p8021_p4 = por %p8020_p2, %p8019_p1 }
  0x66   : > { %p8017_p0 = pneg %p8016_p12 }
  0x67   : > { %p8023_p13 = por %p8022_p8, %p8021_p4 }
  0x69   : > { %p8024_p6 = pnand %p8023_p13, %p8017_p0 }
  0x6b   : > { %8027 = shalt.err (!%p8024_p6)
}
  0x6c   : > { %s8028_s12 = scalar_lea.vmem %s8355_s7, 1536  ;;  %s8124_s28 = smov [#allocation2]  }
  0x6d   : > { %p8029_p10 = scmp.ne.s32.totalorder %s8355_s7, %s8028_s12  ;;  %s8033_s26 = sshll.u32 %s8124_s28, 4  ;;  %s8034_s26 = int_to_ptr.vmem [resolvable:$false] %s8033_s26 }
  0x6e   : > { %s8035_s30 = scalar_lea.vmem %s8034_s26, 3072  ;;  %p8036_p12 = scmp.lt.s32.totalorder %s8355_s7, %s8034_s26 }
  0x6f   : > { %p8031_p3 = pnand %p8029_p10, %p8015_p9  ;;  %p8037_p1 = scmp.lt.s32.totalorder %s8035_s30, %s8028_s12 }
  0x71   : > { %p8032_p7 = pneg %p8031_p3  ;;  %p8038_p2 = por %p8037_p1, %p8036_p12 }
  0x73   : > { %p8039_p4 = pnand %p8038_p2, %p8032_p7 }
  0x75   : > { %8042 = shalt.err (!%p8039_p4)
}
  0x76   : > { %s9587_s11 = smov 8   ;;  %s9588_s10 = smov 128  }
  0x77   : > { %7644 = dma.hbm_to_vmem [thread:$0]  (!%p8346_p11), %s8353_s23, 1536, %s8355_s7, %s8357_s24, %s9588_s10, %s9588_s10, %s9587_s11  }
  0x78   : > { %p9589_p9 = scmp.ne.s32.totalorder %s9581_s21, 0 }
  0x79   : > { %s8391_s18 = sand.u32 (!%p9589_p9), 1, %s8109_s14   ;;  %p9590_p0 = scmp.ne.s32.totalorder (!%p9589_p9), %s9578_s19, 0 }
  0x7a   : > { %367 = sbr.rel (%p9589_p9) target bundleno = 7992 (0x1f38), region = 60  ;;  %s370_s29 = scalar_lea.sflag (!%p9589_p9), [#allocation3], %s8391_s18 }
  0x7b   : > { %s7612_s27 = smul.u32 (!%p9589_p9), 96, %s8391_s18 }
  0x7d   : > { %s8395_s12 = scalar_lea.vmem (!%p9589_p9), [#allocation2], %s7612_s27 }
  0x81   : > { %8088 = dma.done.wait (%p9590_p0), %s370_s29, 1536  }
  0x82   : > { %8090 = vsyncadd (%p9590_p0), %s370_s29, 4294965760  ;;  %p9591_p11 = scmp.eq.s32.totalorder %s8207_s17, 0 }
  0x84   : > { %8092 = dma.done.wait (%p9591_p11), [#allocation6], 2304   ;;  %p9592_p8 = pmov %p9591_p11 }
  0x86   : > { %8094 = vsyncadd (%p9592_p8), [#allocation6], 4294964992  ;;  %p9593_p13 = pmov %p9592_p8 }
  0x87   : > { %p9594_p6 = pmov %p9592_p8 }
  0x88   : > { %8096 = dma.done.wait (%p9593_p13), [#allocation9], 1024  }
  0x89   : > { %8098 = vsyncadd (%p9594_p6), [#allocation9], 4294966272  ;;  %vm489_vm0 = vcmask 261120   ;;  %v440_v0 = vld [vmem:[#allocation8] sm:$0xff]  ;;  %v441_v1 = vld [vmem:[#allocation8 + $0x8] sm:$0xff]  ;;  %s8125_s10 = smov 96  }
  0x8a   : > { %v442_v2 = vld [vmem:[#allocation8 + $0x10] sm:$0xff]  ;;  %v8409_v3 = vpack.c.bf16 %v441_v1, %v440_v0  ;;  %v443_v4 = vld [vmem:[#allocation8 + $0x18] sm:$0xff]  ;;  %v424_v13 = vld [vmem:[%s8395_s12 + $0x10] sm:$0xff]  ;;  %vm788_vm1 = vcmask 64512   ;;  %s9595_s19 = sld [smem:[#allocation17_spill]]  ;;  %s8127_s21 = smov 64  }
  0x8b   : > { %v434_v5 = vld [vmem:[#allocation5] sm:$0xff]  ;;  %v8411_v6 = vpack.c.bf16 %v443_v4, %v442_v2  ;;  %v477_v8 = vld [vmem:[%s9563_s8 + $0x8] sm:$0xff]  ;;  %v425_v14 = vld [vmem:[%s8395_s12 + $0x18] sm:$0xff]  ;;  %s7613_s30 = smul.u32 24, %s8391_s18  ;;  %s9596_s29 = sld [smem:[#allocation18_spill]] }
  0x8c   : > { %6894 = vmatprep.mubr.msk.f32.mxu0 %vm489_vm0, %v434_v5  ;;  %7415 = vmatprep.subr.bf16.mxu0 %v8409_v3  ;;  %v476_v7 = vld [vmem:[%s9563_s8] sm:$0xff]  ;;  %v435_v10 = vld [vmem:[#allocation5 + $0x8] sm:$0xff]  ;;  %v478_v15 = vld [vmem:[%s9563_s8 + $0x10] sm:$0xff]  ;;  %s8128_s23 = smov [#allocation10]  }
  0x8d   : > { %7417 = vmatpush3.bf16.msra.mxu0 %v8409_v3  ;;  %v8422_v9 = vpack.c.bf16 %v477_v8, %v476_v7  ;;  %v422_v11 = vld [vmem:[%s8395_s12] sm:$0xff]  ;;  %v423_v12 = vld [vmem:[%s8395_s12 + $0x8] sm:$0xff]  ;;  %v479_v16 = vld [vmem:[%s9563_s8 + $0x18] sm:$0xff]  ;;  %s8817_s11 = scalar_lea.vmem [#allocation10], %s7613_s30  ;;  %s8047_s7 = sshll.u32 %s8128_s23, 4  ;;  %s8048_s7 = int_to_ptr.vmem [resolvable:$false] %s8047_s7 }
  0x8e   : > { %7419 = vmatprep.subr.bf16.mxu0 %v8411_v6  ;;  %v8443_v17 = vpack.c.bf16 %v479_v16, %v478_v15  ;;  %v6337_v18 = vld [vmem:[%s9560_s5] ss:$0 sm:$0xff]  ;;  %s6221_s30 = sshll.u32 %s8817_s11, 4  ;;  %s8049_s24 = scalar_lea.vmem %s8048_s7, 768  ;;  %s9509_s30 = int_to_ptr.vmem [resolvable:$true] %s6221_s30 }
  0x8f   : > { %7423 = vmatprep.subr.bf16.mxu1 %v8422_v9  ;;  %v8471_v43 = vld [vmem:[%s9564_s9] sm:$0xff]  ;;  %p8050_p12 = scmp.lt.s32.totalorder %s9509_s30, %s8048_s7 }
  0x90   : > { %7425 = vmatpush3.bf16.msra.mxu1 %v8422_v9 }
  0x91   : > { %7421 = vmatpush3.bf16.msra.mxu0 %v8411_v6  ;;  %7427 = vmatprep.subr.bf16.mxu1 %v8443_v17 }
  0x92   : > { %6929 = vmatprep.subr.mxu0 %v8471_v43 }
  0x94   : > { %6895 = vmatmul.mubr.msk.f32.vlgmr.msra.gmra.mrb[0].mxu0 %vm489_vm0, %v435_v10  ;;  %7429 = vmatpush3.bf16.msra.mxu1 %v8443_v17 }
  0x95   : > { %6897 = vmatprep.mubr.msk.f32.mxu0 %vm489_vm0, %v422_v11  ;;  %6930 = vmatpush3.msra.mxu0 %v8471_v43 }
  0x96   : > { %7447 = vmatprep.subr.bf16.mxu0 %v8422_v9 }
  0x98   : > { %6898 = vmatmul.mubr.msk.f32.gmra.mrb[2].mxu0 %vm489_vm0, %v423_v12 }
  0x99   : > { %6900 = vmatprep.mubr.msk.f32.mxu0 %vm489_vm0, %v424_v13 }
  0x9c   : > { %6901 = vmatmul.mubr.msk.f32.gmra.mrb[4].mxu0 %vm489_vm0, %v425_v14 }
 0x167   : > { %v6896_v19 = vpop.f32.mrb[0].mxu0 }
 0x168   : > { %v580_v20 = vadd.f32 %v6896_v19, %v6337_v18  ;;  %v574_v21 = vpop.f32.mrb[1].mxu0 }
 0x169   : > { %v575_v22 = vadd.f32 %v6337_v18, %v574_v21 }
 0x16a   : > { %v604_v25 = vmul.f32 %v580_v20, %v434_v5  ;;  %v610_v38 = vmul.f32 %v580_v20, %v435_v10 }
 0x16b   : > { %1050 = vrot.lane.b32.xlu0 %v575_v22, %s8125_s10  ;;  %v6899_v23 = vpop.f32.mrb[2].mxu0  ;;  %v603_v24 = vmul.f32 %v575_v22, %v434_v5  ;;  %v609_v37 = vmul.f32 %v575_v22, %v435_v10 }
 0x16c   : > { %v590_v26 = vadd.f32 %v6899_v23, %v6337_v18  ;;  %v584_v27 = vpop.f32.mrb[3].mxu0 }
 0x16d   : > { %v585_v28 = vadd.f32 %v6337_v18, %v584_v27  ;;  %6911 = vmatprep.mubr.msk.f32.mxu1 %vm489_vm0, %v603_v24 }
 0x16e   : > { %6912 = vmatmul.mubr.msk.f32.vlgmr.msra.gmra.mrb[0].mxu1 %vm489_vm0, %v604_v25  ;;  %v606_v31 = vmul.f32 %v590_v26, %v434_v5  ;;  %v612_v40 = vmul.f32 %v590_v26, %v435_v10 }
 0x16f   : > { %v605_v29 = vmul.f32 %v585_v28, %v434_v5  ;;  %1052 = vrot.lane.b32.xlu0 %v580_v20, %s8125_s10  ;;  %v6902_v30 = vpop.f32.mrb[4].mxu0  ;;  %1054 = vrot.lane.b32.xlu1 %v585_v28, %s8125_s10  ;;  %v611_v39 = vmul.f32 %v585_v28, %v435_v10 }
 0x170   : > { %v600_v32 = vadd.f32 %v6902_v30, %v6337_v18  ;;  %v594_v33 = vpop.f32.mrb[5].mxu0 }
 0x171   : > { %v595_v34 = vadd.f32 %v6337_v18, %v594_v33  ;;  %6914 = vmatprep.mubr.msk.f32.mxu1 %vm489_vm0, %v605_v29 }
 0x172   : > { %6915 = vmatmul.mubr.msk.f32.gmra.mrb[2].mxu1 %vm489_vm0, %v606_v31  ;;  %v608_v36 = vmul.f32 %v600_v32, %v434_v5  ;;  %v614_v42 = vmul.f32 %v600_v32, %v435_v10 }
 0x173   : > { %v607_v35 = vmul.f32 %v595_v34, %v434_v5  ;;  %1058 = vrot.lane.b32.xlu0 %v595_v34, %s8125_s10  ;;  %1056 = vrot.lane.b32.xlu1 %v590_v26, %s8125_s10  ;;  %v613_v41 = vmul.f32 %v595_v34, %v435_v10 }
 0x175   : > { %6917 = vmatprep.mubr.msk.f32.mxu1 %vm489_vm0, %v607_v35 }
 0x176   : > { %6918 = vmatmul.mubr.msk.f32.gmra.mrb[4].mxu1 %vm489_vm0, %v608_v36 }
 0x177   : > { %1060 = vrot.lane.b32.xlu1 %v600_v32, %s8125_s10  ;;  %6920 = vmatprep.mubr.msk.f32.mxu1 %vm489_vm0, %v609_v37 }
 0x17a   : > { %6921 = vmatmul.mubr.msk.f32.gmra.mrb[6].mxu1 %vm489_vm0, %v610_v38 }
 0x17b   : > { %6923 = vmatprep.mubr.msk.f32.mxu1 %vm489_vm0, %v611_v39 }
 0x17e   : > { %6924 = vmatmul.mubr.msk.f32.gmra.mrb[8].mxu1 %vm489_vm0, %v612_v40 }
 0x17f   : > { %6926 = vmatprep.mubr.msk.f32.mxu1 %vm489_vm0, %v613_v41 }
 0x182   : > { %6927 = vmatmul.mubr.msk.f32.gmra.mrb[10].mxu1 %vm489_vm0, %v614_v42 }
 0x241   : > { %v6913_v44 = vpop.f32.mrb[0].mxu1 }
 0x242   : > { %v717_v45 = vpop.f32.mrb[1].mxu1  ;;  %v777_v46 = vmul.f32 0.5, %v6913_v44 }
 0x243   : > { %v776_v47 = vmul.f32 0.5, %v717_v45 }
 0x244   : > { %v790_v52 = vsel %vm788_vm1, %v777_v46, -inf }
 0x245   : > { %v6916_v48 = vpop.f32.mrb[2].mxu1  ;;  %v789_v54 = vsel %vm788_vm1, %v776_v47, -inf }
 0x246   : > { %v779_v49 = vmul.f32 0.5, %v6916_v48  ;;  %v727_v50 = vpop.f32.mrb[3].mxu1 }
 0x247   : > { %v778_v51 = vmul.f32 0.5, %v727_v50 }
 0x248   : > { %v793_v53 = vsel %vm788_vm1, %v779_v49, -inf }
 0x249   : > { %v794_v55 = vmax.f32 %v790_v52, %v793_v53  ;;  %v791_v56 = vsel %vm788_vm1, %v778_v51, -inf  ;;  %v6919_v57 = vpop.f32.mrb[4].mxu1 }
 0x24a   : > { %v792_v58 = vmax.f32 %v789_v54, %v791_v56  ;;  %v781_v59 = vmul.f32 0.5, %v6919_v57  ;;  %v737_v60 = vpop.f32.mrb[5].mxu1 }
 0x24b   : > { %v780_v61 = vmul.f32 0.5, %v737_v60 }
 0x24c   : > { %v797_v62 = vsel %vm788_vm1, %v781_v59, -inf }
 0x24d   : > { %v798_v63 = vmax.f32 %v794_v55, %v797_v62  ;;  %v795_v0 = vsel %vm788_vm1, %v780_v61, -inf  ;;  %v6922_v1 = vpop.f32.mrb[6].mxu1 }
 0x24e   : > { %v796_v2 = vmax.f32 %v792_v58, %v795_v0  ;;  %v747_v4 = vpop.f32.mrb[7].mxu1  ;;  %v783_v7 = vmul.f32 0.5, %v6922_v1 }
 0x24f   : > { %v782_v8 = vmul.f32 0.5, %v747_v4 }
 0x250   : > { %v799_v5 = vmax.f32 %v796_v2, %v798_v63  ;;  %v801_v25 = vsel %vm788_vm1, %v783_v7, -inf }
 0x251   : > { %v6925_v10 = vpop.f32.mrb[8].mxu1  ;;  %v800_v26 = vsel %vm788_vm1, %v782_v8, -inf }
 0x252   : > { %v811_v11 = vsub.f32 %v776_v47, %v799_v5  ;;  %v812_v12 = vsub.f32 %v777_v46, %v799_v5  ;;  %v813_v13 = vsub.f32 %v778_v51, %v799_v5  ;;  %v814_v14 = vsub.f32 %v779_v49, %v799_v5  ;;  %v757_v15 = vpop.f32.mrb[9].mxu1 }
 0x253   : > { %v815_v16 = vsub.f32 %v780_v61, %v799_v5  ;;  %v816_v18 = vsub.f32 %v781_v59, %v799_v5  ;;  %v785_v19 = vmul.f32 0.5, %v6925_v10  ;;  %v784_v20 = vmul.f32 0.5, %v757_v15 }
 0x254   : > { %v823_v21 = vmul.f32 1.442695, %v811_v11  ;;  %v825_v22 = vmul.f32 1.442695, %v812_v12  ;;  %v827_v23 = vmul.f32 1.442695, %v813_v13 }
 0x255   : > { %v829_v24 = vmul.f32 1.442695, %v814_v14  ;;  %v831_v27 = vmul.f32 1.442695, %v815_v16  ;;  %v804_v28 = vsel %vm788_vm1, %v785_v19, -inf  ;;  %v802_v29 = vsel %vm788_vm1, %v784_v20, -inf }
 0x256   : > { %7699 = vpow2.f32 %v823_v21  ;;  %v6928_v30 = vpop.f32.mrb[10].mxu1  ;;  %v805_v31 = vmax.f32 %v801_v25, %v804_v28  ;;  %v803_v32 = vmax.f32 %v800_v26, %v802_v29  ;;  %v833_v36 = vmul.f32 1.442695, %v816_v18 }
 0x257   : > { %7701 = vpow2.f32 %v825_v22  ;;  %v787_v33 = vmul.f32 0.5, %v6928_v30  ;;  %v767_v34 = vpop.f32.mrb[11].mxu1 }
 0x258   : > { %7703 = vpow2.f32 %v827_v23  ;;  %v786_v35 = vmul.f32 0.5, %v767_v34 }
 0x259   : > { %7705 = vpow2.f32 %v829_v24  ;;  %v808_v37 = vsel %vm788_vm1, %v787_v33, -inf }
 0x25a   : > { %v809_v38 = vmax.f32 %v805_v31, %v808_v37  ;;  %v806_v39 = vsel %vm788_vm1, %v786_v35, -inf  ;;  %7707 = vpow2.f32 %v831_v27 }
 0x25b   : > { %v807_v40 = vmax.f32 %v803_v32, %v806_v39  ;;  %7709 = vpow2.f32 %v833_v36 }
 0x25d   : > { %v810_v41 = vmax.f32 %v807_v40, %v809_v38 }
 0x25f   : > { %v817_v42 = vsub.f32 %v782_v8, %v810_v41  ;;  %v818_v44 = vsub.f32 %v783_v7, %v810_v41  ;;  %v819_v45 = vsub.f32 %v784_v20, %v810_v41  ;;  %v820_v46 = vsub.f32 %v785_v19, %v810_v41 }
 0x260   : > { %v7700_v47 = vpop.eup %7699  ;;  %v821_v48 = vsub.f32 %v786_v35, %v810_v41  ;;  %v822_v49 = vsub.f32 %v787_v33, %v810_v41 }
 0x261   : > { %v7702_v50 = vpop.eup %7701  ;;  %v847_v51 = vsel %vm788_vm1, %v7700_v47, 0.0  ;;  %v835_v52 = vmul.f32 1.442695, %v817_v42  ;;  %v837_v53 = vmul.f32 1.442695, %v818_v44  ;;  %v452_v44 = vld [vmem:[#allocation7] sm:$0xff] }
 0x262   : > { %v7704_v54 = vpop.eup %7703  ;;  %v848_v55 = vsel %vm788_vm1, %v7702_v50, 0.0  ;;  %v839_v56 = vmul.f32 1.442695, %v819_v45  ;;  %v841_v57 = vmul.f32 1.442695, %v820_v46  ;;  %v453_v45 = vld [vmem:[#allocation7 + $0x8] sm:$0xff] }
 0x263   : > { %v7706_v58 = vpop.eup %7705  ;;  %v849_v59 = vadd.f32 %v848_v55, %v847_v51  ;;  %7711 = vpow2.f32 %v835_v52  ;;  %v850_v60 = vsel %vm788_vm1, %v7704_v54, 0.0  ;;  %v843_v61 = vmul.f32 1.442695, %v821_v48  ;;  %v455_v48 = vld [vmem:[#allocation7 + $0x18] sm:$0xff] }
 0x264   : > { %7713 = vpow2.f32 %v837_v53  ;;  %v7708_v62 = vpop.eup %7707  ;;  %v852_v0 = vsel %vm788_vm1, %v7706_v58, 0.0  ;;  %v845_v1 = vmul.f32 1.442695, %v822_v49  ;;  %v8515_v46 = vpack.c.bf16 %v453_v45, %v452_v44  ;;  %v472_v51 = vld [vmem:[%s9561_s6 + $0x8] sm:$0xff]  ;;  %v1051_v53 = vpop.permute.xlu0 %1050 }
 0x265   : > { %v851_v63 = vadd.f32 %v850_v60, %v849_v59  ;;  %7715 = vpow2.f32 %v839_v56  ;;  %v7710_v2 = vpop.eup %7709  ;;  %v854_v5 = vsel %vm788_vm1, %v7708_v62, 0.0 }
 0x266   : > { %7717 = vpow2.f32 %v841_v57  ;;  %v856_v8 = vsel %vm788_vm1, %v7710_v2, 0.0  ;;  %7431 = vmatprep.subr.bf16.mxu1 %v8515_v46 }
 0x267   : > { %v853_v4 = vadd.f32 %v852_v0, %v851_v63  ;;  %7719 = vpow2.f32 %v843_v61  ;;  %7433 = vmatpush3.bf16.msra.mxu1 %v8515_v46 }
 0x268   : > { %7721 = vpow2.f32 %v845_v1  ;;  %v1053_v55 = vpop.permute.xlu0 %1052 }
 0x269   : > { %v855_v7 = vadd.f32 %v854_v5, %v853_v4 }
 0x26b   : > { %v857_v10 = vadd.f32 %v856_v8, %v855_v7 }
 0x26c   : > { %v1059_v5 = vpop.permute.xlu0 %1058 }
 0x26d   : > { %v7712_v11 = vpop.eup %7711  ;;  %7723 = vrcp.f32 %v857_v10 }
 0x26e   : > { %v7714_v12 = vpop.eup %7713  ;;  %v858_v13 = vsel %vm788_vm1, %v7712_v11, 0.0 }
 0x26f   : > { %v7716_v14 = vpop.eup %7715  ;;  %v859_v15 = vsel %vm788_vm1, %v7714_v12, 0.0 }
 0x270   : > { %v7718_v16 = vpop.eup %7717  ;;  %v860_v18 = vadd.f32 %v859_v15, %v858_v13  ;;  %v861_v19 = vsel %vm788_vm1, %v7716_v14, 0.0 }
 0x271   : > { %v7720_v20 = vpop.eup %7719  ;;  %v863_v22 = vsel %vm788_vm1, %v7718_v16, 0.0 }
 0x272   : > { %v862_v21 = vadd.f32 %v861_v19, %v860_v18  ;;  %v7722_v23 = vpop.eup %7721  ;;  %v865_v25 = vsel %vm788_vm1, %v7720_v20, 0.0 }
 0x273   : > { %v867_v28 = vsel %vm788_vm1, %v7722_v23, 0.0 }
 0x274   : > { %v864_v24 = vadd.f32 %v863_v22, %v862_v21 }
 0x276   : > { %v866_v26 = vadd.f32 %v865_v25, %v864_v24 }
 0x277   : > { %v7724_v27 = vpop.eup %7723 }
 0x278   : > { %v868_v29 = vadd.f32 %v867_v28, %v866_v26  ;;  %v871_v30 = vmul.f32 %v7724_v27, %v7700_v47  ;;  %v872_v31 = vmul.f32 %v7724_v27, %v7702_v50  ;;  %v873_v32 = vmul.f32 %v7724_v27, %v7704_v54  ;;  %v454_v47 = vld [vmem:[#allocation7 + $0x10] sm:$0xff]  ;;  %v1055_v54 = vpop.permute.xlu1 %1054 }
 0x279   : > { %v874_v33 = vmul.f32 %v7724_v27, %v7706_v58  ;;  %v875_v34 = vmul.f32 %v7724_v27, %v7708_v62  ;;  %v876_v35 = vmul.f32 %v7724_v27, %v7710_v2  ;;  %v8519_v49 = vpack.c.bf16 %v455_v48, %v454_v47  ;;  %v471_v50 = vld [vmem:[%s9561_s6] sm:$0xff]  ;;  %v473_v47 = vld [vmem:[%s9561_s6 + $0x10] sm:$0xff]  ;;  %v474_v48 = vld [vmem:[%s9561_s6 + $0x18] sm:$0xff] }
 0x27a   : > { %7725 = vrcp.f32 %v868_v29  ;;  %6931 = vmatprep.mubr.msk.f32.mxu0 %vm788_vm1, %v871_v30  ;;  %v8529_v52 = vpack.c.bf16 %v472_v51, %v471_v50  ;;  %v8553_v50 = vpack.c.bf16 %v474_v48, %v473_v47  ;;  %v6368_v51 = vld [vmem:[%s9558_s3] ss:$0 sm:$0xff] }
 0x27b   : > { %6932 = vmatmul.mubr.msk.f32.vlgmr.msra.gmra.mrb[6].mxu0 %vm788_vm1, %v872_v31  ;;  %7435 = vmatprep.subr.bf16.mxu1 %v8519_v49 }
 0x27c   : > { %6934 = vmatprep.mubr.msk.f32.mxu0 %vm788_vm1, %v873_v32  ;;  %7449 = vmatpush3.bf16.msra.mxu0 %v8422_v9  ;;  %v1057_v60 = vpop.permute.xlu1 %1056 }
 0x27d   : > { %7451 = vmatprep.subr.bf16.mxu0 %v8443_v17  ;;  %7437 = vmatpush3.bf16.msra.mxu1 %v8519_v49 }
 0x27e   : > { %7439 = vmatprep.subr.bf16.mxu1 %v8529_v52 }
 0x27f   : > { %6935 = vmatmul.mubr.msk.f32.gmra.mrb[8].mxu0 %vm788_vm1, %v874_v33 }
 0x280   : > { %6937 = vmatprep.mubr.msk.f32.mxu0 %vm788_vm1, %v875_v34  ;;  %7453 = vmatpush3.bf16.msra.mxu0 %v8443_v17  ;;  %v1061_v10 = vpop.permute.xlu1 %1060 }
 0x283   : > { %6938 = vmatmul.mubr.msk.f32.gmra.mrb[10].mxu0 %vm788_vm1, %v876_v35 }
 0x284   : > { %v7726_v36 = vpop.eup %7725 }
 0x285   : > { %v877_v37 = vmul.f32 %v7726_v36, %v7712_v11  ;;  %v878_v38 = vmul.f32 %v7726_v36, %v7714_v12  ;;  %v879_v39 = vmul.f32 %v7726_v36, %v7716_v14  ;;  %v880_v40 = vmul.f32 %v7726_v36, %v7718_v16 }
 0x286   : > { %v881_v41 = vmul.f32 %v7726_v36, %v7720_v20  ;;  %v882_v42 = vmul.f32 %v7726_v36, %v7722_v23 }
 0x287   : > { %6940 = vmatprep.mubr.msk.f32.mxu0 %vm788_vm1, %v877_v37 }
 0x288   : > { %6941 = vmatmul.mubr.msk.f32.gmra.mrb[12].mxu0 %vm788_vm1, %v878_v38 }
 0x289   : > { %6943 = vmatprep.mubr.msk.f32.mxu0 %vm788_vm1, %v879_v39 }
 0x28c   : > { %6944 = vmatmul.mubr.msk.f32.gmra.mrb[14].mxu0 %vm788_vm1, %v880_v40 }
 0x28d   : > { %6946 = vmatprep.mubr.msk.f32.mxu0 %vm788_vm1, %v881_v41 }
 0x290   : > { %6947 = vmatmul.mubr.msk.f32.gmra.mrb[16].mxu0 %vm788_vm1, %v882_v42 }
 0x34e   : > { %v6933_v56 = vpop.f32.mrb[6].mxu0 }
 0x34f   : > { %v1069_v57 = vmul.f32 %v6933_v56, %v1053_v55  ;;  %v985_v58 = vpop.f32.mrb[7].mxu0 }
 0x350   : > { %v1068_v59 = vmul.f32 %v1051_v53, %v985_v58 }
 0x351   : > { %v1081_v61 = vsel %vm489_vm0, %v1069_v57, 0.0 }
 0x352   : > { %v1080_v62 = vsel %vm489_vm0, %v1068_v59, 0.0  ;;  %v6936_v63 = vpop.f32.mrb[8].mxu0  ;;  %v8126_v59 = vmov 1966171168  }
 0x353   : > { %v1082_v0 = vadd.f32 %v1081_v61, %v1080_v62  ;;  %v995_v1 = vpop.f32.mrb[9].mxu0  ;;  %v1071_v2 = vmul.f32 %v6936_v63, %v1057_v60  ;;  %v1284_v61 = vlaneseq }
 0x354   : > { %v1070_v4 = vmul.f32 %v1055_v54, %v995_v1 }
 0x355   : > { %v1085_v13 = vsel %vm489_vm0, %v1071_v2, 0.0  ;;  %v1285_v63 = vshrl.u32 %v1284_v61, 7 }
 0x356   : > { %v1083_v7 = vsel %vm489_vm0, %v1070_v4, 0.0  ;;  %v6939_v8 = vpop.f32.mrb[10].mxu0 }
 0x357   : > { %v1084_v11 = vadd.f32 %v1083_v7, %v1082_v0  ;;  %v1005_v12 = vpop.f32.mrb[11].mxu0  ;;  %v1073_v14 = vmul.f32 %v6939_v8, %v1061_v10  ;;  %v6371_v0 = vld [vmem:[%s9595_s19] ss:$0 sm:$0xff]  ;;  %v8573_v8 = vsub.s32 0, %v1285_v63 }
 0x358   : > { %v1072_v15 = vmul.f32 %v1059_v5, %v1005_v12 }
 0x359   : > { %v1086_v16 = vadd.f32 %v1085_v13, %v1084_v11  ;;  %v1089_v21 = vsel %vm489_vm0, %v1073_v14, 0.0 }
 0x35a   : > { %v1087_v18 = vsel %vm489_vm0, %v1072_v15, 0.0 }
 0x35b   : > { %v1088_v19 = vadd.f32 %v1087_v18, %v1086_v16  ;;  %v6942_v20 = vpop.f32.mrb[12].mxu0 }
 0x35c   : > { %v1075_v22 = vmul.f32 %v6942_v20, %v1053_v55  ;;  %v1015_v23 = vpop.f32.mrb[13].mxu0 }
 0x35d   : > { %v1090_v24 = vadd.f32 %v1089_v21, %v1088_v19  ;;  %v1074_v25 = vmul.f32 %v1051_v53, %v1015_v23 }
 0x35e   : > { %v1092_v26 = vsel %vm489_vm0, %v1075_v22, 0.0 }
 0x35f   : > { %v1091_v27 = vsel %vm489_vm0, %v1074_v25, 0.0  ;;  %v6945_v28 = vpop.f32.mrb[14].mxu0  ;;  %6957 = vmatprep.mubr.msk.f32.mxu1 %vm489_vm0, %v1090_v24 }
 0x360   : > { %v1093_v29 = vadd.f32 %v1092_v26, %v1091_v27  ;;  %v1025_v30 = vpop.f32.mrb[15].mxu0  ;;  %v1077_v31 = vmul.f32 %v6945_v28, %v1057_v60  ;;  %v1282_v60 = vunpack.c.l.s4 %v8126_v59 }
 0x361   : > { %v1076_v32 = vmul.f32 %v1055_v54, %v1025_v30 }
 0x362   : > { %v1096_v37 = vsel %vm489_vm0, %v1077_v31, 0.0  ;;  %v1283_v62 = vunpack.c.0.s8 %v1282_v60 }
 0x363   : > { %v1094_v33 = vsel %vm489_vm0, %v1076_v32, 0.0  ;;  %v6948_v34 = vpop.f32.mrb[16].mxu0 }
 0x364   : > { %v1095_v35 = vadd.f32 %v1094_v33, %v1093_v29  ;;  %v1035_v36 = vpop.f32.mrb[17].mxu0  ;;  %v1079_v38 = vmul.f32 %v6948_v34, %v1061_v10  ;;  %v8567_v2 = vsub.s32 %v1283_v62, %v1285_v63 }
 0x365   : > { %v1078_v39 = vmul.f32 %v1059_v5, %v1035_v36 }
 0x366   : > { %v1097_v40 = vadd.f32 %v1096_v37, %v1095_v35  ;;  %v1100_v44 = vsel %vm489_vm0, %v1079_v38, 0.0 }
 0x367   : > { %v1098_v41 = vsel %vm489_vm0, %v1078_v39, 0.0 }
 0x368   : > { %v1099_v42 = vadd.f32 %v1098_v41, %v1097_v40 }
 0x36a   : > { %v1101_v45 = vadd.f32 %v1100_v44, %v1099_v42 }
 0x36c   : > { %6958 = vmatmul.mubr.msk.f32.vlgmr.msra.gmra.mrb[12].mxu1 %vm489_vm0, %v1101_v45 }
 0x36d   : > { %7441 = vmatpush3.bf16.msra.mxu1 %v8529_v52 }
 0x36e   : > { %7443 = vmatprep.subr.bf16.mxu1 %v8553_v50 }
 0x371   : > { %7445 = vmatpush3.bf16.msra.mxu1 %v8553_v50 }
 0x372   : > { %7003 = vmatprep.subr.mxu1 %v8471_v43 }
 0x43f   : > { %v6959_v53 = vpop.f32.mrb[12].mxu1 }
 0x440   : > { %v1186_v54 = vadd.f32 %v6959_v53, %v6368_v51  ;;  %v1180_v55 = vpop.f32.mrb[13].mxu1 }
 0x441   : > { %v1181_v56 = vadd.f32 %v6368_v51, %v1180_v55 }
 0x442   : > { %v1190_v58 = vmax.f32 %v1186_v54, 0.0 }
 0x443   : > { %v1189_v57 = vmax.f32 %v1181_v56, 0.0 }
 0x445   : > { %6968 = vmatprep.mubr.msk.f32.mxu1 %vm489_vm0, %v1189_v57 }
 0x446   : > { %6969 = vmatmul.mubr.msk.f32.vlgmr.msra.gmra.mrb[14].mxu1 %vm489_vm0, %v1190_v58 }
 0x447   : > { %7004 = vmatpush3.msra.mxu1 %v8471_v43 }
 0x519   : > { %v6970_v1 = vpop.f32.mrb[14].mxu1 }
 0x51a   : > { %v1269_v4 = vpop.f32.mrb[15].mxu1  ;;  %v8581_v16 = vadd.f32 %v6970_v1, %v6371_v0 }
 0x51b   : > { %v8569_v5 = vadd.f32 %v6371_v0, %v1269_v4 }
 0x51c   : > { %v1336_v25 = vrot.slane %v8581_v16, %v8567_v2  ;;  %v1329_v31 = vcombine.high %v8581_v16, %v8581_v16 }
 0x51d   : > { %v1287_v7 = vrot.slane %v8569_v5, %v8567_v2  ;;  %v1280_v43 = vcombine.high %v8569_v5, %v8569_v5 }
 0x51e   : > { %v1344_v30 = vcombine.high %v1336_v25, %v1336_v25  ;;  %v1352_v33 = vrot.slane %v1336_v25, %v8567_v2  ;;  %v1343_v36 = vrot.slane %v1329_v31, %v8567_v2 }
 0x51f   : > { %v1303_v10 = vrot.slane %v1287_v7, %v8567_v2  ;;  %v1295_v11 = vcombine.high %v1287_v7, %v1287_v7  ;;  %v1294_v12 = vrot.slane %v1280_v43, %v8567_v2 }
 0x520   : > { %v1366_v35 = vrot.slane %v1344_v30, %v8567_v2  ;;  %v1413_v37 = vrot.slane %v1352_v33, %v8573_v8  ;;  %v1374_v38 = vcombine.high %v1352_v33, %v1352_v33  ;;  %v1345_v41 = vcombine.high %v1343_v36, %v1343_v36 }
 0x521   : > { %v1381_v13 = vrot.slane %v1303_v10, %v8573_v8  ;;  %v1317_v14 = vrot.slane %v1295_v11, %v8567_v2  ;;  %v1325_v15 = vcombine.high %v1303_v10, %v1303_v10  ;;  %v1296_v20 = vcombine.high %v1294_v12, %v1294_v12 }
 0x522   : > { %v1310_v22 = vrot.slane %v1294_v12, %v8567_v2  ;;  %v1417_v39 = vrot.slane %v1366_v35, %v8573_v8  ;;  %v1376_v40 = vcombine.high %v1366_v35, %v1366_v35  ;;  %v1421_v42 = vrot.slane %v1374_v38, %v8573_v8 }
 0x523   : > { %1442 = vrot.lane.b32.xlu0 %v1381_v13, %s8125_s10  ;;  %v1385_v18 = vrot.slane %v1317_v14, %v8573_v8  ;;  %v1327_v19 = vcombine.high %v1317_v14, %v1317_v14  ;;  %v1389_v21 = vrot.slane %v1325_v15, %v8573_v8  ;;  %v1324_v24 = vrot.slane %v1296_v20, %v8567_v2 }
 0x524   : > { %v1397_v26 = vrot.slane %v1310_v22, %v8573_v8  ;;  %v1326_v27 = vcombine.high %v1310_v22, %v1310_v22  ;;  %v1359_v44 = vrot.slane %v1343_v36, %v8567_v2  ;;  %v1425_v45 = vrot.slane %v1376_v40, %v8573_v8 }
 0x525   : > { %1444 = vrot.lane.b32.xlu1 %v1385_v18, %s8125_s10  ;;  %v1393_v23 = vrot.slane %v1327_v19, %v8573_v8  ;;  %v1401_v28 = vrot.slane %v1324_v24, %v8573_v8  ;;  %v1328_v29 = vcombine.high %v1324_v24, %v1324_v24  ;;  %v1373_v47 = vrot.slane %v1345_v41, %v8567_v2 }
 0x526   : > { %v1405_v32 = vrot.slane %v1326_v27, %v8573_v8  ;;  %v1429_v48 = vrot.slane %v1359_v44, %v8573_v8  ;;  %v1375_v51 = vcombine.high %v1359_v44, %v1359_v44 }
 0x527   : > { %1446 = vrot.lane.b32.xlu0 %v1389_v21, %s8125_s10  ;;  %v1409_v34 = vrot.slane %v1328_v29, %v8573_v8  ;;  %v1433_v53 = vrot.slane %v1373_v47, %v8573_v8  ;;  %v1377_v54 = vcombine.high %v1373_v47, %v1373_v47 }
 0x528   : > { %v1437_v55 = vrot.slane %v1375_v51, %v8573_v8 }
 0x529   : > { %1448 = vrot.lane.b32.xlu1 %v1393_v23, %s8125_s10  ;;  %v1441_v56 = vrot.slane %v1377_v54, %v8573_v8 }
 0x52b   : > { %1450 = vrot.lane.b32.xlu0 %v1397_v26, %s8125_s10 }
 0x52d   : > { %1452 = vrot.lane.b32.xlu1 %v1401_v28, %s8125_s10 }
 0x52f   : > { %1454 = vrot.lane.b32.xlu0 %v1405_v32, %s8125_s10 }
 0x531   : > { %1456 = vrot.lane.b32.xlu1 %v1409_v34, %s8125_s10 }
 0x533   : > { %1458 = vrot.lane.b32.xlu0 %v1413_v37, %s8125_s10 }
 0x535   : > { %1460 = vrot.lane.b32.xlu1 %v1417_v39, %s8125_s10 }
 0x537   : > { %1462 = vrot.lane.b32.xlu0 %v1421_v42, %s8125_s10 }
 0x539   : > { %1464 = vrot.lane.b32.xlu1 %v1425_v45, %s8125_s10 }
 0x53b   : > { %1466 = vrot.lane.b32.xlu0 %v1429_v48, %s8125_s10 }
 0x53d   : > { %1468 = vrot.lane.b32.xlu1 %v1433_v53, %s8125_s10 }
 0x53f   : > { %1470 = vrot.lane.b32.xlu0 %v1437_v55, %s8125_s10 }
 0x541   : > { %1472 = vrot.lane.b32.xlu1 %v1441_v56, %s8125_s10 }
 0x543   : > { %2034 = vrot.lane.b32.xlu0 %v1381_v13, %s8127_s21 }
 0x545   : > { %2036 = vrot.lane.b32.xlu1 %v1385_v18, %s8127_s21 }
 0x547   : > { %2050 = vrot.lane.b32.xlu0 %v1413_v37, %s8127_s21 }
 0x549   : > { %2052 = vrot.lane.b32.xlu1 %v1417_v39, %s8127_s21 }
 0x54b   : > { %2038 = vrot.lane.b32.xlu0 %v1389_v21, %s8127_s21 }
 0x54d   : > { %2054 = vrot.lane.b32.xlu1 %v1421_v42, %s8127_s21 }
 0x54f   : > { %2040 = vrot.lane.b32.xlu0 %v1393_v23, %s8127_s21 }
 0x551   : > { %2056 = vrot.lane.b32.xlu1 %v1425_v45, %s8127_s21 }
 0x553   : > { %2042 = vrot.lane.b32.xlu0 %v1397_v26, %s8127_s21 }
 0x555   : > { %2058 = vrot.lane.b32.xlu1 %v1429_v48, %s8127_s21 }
 0x557   : > { %2044 = vrot.lane.b32.xlu0 %v1401_v28, %s8127_s21 }
 0x559   : > { %2060 = vrot.lane.b32.xlu1 %v1433_v53, %s8127_s21 }
 0x55b   : > { %2046 = vrot.lane.b32.xlu0 %v1405_v32, %s8127_s21 }
 0x55d   : > { %2062 = vrot.lane.b32.xlu1 %v1437_v55, %s8127_s21 }
 0x55f   : > { %2048 = vrot.lane.b32.xlu0 %v1409_v34, %s8127_s21 }
 0x561   : > { %2064 = vrot.lane.b32.xlu1 %v1441_v56, %s8127_s21 }
 0x595   : > { %v1443_v57 = vpop.permute.xlu0 %1442 }
 0x596   : > { %v1490_v58 = vmul.f32 %v1443_v57, %v8569_v5 }
 0x597   : > { %v1445_v59 = vpop.permute.xlu1 %1444 }
 0x598   : > { %v1491_v60 = vmul.f32 %v1445_v59, %v8569_v5  ;;  %6979 = vmatprep.mubr.msk.f32.mxu0 %vm489_vm0, %v1490_v58 }
 0x599   : > { %v1447_v61 = vpop.permute.xlu0 %1446 }
 0x59a   : > { %v1492_v62 = vmul.f32 %v1447_v61, %v8569_v5  ;;  %6980 = vmatmul.mubr.msk.f32.vlgmr.msra.gmra.mrb[18].mxu0 %vm489_vm0, %v1491_v60 }
 0x59b   : > { %v1449_v63 = vpop.permute.xlu1 %1448 }
 0x59c   : > { %v1493_v0 = vmul.f32 %v1449_v63, %v8569_v5  ;;  %6982 = vmatprep.mubr.msk.f32.mxu0 %vm489_vm0, %v1492_v62 }
 0x59d   : > { %v1451_v1 = vpop.permute.xlu0 %1450 }
 0x59e   : > { %v1494_v4 = vmul.f32 %v1451_v1, %v8569_v5  ;;  %6983 = vmatmul.mubr.msk.f32.gmra.mrb[20].mxu0 %vm489_vm0, %v1493_v0 }
 0x59f   : > { %v1453_v7 = vpop.permute.xlu1 %1452 }
 0x5a0   : > { %v1495_v43 = vmul.f32 %v1453_v7, %v8569_v5  ;;  %6985 = vmatprep.mubr.msk.f32.mxu0 %vm489_vm0, %v1494_v4 }
 0x5a1   : > { %v1455_v10 = vpop.permute.xlu0 %1454 }
 0x5a2   : > { %v1496_v11 = vmul.f32 %v1455_v10, %v8569_v5  ;;  %6986 = vmatmul.mubr.msk.f32.gmra.mrb[22].mxu0 %vm489_vm0, %v1495_v43 }
 0x5a3   : > { %v1457_v12 = vpop.permute.xlu1 %1456 }
 0x5a4   : > { %v1497_v13 = vmul.f32 %v1457_v12, %v8569_v5  ;;  %6988 = vmatprep.mubr.msk.f32.mxu0 %vm489_vm0, %v1496_v11 }
 0x5a5   : > { %v1459_v14 = vpop.permute.xlu0 %1458 }
 0x5a6   : > { %v1498_v15 = vmul.f32 %v1459_v14, %v8581_v16  ;;  %6989 = vmatmul.mubr.msk.f32.gmra.mrb[24].mxu0 %vm489_vm0, %v1497_v13 }
 0x5a7   : > { %v1461_v18 = vpop.permute.xlu1 %1460 }
 0x5a8   : > { %v1499_v19 = vmul.f32 %v1461_v18, %v8581_v16  ;;  %6991 = vmatprep.mubr.msk.f32.mxu0 %vm489_vm0, %v1498_v15 }
 0x5a9   : > { %v1463_v20 = vpop.permute.xlu0 %1462 }
 0x5aa   : > { %v1500_v21 = vmul.f32 %v1463_v20, %v8581_v16  ;;  %6992 = vmatmul.mubr.msk.f32.gmra.mrb[26].mxu0 %vm489_vm0, %v1499_v19 }
 0x5ab   : > { %v1465_v22 = vpop.permute.xlu1 %1464 }
 0x5ac   : > { %v1501_v5 = vmul.f32 %v1465_v22, %v8581_v16  ;;  %6994 = vmatprep.mubr.msk.f32.mxu0 %vm489_vm0, %v1500_v21 }
 0x5ad   : > { %v1467_v23 = vpop.permute.xlu0 %1466 }
 0x5ae   : > { %v1502_v24 = vmul.f32 %v1467_v23, %v8581_v16  ;;  %6995 = vmatmul.mubr.msk.f32.gmra.mrb[28].mxu0 %vm489_vm0, %v1501_v5 }
 0x5af   : > { %v1469_v25 = vpop.permute.xlu1 %1468 }
 0x5b0   : > { %v1503_v26 = vmul.f32 %v1469_v25, %v8581_v16  ;;  %6997 = vmatprep.mubr.msk.f32.mxu0 %vm489_vm0, %v1502_v24 }
 0x5b1   : > { %v1471_v27 = vpop.permute.xlu0 %1470 }
 0x5b2   : > { %v1504_v28 = vmul.f32 %v1471_v27, %v8581_v16  ;;  %6998 = vmatmul.mubr.msk.f32.gmra.mrb[30].mxu0 %vm489_vm0, %v1503_v26 }
 0x5b3   : > { %v1473_v29 = vpop.permute.xlu1 %1472 }
 0x5b4   : > { %v1505_v30 = vmul.f32 %v1473_v29, %v8581_v16  ;;  %7000 = vmatprep.mubr.msk.f32.mxu0 %vm489_vm0, %v1504_v28 }
 0x5b6   : > { %7001 = vmatmul.mubr.msk.f32.gmra.mrb[32].mxu0 %vm489_vm0, %v1505_v30 }
 0x66d   : > { %v6981_v31 = vpop.f32.mrb[18].mxu0 }
 0x66e   : > { %v1620_v32 = vpop.f32.mrb[19].mxu0  ;;  %v1700_v33 = vmul.f32 0.5, %v6981_v31 }
 0x66f   : > { %v1699_v34 = vmul.f32 0.5, %v1620_v32 }
 0x670   : > { %v1716_v39 = vsel %vm788_vm1, %v1700_v33, -inf }
 0x671   : > { %v6984_v35 = vpop.f32.mrb[20].mxu0  ;;  %v1715_v41 = vsel %vm788_vm1, %v1699_v34, -inf }
 0x672   : > { %v1702_v36 = vmul.f32 0.5, %v6984_v35  ;;  %v1630_v37 = vpop.f32.mrb[21].mxu0 }
 0x673   : > { %v1701_v38 = vmul.f32 0.5, %v1630_v37 }
 0x674   : > { %v1719_v40 = vsel %vm788_vm1, %v1702_v36, -inf }
 0x675   : > { %v1720_v42 = vmax.f32 %v1716_v39, %v1719_v40  ;;  %v1717_v16 = vsel %vm788_vm1, %v1701_v38, -inf  ;;  %v6987_v44 = vpop.f32.mrb[22].mxu0 }
 0x676   : > { %v1718_v45 = vmax.f32 %v1715_v41, %v1717_v16  ;;  %v1704_v47 = vmul.f32 0.5, %v6987_v44  ;;  %v1640_v48 = vpop.f32.mrb[23].mxu0 }
 0x677   : > { %v1703_v51 = vmul.f32 0.5, %v1640_v48 }
 0x678   : > { %v1723_v53 = vsel %vm788_vm1, %v1704_v47, -inf }
 0x679   : > { %v1724_v54 = vmax.f32 %v1720_v42, %v1723_v53  ;;  %v1721_v55 = vsel %vm788_vm1, %v1703_v51, -inf  ;;  %v6990_v56 = vpop.f32.mrb[24].mxu0 }
 0x67a   : > { %v1722_v57 = vmax.f32 %v1718_v45, %v1721_v55  ;;  %v1706_v58 = vmul.f32 0.5, %v6990_v56  ;;  %v1650_v59 = vpop.f32.mrb[25].mxu0 }
 0x67b   : > { %v1705_v60 = vmul.f32 0.5, %v1650_v59 }
 0x67c   : > { %v1727_v61 = vsel %vm788_vm1, %v1706_v58, -inf }
 0x67d   : > { %v1728_v62 = vmax.f32 %v1724_v54, %v1727_v61  ;;  %v1725_v63 = vsel %vm788_vm1, %v1705_v60, -inf  ;;  %v6993_v0 = vpop.f32.mrb[26].mxu0 }
 0x67e   : > { %v1726_v1 = vmax.f32 %v1722_v57, %v1725_v63  ;;  %v1660_v4 = vpop.f32.mrb[27].mxu0  ;;  %v8681_v43 = vmul.f32 0.5, %v6993_v0 }
 0x67f   : > { %v8683_v10 = vmul.f32 0.5, %v1660_v4 }
 0x680   : > { %v1729_v7 = vmax.f32 %v1726_v1, %v1728_v62  ;;  %v1731_v26 = vsel %vm788_vm1, %v8681_v43, -inf }
 0x681   : > { %v6996_v11 = vpop.f32.mrb[28].mxu0  ;;  %v1730_v27 = vsel %vm788_vm1, %v8683_v10, -inf }
 0x682   : > { %v1745_v12 = vsub.f32 %v1699_v34, %v1729_v7  ;;  %v1746_v13 = vsub.f32 %v1700_v33, %v1729_v7  ;;  %v1747_v14 = vsub.f32 %v1701_v38, %v1729_v7  ;;  %v1748_v15 = vsub.f32 %v1702_v36, %v1729_v7  ;;  %v1670_v18 = vpop.f32.mrb[29].mxu0 }
 0x683   : > { %v1749_v19 = vsub.f32 %v1703_v51, %v1729_v7  ;;  %v1750_v20 = vsub.f32 %v1704_v47, %v1729_v7  ;;  %v1751_v21 = vsub.f32 %v1705_v60, %v1729_v7  ;;  %v1752_v22 = vsub.f32 %v1706_v58, %v1729_v7 }
 0x684   : > { %v1761_v5 = vmul.f32 1.442695, %v1745_v12  ;;  %v1763_v23 = vmul.f32 1.442695, %v1746_v13  ;;  %v1765_v24 = vmul.f32 1.442695, %v1747_v14 }
 0x685   : > { %v1767_v25 = vmul.f32 1.442695, %v1748_v15  ;;  %v1710_v28 = vmul.f32 0.5, %v6996_v11  ;;  %v6999_v29 = vpop.f32.mrb[30].mxu0  ;;  %v1769_v30 = vmul.f32 1.442695, %v1749_v19 }
 0x686   : > { %7727 = vpow2.f32 %v1761_v5  ;;  %v1709_v31 = vmul.f32 0.5, %v1670_v18  ;;  %v1712_v32 = vmul.f32 0.5, %v6999_v29  ;;  %v1680_v33 = vpop.f32.mrb[31].mxu0  ;;  %v1771_v34 = vmul.f32 1.442695, %v1750_v20 }
 0x687   : > { %7729 = vpow2.f32 %v1763_v23  ;;  %v1734_v35 = vsel %vm788_vm1, %v1710_v28, -inf  ;;  %v1711_v36 = vmul.f32 0.5, %v1680_v33  ;;  %v1773_v45 = vmul.f32 1.442695, %v1751_v21 }
 0x688   : > { %7731 = vpow2.f32 %v1765_v24  ;;  %v1735_v37 = vmax.f32 %v1731_v26, %v1734_v35  ;;  %v1732_v38 = vsel %vm788_vm1, %v1709_v31, -inf  ;;  %v1738_v39 = vsel %vm788_vm1, %v1712_v32, -inf }
 0x689   : > { %7733 = vpow2.f32 %v1767_v25  ;;  %v7002_v40 = vpop.f32.mrb[32].mxu0  ;;  %v1733_v41 = vmax.f32 %v1730_v27, %v1732_v38  ;;  %v1736_v42 = vsel %vm788_vm1, %v1711_v36, -inf  ;;  %v1775_v54 = vmul.f32 1.442695, %v1752_v22 }
 0x68a   : > { %v1714_v16 = vmul.f32 0.5, %v7002_v40  ;;  %v1690_v44 = vpop.f32.mrb[33].mxu0  ;;  %7735 = vpow2.f32 %v1769_v30  ;;  %v1739_v47 = vmax.f32 %v1735_v37, %v1738_v39 }
 0x68b   : > { %v1713_v48 = vmul.f32 0.5, %v1690_v44  ;;  %v1737_v51 = vmax.f32 %v1733_v41, %v1736_v42  ;;  %7737 = vpow2.f32 %v1771_v34 }
 0x68c   : > { %v1742_v53 = vsel %vm788_vm1, %v1714_v16, -inf  ;;  %7739 = vpow2.f32 %v1773_v45 }
 0x68d   : > { %v1743_v55 = vmax.f32 %v1739_v47, %v1742_v53  ;;  %v1740_v56 = vsel %vm788_vm1, %v1713_v48, -inf  ;;  %7741 = vpow2.f32 %v1775_v54 }
 0x68e   : > { %v1741_v57 = vmax.f32 %v1737_v51, %v1740_v56 }
 0x690   : > { %v8695_v58 = vpop.eup %7727  ;;  %v1744_v59 = vmax.f32 %v1741_v57, %v1743_v55 }
 0x691   : > { %v8697_v60 = vpop.eup %7729  ;;  %v1793_v61 = vsel %vm788_vm1, %v8695_v58, 0.0 }
 0x692   : > { %v8701_v62 = vpop.eup %7731  ;;  %v1794_v63 = vsel %vm788_vm1, %v8697_v60, 0.0  ;;  %v1753_v0 = vsub.f32 %v8683_v10, %v1744_v59  ;;  %v1754_v1 = vsub.f32 %v8681_v43, %v1744_v59  ;;  %v1755_v4 = vsub.f32 %v1709_v31, %v1744_v59 }
 0x693   : > { %v8707_v7 = vpop.eup %7733  ;;  %v1795_v11 = vadd.f32 %v1794_v63, %v1793_v61  ;;  %v1756_v12 = vsub.f32 %v1710_v28, %v1744_v59  ;;  %v1757_v13 = vsub.f32 %v1711_v36, %v1744_v59  ;;  %v1796_v14 = vsel %vm788_vm1, %v8701_v62, 0.0 }
 0x694   : > { %v1758_v15 = vsub.f32 %v1712_v32, %v1744_v59  ;;  %v1759_v18 = vsub.f32 %v1713_v48, %v1744_v59  ;;  %v1760_v19 = vsub.f32 %v1714_v16, %v1744_v59  ;;  %v7736_v20 = vpop.eup %7735  ;;  %v1777_v22 = vmul.f32 1.442695, %v1753_v0 }
 0x695   : > { %v1797_v21 = vadd.f32 %v1796_v14, %v1795_v11  ;;  %v1779_v5 = vmul.f32 1.442695, %v1754_v1  ;;  %v1798_v10 = vsel %vm788_vm1, %v8707_v7, 0.0  ;;  %v1781_v43 = vmul.f32 1.442695, %v1755_v4  ;;  %v7738_v24 = vpop.eup %7737 }
 0x696   : > { %v1783_v23 = vmul.f32 1.442695, %v1756_v12  ;;  %7743 = vpow2.f32 %v1777_v22  ;;  %v1800_v26 = vsel %vm788_vm1, %v7736_v20, 0.0  ;;  %v1785_v27 = vmul.f32 1.442695, %v1757_v13  ;;  %v7740_v28 = vpop.eup %7739 }
 0x697   : > { %v1799_v25 = vadd.f32 %v1798_v10, %v1797_v21  ;;  %7745 = vpow2.f32 %v1779_v5  ;;  %v1787_v30 = vmul.f32 1.442695, %v1758_v15  ;;  %v1802_v31 = vsel %vm788_vm1, %v7738_v24, 0.0  ;;  %v7742_v33 = vpop.eup %7741 }
 0x698   : > { %7747 = vpow2.f32 %v1781_v43  ;;  %v1789_v32 = vmul.f32 1.442695, %v1759_v18  ;;  %v1804_v35 = vsel %vm788_vm1, %v7740_v28, 0.0  ;;  %v1806_v37 = vsel %vm788_vm1, %v7742_v33, 0.0 }
 0x699   : > { %v1801_v29 = vadd.f32 %v1800_v26, %v1799_v25  ;;  %7749 = vpow2.f32 %v1783_v23  ;;  %v1791_v38 = vmul.f32 1.442695, %v1760_v19 }
 0x69a   : > { %7751 = vpow2.f32 %v1785_v27  ;;  %v458_v27 = vld [vmem:[#allocation7 + $0x20] sm:$0xff] }
 0x69b   : > { %v1803_v34 = vadd.f32 %v1802_v31, %v1801_v29  ;;  %7753 = vpow2.f32 %v1787_v30  ;;  %v460_v30 = vld [vmem:[#allocation7 + $0x30] sm:$0xff]  ;;  %v461_v31 = vld [vmem:[#allocation7 + $0x38] sm:$0xff] }
 0x69c   : > { %7755 = vpow2.f32 %v1789_v32  ;;  %v8749_v32 = vpack.c.bf16 %v461_v31, %v460_v30 }
 0x69d   : > { %v1805_v36 = vadd.f32 %v1804_v35, %v1803_v34  ;;  %v447_v34 = vld [vmem:[#allocation8 + $0x28] sm:$0xff]  ;;  %v448_v35 = vld [vmem:[#allocation8 + $0x30] sm:$0xff] }
 0x69f   : > { %v1807_v39 = vadd.f32 %v1806_v37, %v1805_v36  ;;  %v449_v37 = vld [vmem:[#allocation8 + $0x38] sm:$0xff] }
 0x6a0   : > { %v7744_v40 = vpop.eup %7743 }
 0x6a1   : > { %7757 = vrcp.f32 %v1807_v39  ;;  %v7746_v41 = vpop.eup %7745  ;;  %v1808_v42 = vsel %vm788_vm1, %v7744_v40, 0.0  ;;  %v2035_v39 = vpop.permute.xlu0 %2034 }
 0x6a2   : > { %7759 = vpow2.f32 %v1791_v38  ;;  %v7748_v16 = vpop.eup %7747  ;;  %v1809_v44 = vsel %vm788_vm1, %v7746_v41, 0.0  ;;  %v8755_v38 = vpack.c.bf16 %v449_v37, %v448_v35 }
 0x6a3   : > { %v7750_v45 = vpop.eup %7749  ;;  %v1810_v47 = vadd.f32 %v1809_v44, %v1808_v42  ;;  %v1811_v48 = vsel %vm788_vm1, %v7748_v16, 0.0  ;;  %v2037_v42 = vpop.permute.xlu1 %2036 }
 0x6a4   : > { %v7752_v51 = vpop.eup %7751  ;;  %v1813_v55 = vsel %vm788_vm1, %v7750_v45, 0.0 }
 0x6a5   : > { %v1812_v53 = vadd.f32 %v1811_v48, %v1810_v47  ;;  %v7754_v54 = vpop.eup %7753  ;;  %v1815_v59 = vsel %vm788_vm1, %v7752_v51, 0.0 }
 0x6a6   : > { %v7756_v56 = vpop.eup %7755  ;;  %v1817_v0 = vsel %vm788_vm1, %v7754_v54, 0.0 }
 0x6a7   : > { %v1814_v57 = vadd.f32 %v1813_v55, %v1812_v53  ;;  %v1819_v1 = vsel %vm788_vm1, %v7756_v56, 0.0  ;;  %v2053_v44 = vpop.permute.xlu1 %2052 }
 0x6a9   : > { %v1816_v61 = vadd.f32 %v1815_v59, %v1814_v57 }
 0x6ab   : > { %v7758_v63 = vpop.eup %7757  ;;  %v1818_v11 = vadd.f32 %v1817_v0, %v1816_v61  ;;  %v2055_v47 = vpop.permute.xlu1 %2054 }
 0x6ac   : > { %v7760_v4 = vpop.eup %7759  ;;  %v1825_v12 = vmul.f32 %v7758_v63, %v8695_v58  ;;  %v1826_v13 = vmul.f32 %v7758_v63, %v8697_v60  ;;  %v1827_v14 = vmul.f32 %v7758_v63, %v8701_v62  ;;  %v1828_v15 = vmul.f32 %v7758_v63, %v8707_v7 }
 0x6ad   : > { %v1829_v18 = vmul.f32 %v7758_v63, %v7736_v20  ;;  %v1830_v19 = vmul.f32 %v7758_v63, %v7738_v24  ;;  %v1831_v21 = vmul.f32 %v7758_v63, %v7740_v28  ;;  %v1820_v22 = vadd.f32 %v1819_v1, %v1818_v11  ;;  %v459_v28 = vld [vmem:[#allocation7 + $0x28] sm:$0xff] }
 0x6ae   : > { %7005 = vmatprep.mubr.msk.f32.mxu1 %vm788_vm1, %v1825_v12  ;;  %v1832_v5 = vmul.f32 %v7758_v63, %v7742_v33  ;;  %v1821_v10 = vsel %vm788_vm1, %v7760_v4, 0.0  ;;  %v8745_v29 = vpack.c.bf16 %v459_v28, %v458_v27  ;;  %v446_v33 = vld [vmem:[#allocation8 + $0x20] sm:$0xff] }
 0x6af   : > { %7006 = vmatmul.mubr.msk.f32.vlgmr.msra.gmra.mrb[16].mxu1 %vm788_vm1, %v1826_v13  ;;  %v1822_v43 = vadd.f32 %v1821_v10, %v1820_v22  ;;  %v8753_v36 = vpack.c.bf16 %v447_v34, %v446_v33  ;;  %v2057_v0 = vpop.permute.xlu1 %2056 }
 0x6b0   : > { %7008 = vmatprep.mubr.msk.f32.mxu1 %vm788_vm1, %v1827_v14  ;;  %7455 = vmatprep.subr.bf16.mxu0 %v8745_v29 }
 0x6b1   : > { %7761 = vrcp.f32 %v1822_v43  ;;  %7457 = vmatpush3.bf16.msra.mxu0 %v8745_v29  ;;  %7463 = vmatprep.subr.bf16.mxu1 %v8753_v36 }
 0x6b2   : > { %7459 = vmatprep.subr.bf16.mxu0 %v8749_v32  ;;  %7465 = vmatpush3.bf16.msra.mxu1 %v8753_v36 }
 0x6b3   : > { %7009 = vmatmul.mubr.msk.f32.gmra.mrb[18].mxu1 %vm788_vm1, %v1828_v15  ;;  %7467 = vmatprep.subr.bf16.mxu1 %v8755_v38 }
 0x6b4   : > { %7011 = vmatprep.mubr.msk.f32.mxu1 %vm788_vm1, %v1829_v18 }
 0x6b5   : > { %7461 = vmatpush3.bf16.msra.mxu0 %v8749_v32 }
 0x6b6   : > { %7469 = vmatpush3.bf16.msra.mxu1 %v8755_v38 }
 0x6b7   : > { %7012 = vmatmul.mubr.msk.f32.gmra.mrb[20].mxu1 %vm788_vm1, %v1830_v19  ;;  %7479 = vmatprep.subr.bf16.mxu1 %v8409_v3 }
 0x6b8   : > { %7014 = vmatprep.mubr.msk.f32.mxu1 %vm788_vm1, %v1831_v21 }
 0x6bb   : > { %7015 = vmatmul.mubr.msk.f32.gmra.mrb[22].mxu1 %vm788_vm1, %v1832_v5  ;;  %v7762_v58 = vpop.eup %7761  ;;  %v2059_v5 = vpop.permute.xlu1 %2058 }
 0x6bc   : > { %v1833_v60 = vmul.f32 %v7762_v58, %v7744_v40  ;;  %v1834_v62 = vmul.f32 %v7762_v58, %v7746_v41  ;;  %v1835_v7 = vmul.f32 %v7762_v58, %v7748_v16  ;;  %v1836_v20 = vmul.f32 %v7762_v58, %v7750_v45  ;;  %v2051_v40 = vpop.permute.xlu0 %2050 }
 0x6bd   : > { %v1837_v23 = vmul.f32 %v7762_v58, %v7752_v51  ;;  %v1838_v24 = vmul.f32 %v7762_v58, %v7754_v54  ;;  %v1839_v25 = vmul.f32 %v7762_v58, %v7756_v56  ;;  %v1840_v26 = vmul.f32 %v7762_v58, %v7760_v4 }
 0x6be   : > { %7017 = vmatprep.mubr.msk.f32.mxu1 %vm788_vm1, %v1833_v60 }
 0x6bf   : > { %7018 = vmatmul.mubr.msk.f32.gmra.mrb[24].mxu1 %vm788_vm1, %v1834_v62  ;;  %v2061_v28 = vpop.permute.xlu1 %2060 }
 0x6c0   : > { %7020 = vmatprep.mubr.msk.f32.mxu1 %vm788_vm1, %v1835_v7  ;;  %v2039_v41 = vpop.permute.xlu0 %2038 }
 0x6c3   : > { %7021 = vmatmul.mubr.msk.f32.gmra.mrb[26].mxu1 %vm788_vm1, %v1836_v20 }
 0x6c4   : > { %7023 = vmatprep.mubr.msk.f32.mxu1 %vm788_vm1, %v1837_v23  ;;  %v2041_v16 = vpop.permute.xlu0 %2040 }
 0x6c7   : > { %7024 = vmatmul.mubr.msk.f32.gmra.mrb[28].mxu1 %vm788_vm1, %v1838_v24 }
 0x6c8   : > { %7026 = vmatprep.mubr.msk.f32.mxu1 %vm788_vm1, %v1839_v25  ;;  %v2043_v45 = vpop.permute.xlu0 %2042 }
 0x6cb   : > { %7027 = vmatmul.mubr.msk.f32.gmra.mrb[30].mxu1 %vm788_vm1, %v1840_v26 }
 0x6cc   : > { %v2045_v51 = vpop.permute.xlu0 %2044 }
 0x6d0   : > { %v2047_v11 = vpop.permute.xlu0 %2046 }
 0x6d4   : > { %v2049_v58 = vpop.permute.xlu0 %2048 }
 0x782   : > { %v7007_v48 = vpop.f32.mrb[16].mxu1 }
 0x783   : > { %v2083_v53 = vmul.f32 %v7007_v48, %v2037_v42  ;;  %v1955_v54 = vpop.f32.mrb[17].mxu1 }
 0x784   : > { %v2082_v55 = vmul.f32 %v2035_v39, %v1955_v54 }
 0x785   : > { %v2099_v56 = vsel %vm489_vm0, %v2083_v53, 0.0 }
 0x786   : > { %v2098_v57 = vsel %vm489_vm0, %v2082_v55, 0.0  ;;  %v7010_v59 = vpop.f32.mrb[18].mxu1 }
 0x787   : > { %v2100_v61 = vadd.f32 %v2099_v56, %v2098_v57  ;;  %v1965_v63 = vpop.f32.mrb[19].mxu1  ;;  %v2085_v1 = vmul.f32 %v7010_v59, %v2041_v16 }
 0x788   : > { %v2084_v4 = vmul.f32 %v2039_v41, %v1965_v63 }
 0x789   : > { %v2103_v18 = vsel %vm489_vm0, %v2085_v1, 0.0 }
 0x78a   : > { %v2101_v12 = vsel %vm489_vm0, %v2084_v4, 0.0  ;;  %v7013_v13 = vpop.f32.mrb[20].mxu1 }
 0x78b   : > { %v2102_v14 = vadd.f32 %v2101_v12, %v2100_v61  ;;  %v1975_v15 = vpop.f32.mrb[21].mxu1  ;;  %v2087_v19 = vmul.f32 %v7013_v13, %v2045_v51  ;;  %v2063_v51 = vpop.permute.xlu1 %2062 }
 0x78c   : > { %v2086_v21 = vmul.f32 %v2043_v45, %v1975_v15 }
 0x78d   : > { %v2104_v22 = vadd.f32 %v2103_v18, %v2102_v14  ;;  %v2107_v7 = vsel %vm489_vm0, %v2087_v19, 0.0 }
 0x78e   : > { %v2105_v10 = vsel %vm489_vm0, %v2086_v21, 0.0  ;;  %v7016_v43 = vpop.f32.mrb[22].mxu1  ;;  %v6406_v21 = vld [vmem:[%s9558_s3 + $0x1] ss:$0 sm:$0xff] }
 0x78f   : > { %v2106_v60 = vadd.f32 %v2105_v10, %v2104_v22  ;;  %v1985_v62 = vpop.f32.mrb[23].mxu1  ;;  %v2089_v20 = vmul.f32 %v7016_v43, %v2049_v58  ;;  %v2065_v1 = vpop.permute.xlu1 %2064 }
 0x790   : > { %v2088_v23 = vmul.f32 %v2047_v11, %v1985_v62  ;;  %v465_v62 = vld [vmem:[#allocation7 + $0x40] sm:$0xff] }
 0x791   : > { %v2108_v24 = vadd.f32 %v2107_v7, %v2106_v60  ;;  %v2111_v30 = vsel %vm489_vm0, %v2089_v20, 0.0  ;;  %v466_v7 = vld [vmem:[#allocation7 + $0x48] sm:$0xff]  ;;  %v467_v20 = vld [vmem:[#allocation7 + $0x50] sm:$0xff] }
 0x792   : > { %v2109_v25 = vsel %vm489_vm0, %v2088_v23, 0.0  ;;  %v7019_v27 = vpop.f32.mrb[24].mxu1  ;;  %v8789_v23 = vpack.c.bf16 %v466_v7, %v465_v62 }
 0x793   : > { %v2110_v26 = vadd.f32 %v2109_v25, %v2108_v24  ;;  %v2091_v31 = vmul.f32 %v7019_v27, %v2053_v44  ;;  %v1995_v33 = vpop.f32.mrb[25].mxu1  ;;  %v468_v24 = vld [vmem:[#allocation7 + $0x58] sm:$0xff] }
 0x794   : > { %v2090_v35 = vmul.f32 %v2051_v40, %v1995_v33  ;;  %v8791_v25 = vpack.c.bf16 %v468_v24, %v467_v20  ;;  %7471 = vmatprep.subr.bf16.mxu0 %v8789_v23 }
 0x795   : > { %v2112_v34 = vadd.f32 %v2111_v30, %v2110_v26  ;;  %v2114_v37 = vsel %vm489_vm0, %v2091_v31, 0.0  ;;  %v6409_v26 = vld [vmem:[%s9560_s5 + $0x1] ss:$0 sm:$0xff] }
 0x796   : > { %v2113_v39 = vsel %vm489_vm0, %v2090_v35, 0.0  ;;  %v7022_v41 = vpop.f32.mrb[26].mxu1 }
 0x797   : > { %7037 = vmatprep.mubr.msk.f32.mxu0 %vm489_vm0, %v2112_v34  ;;  %v2115_v42 = vadd.f32 %v2114_v37, %v2113_v39  ;;  %v2005_v16 = vpop.f32.mrb[27].mxu1  ;;  %v2093_v45 = vmul.f32 %v7022_v41, %v2057_v0  ;;  %v6412_v39 = vld [vmem:[%s9558_s3 + $0x2] ss:$0 sm:$0xff] }
 0x798   : > { %v2092_v48 = vmul.f32 %v2055_v47, %v2005_v16 }
 0x799   : > { %v2118_v56 = vsel %vm489_vm0, %v2093_v45, 0.0 }
 0x79a   : > { %v2116_v53 = vsel %vm489_vm0, %v2092_v48, 0.0  ;;  %v7025_v54 = vpop.f32.mrb[28].mxu1 }
 0x79b   : > { %v2117_v55 = vadd.f32 %v2116_v53, %v2115_v42  ;;  %v2015_v44 = vpop.f32.mrb[29].mxu1  ;;  %v2095_v40 = vmul.f32 %v7025_v54, %v2061_v28 }
 0x79c   : > { %v2094_v57 = vmul.f32 %v2059_v5, %v2015_v44 }
 0x79d   : > { %v2119_v59 = vadd.f32 %v2118_v56, %v2117_v55  ;;  %v2122_v0 = vsel %vm489_vm0, %v2095_v40, 0.0 }
 0x79e   : > { %v2120_v61 = vsel %vm489_vm0, %v2094_v57, 0.0  ;;  %v7028_v63 = vpop.f32.mrb[30].mxu1 }
 0x79f   : > { %v2121_v4 = vadd.f32 %v2120_v61, %v2119_v59  ;;  %v2025_v11 = vpop.f32.mrb[31].mxu1  ;;  %v2097_v47 = vmul.f32 %v7028_v63, %v2065_v1  ;;  %v436_v63 = vld [vmem:[#allocation5 + $0x10] sm:$0xff]  ;;  %v437_v1 = vld [vmem:[#allocation5 + $0x18] sm:$0xff] }
 0x7a0   : > { %v2096_v12 = vmul.f32 %v2063_v51, %v2025_v11 }
 0x7a1   : > { %v2123_v13 = vadd.f32 %v2122_v0, %v2121_v4  ;;  %v2126_v18 = vsel %vm489_vm0, %v2097_v47, 0.0 }
 0x7a2   : > { %v2124_v14 = vsel %vm489_vm0, %v2096_v12, 0.0  ;;  %v426_v12 = vld [vmem:[%s8395_s12 + $0x20] sm:$0xff] }
 0x7a3   : > { %v2125_v15 = vadd.f32 %v2124_v14, %v2123_v13  ;;  %v427_v13 = vld [vmem:[%s8395_s12 + $0x28] sm:$0xff]  ;;  %v428_v14 = vld [vmem:[%s8395_s12 + $0x30] sm:$0xff] }
 0x7a5   : > { %v2127_v19 = vadd.f32 %v2126_v18, %v2125_v15  ;;  %v429_v15 = vld [vmem:[%s8395_s12 + $0x38] sm:$0xff]  ;;  %v8837_v18 = vld [vmem:[%s9564_s9] sm:$0xff] }
 0x7a7   : > { %7038 = vmatmul.mubr.msk.f32.vlgmr.msra.gmra.mrb[34].mxu0 %vm489_vm0, %v2127_v19 }
 0x7a8   : > { %7473 = vmatpush3.bf16.msra.mxu0 %v8789_v23 }
 0x7a9   : > { %7475 = vmatprep.subr.bf16.mxu0 %v8791_v25 }
 0x7ac   : > { %7477 = vmatpush3.bf16.msra.mxu0 %v8791_v25 }
 0x7ad   : > { %7487 = vmatprep.subr.bf16.mxu0 %v8422_v9 }
 0x87a   : > { %v7039_v22 = vpop.f32.mrb[34].mxu0 }
 0x87b   : > { %v2212_v5 = vadd.f32 %v7039_v22, %v6406_v21  ;;  %v2206_v10 = vpop.f32.mrb[35].mxu0 }
 0x87c   : > { %v2207_v43 = vadd.f32 %v6406_v21, %v2206_v10  ;;  %v7916_v21 = vld [vmem:[%s9560_s5] ss:$0 sm:$0xff] }
 0x87d   : > { %v2216_v60 = vmax.f32 %v2212_v5, 0.0 }
 0x87e   : > { %v2215_v58 = vmax.f32 %v2207_v43, 0.0 }
 0x880   : > { %7048 = vmatprep.mubr.msk.f32.mxu1 %vm489_vm0, %v2215_v58 }
 0x881   : > { %7049 = vmatmul.mubr.msk.f32.vlgmr.msra.gmra.mrb[32].mxu1 %vm489_vm0, %v2216_v60 }
 0x882   : > { %7481 = vmatpush3.bf16.msra.mxu1 %v8409_v3 }
 0x883   : > { %7483 = vmatprep.subr.bf16.mxu1 %v8411_v6 }
 0x886   : > { %7485 = vmatpush3.bf16.msra.mxu1 %v8411_v6 }
 0x887   : > { %7606 = vmatprep.subr.bf16.mxu1 %v8422_v9 }
 0x954   : > { %v7050_v27 = vpop.f32.mrb[32].mxu1 }
 0x955   : > { %v2301_v28 = vadd.f32 %v7050_v27, %v6409_v26  ;;  %v2295_v30 = vpop.f32.mrb[33].mxu1 }
 0x956   : > { %v2296_v31 = vadd.f32 %v6409_v26, %v2295_v30 }
 0x957   : > { %v2305_v33 = vmax.f32 %v2301_v28, 0.0 }
 0x958   : > { %v2304_v34 = vmax.f32 %v2296_v31, 0.0 }
 0x959   : > { %2316 = vrot.lane.b32.xlu1 %v2305_v33, %s8125_s10 }
 0x95a   : > { %2314 = vrot.lane.b32.xlu0 %v2304_v34, %s8125_s10 }
 0x9cb   : > { %v2317_v37 = vpop.permute.xlu1 %2316 }
 0x9cc   : > { %v2315_v35 = vpop.permute.xlu0 %2314 }
 0x9cd   : > { %7059 = vmatprep.mubr.msk.f32.mxu0 %vm489_vm0, %v2315_v35 }
 0x9ce   : > { %7060 = vmatmul.mubr.msk.f32.vlgmr.msra.gmra.mrb[36].mxu0 %vm489_vm0, %v2317_v37 }
 0x9cf   : > { %7489 = vmatpush3.bf16.msra.mxu0 %v8422_v9 }
 0x9d0   : > { %7491 = vmatprep.subr.bf16.mxu0 %v8443_v17 }
 0x9d3   : > { %7493 = vmatpush3.bf16.msra.mxu0 %v8443_v17 }
 0x9d4   : > { %7495 = vmatprep.subr.bf16.mxu0 %v8515_v46 }
 0xaa1   : > { %v7061_v41 = vpop.f32.mrb[36].mxu0 }
 0xaa2   : > { %v2394_v42 = vadd.f32 %v7061_v41, %v6412_v39  ;;  %v2388_v16 = vpop.f32.mrb[37].mxu0 }
 0xaa3   : > { %v2389_v45 = vadd.f32 %v6412_v39, %v2388_v16 }
 0xaa4   : > { %v6416_v48 = vmul.f32 -1.442695, %v2394_v42 }
 0xaa5   : > { %v6415_v51 = vmul.f32 -1.442695, %v2389_v45 }
 0xaa6   : > { %7763 = vpow2.f32 %v6416_v48 }
 0xaa7   : > { %7765 = vpow2.f32 %v6415_v51 }
 0xab0   : > { %v7764_v53 = vpop.eup %7763 }
 0xab1   : > { %v7766_v54 = vpop.eup %7765  ;;  %v2404_v55 = vadd.f32 1.0, %v7764_v53 }
 0xab2   : > { %v2403_v44 = vadd.f32 1.0, %v7766_v54 }
 0xab3   : > { %7767 = vrcp.f32 %v2404_v55 }
 0xab4   : > { %7769 = vrcp.f32 %v2403_v44 }
 0xabd   : > { %v7768_v56 = vpop.eup %7767 }
 0xabe   : > { %v7770_v40 = vpop.eup %7769  ;;  %v2410_v57 = vmul.f32 %v7768_v56, %v2301_v28 }
 0xabf   : > { %v2409_v59 = vmul.f32 %v7770_v40, %v2296_v31 }
 0xac0   : > { %v2412_v61 = vsel %vm489_vm0, %v2410_v57, 0.0 }
 0xac1   : > { %v2411_v4 = vsel %vm489_vm0, %v2409_v59, 0.0 }
 0xac2   : > { %v2413_v11 = vadd.f32 %v2412_v61, %v2411_v4 }
 0xac4   : > { %v2414_v0 = vadd.f32 %v2413_v11, %v436_v63  ;;  %v8815_v47 = vadd.f32 %v2413_v11, %v437_v1  ;;  %6204 = vst.msk [vmem:[%s8817_s11] sm:$0xff] %vm489_vm0, %v2413_v11 }
 0xac6   : > { %7070 = vmatprep.mubr.msk.f32.mxu1 %vm489_vm0, %v2414_v0 }
 0xac7   : > { %7071 = vmatmul.mubr.msk.f32.vlgmr.msra.gmra.mrb[34].mxu1 %vm489_vm0, %v8815_v47 }
 0xac8   : > { %7073 = vmatprep.mubr.msk.f32.mxu1 %vm489_vm0, %v426_v12  ;;  %7608 = vmatpush3.bf16.msra.mxu1 %v8422_v9 }
 0xac9   : > { %7607 = vmatprep.subr.bf16.mxu1 %v8443_v17 }
 0xacb   : > { %7074 = vmatmul.mubr.msk.f32.gmra.mrb[36].mxu1 %vm489_vm0, %v427_v13 }
 0xacc   : > { %7076 = vmatprep.mubr.msk.f32.mxu1 %vm489_vm0, %v428_v14  ;;  %7609 = vmatpush3.bf16.msra.mxu1 %v8443_v17 }
 0xacd   : > { %7105 = vmatprep.subr.mxu1 %v8837_v18 }
 0xacf   : > { %7077 = vmatmul.mubr.msk.f32.gmra.mrb[38].mxu1 %vm489_vm0, %v429_v15 }
 0xb9a   : > { %v7072_v19 = vpop.f32.mrb[34].mxu1 }
 0xb9b   : > { %v2506_v22 = vadd.f32 %v7916_v21, %v7072_v19  ;;  %v2500_v5 = vpop.f32.mrb[35].mxu1 }
 0xb9c   : > { %v2501_v10 = vadd.f32 %v7916_v21, %v2500_v5 }
 0xb9d   : > { %2977 = vrot.lane.b32.xlu1 %v2506_v22, %s8125_s10  ;;  %v2530_v60 = vmul.f32 %v2506_v22, %v2414_v0  ;;  %v2536_v41 = vmul.f32 %v2506_v22, %v8815_v47 }
 0xb9e   : > { %v2529_v43 = vmul.f32 %v2501_v10, %v2414_v0  ;;  %v7075_v58 = vpop.f32.mrb[36].mxu1  ;;  %2975 = vrot.lane.b32.xlu0 %v2501_v10, %s8125_s10  ;;  %v2535_v39 = vmul.f32 %v2501_v10, %v8815_v47 }
 0xb9f   : > { %v2516_v62 = vadd.f32 %v7916_v21, %v7075_v58  ;;  %v2510_v7 = vpop.f32.mrb[37].mxu1 }
 0xba0   : > { %v2511_v20 = vadd.f32 %v7916_v21, %v2510_v7  ;;  %7087 = vmatprep.mubr.msk.f32.mxu0 %vm489_vm0, %v2529_v43 }
 0xba1   : > { %2981 = vrot.lane.b32.xlu1 %v2516_v62, %s8125_s10  ;;  %7088 = vmatmul.mubr.msk.f32.vlgmr.msra.gmra.mrb[38].mxu0 %vm489_vm0, %v2530_v60  ;;  %v2532_v27 = vmul.f32 %v2516_v62, %v2414_v0  ;;  %v2538_v16 = vmul.f32 %v2516_v62, %v8815_v47 }
 0xba2   : > { %v2531_v24 = vmul.f32 %v2511_v20, %v2414_v0  ;;  %v7078_v26 = vpop.f32.mrb[38].mxu1  ;;  %2979 = vrot.lane.b32.xlu0 %v2511_v20, %s8125_s10  ;;  %7497 = vmatpush3.bf16.msra.mxu0 %v8515_v46  ;;  %v2537_v42 = vmul.f32 %v2511_v20, %v8815_v47 }
 0xba3   : > { %v2526_v28 = vadd.f32 %v7916_v21, %v7078_v26  ;;  %v2520_v30 = vpop.f32.mrb[39].mxu1  ;;  %7499 = vmatprep.subr.bf16.mxu0 %v8519_v49 }
 0xba4   : > { %v2521_v31 = vadd.f32 %v7916_v21, %v2520_v30  ;;  %7090 = vmatprep.mubr.msk.f32.mxu0 %vm489_vm0, %v2531_v24 }
 0xba5   : > { %2985 = vrot.lane.b32.xlu1 %v2526_v28, %s8125_s10  ;;  %7091 = vmatmul.mubr.msk.f32.gmra.mrb[40].mxu0 %vm489_vm0, %v2532_v27  ;;  %v2534_v35 = vmul.f32 %v2526_v28, %v2414_v0  ;;  %v2540_v37 = vmul.f32 %v2526_v28, %v8815_v47 }
 0xba6   : > { %v2533_v33 = vmul.f32 %v2521_v31, %v2414_v0  ;;  %v2539_v34 = vmul.f32 %v2521_v31, %v8815_v47  ;;  %2983 = vrot.lane.b32.xlu0 %v2521_v31, %s8125_s10  ;;  %7501 = vmatpush3.bf16.msra.mxu0 %v8519_v49 }
 0xba7   : > { %7511 = vmatprep.subr.bf16.mxu0 %v8422_v9 }
 0xba8   : > { %7093 = vmatprep.mubr.msk.f32.mxu0 %vm489_vm0, %v2533_v33  ;;  %7102 = vmatprep.mubr.msk.f32.mxu1 %vm489_vm0, %v2539_v34 }
 0xba9   : > { %7094 = vmatmul.mubr.msk.f32.gmra.mrb[42].mxu0 %vm489_vm0, %v2534_v35  ;;  %7103 = vmatmul.mubr.msk.f32.vlgmr.msra.gmra.mrb[40].mxu1 %vm489_vm0, %v2540_v37 }
 0xbaa   : > { %7096 = vmatprep.mubr.msk.f32.mxu0 %vm489_vm0, %v2535_v39  ;;  %7106 = vmatpush3.msra.mxu1 %v8837_v18 }
 0xbab   : > { %7503 = vmatprep.subr.bf16.mxu1 %v8529_v52 }
 0xbad   : > { %7097 = vmatmul.mubr.msk.f32.gmra.mrb[44].mxu0 %vm489_vm0, %v2536_v41 }
 0xbae   : > { %7099 = vmatprep.mubr.msk.f32.mxu0 %vm489_vm0, %v2537_v42 }
 0xbb1   : > { %7100 = vmatmul.mubr.msk.f32.gmra.mrb[46].mxu0 %vm489_vm0, %v2538_v16 }
 0xc74   : > { %v7089_v45 = vpop.f32.mrb[38].mxu0 }
 0xc75   : > { %v2643_v48 = vpop.f32.mrb[39].mxu0  ;;  %v2703_v51 = vmul.f32 0.5, %v7089_v45 }
 0xc76   : > { %v2702_v53 = vmul.f32 0.5, %v2643_v48 }
 0xc77   : > { %v2715_v40 = vsel %vm788_vm1, %v2703_v51, -inf }
 0xc78   : > { %v7092_v54 = vpop.f32.mrb[40].mxu0  ;;  %v2714_v59 = vsel %vm788_vm1, %v2702_v53, -inf }
 0xc79   : > { %v2705_v55 = vmul.f32 0.5, %v7092_v54  ;;  %v2653_v44 = vpop.f32.mrb[41].mxu0 }
 0xc7a   : > { %v2704_v56 = vmul.f32 0.5, %v2653_v44 }
 0xc7b   : > { %v2718_v57 = vsel %vm788_vm1, %v2705_v55, -inf }
 0xc7c   : > { %v2719_v61 = vmax.f32 %v2715_v40, %v2718_v57  ;;  %v2716_v63 = vsel %vm788_vm1, %v2704_v56, -inf  ;;  %v7095_v1 = vpop.f32.mrb[42].mxu0  ;;  %v7104_v4 = vpop.f32.mrb[40].mxu1 }
 0xc7d   : > { %v2717_v11 = vmax.f32 %v2714_v59, %v2716_v63  ;;  %v2707_v0 = vmul.f32 0.5, %v7095_v1  ;;  %v2663_v47 = vpop.f32.mrb[43].mxu0  ;;  %v2693_v12 = vpop.f32.mrb[41].mxu1  ;;  %v2713_v43 = vmul.f32 0.5, %v7104_v4 }
 0xc7e   : > { %v2706_v13 = vmul.f32 0.5, %v2663_v47  ;;  %v2712_v58 = vmul.f32 0.5, %v2693_v12 }
 0xc7f   : > { %v2722_v14 = vsel %vm788_vm1, %v2707_v0, -inf }
 0xc80   : > { %v2723_v15 = vmax.f32 %v2719_v61, %v2722_v14  ;;  %v2720_v19 = vsel %vm788_vm1, %v2706_v13, -inf  ;;  %v7098_v21 = vpop.f32.mrb[44].mxu0 }
 0xc81   : > { %v2721_v22 = vmax.f32 %v2717_v11, %v2720_v19  ;;  %v2673_v5 = vpop.f32.mrb[45].mxu0  ;;  %v2709_v60 = vmul.f32 0.5, %v7098_v21 }
 0xc82   : > { %v2708_v62 = vmul.f32 0.5, %v2673_v5 }
 0xc83   : > { %v2724_v10 = vmax.f32 %v2721_v22, %v2723_v15  ;;  %v2726_v42 = vsel %vm788_vm1, %v2709_v60, -inf }
 0xc84   : > { %v7101_v7 = vpop.f32.mrb[46].mxu0  ;;  %v2725_v16 = vsel %vm788_vm1, %v2708_v62, -inf }
 0xc85   : > { %v2736_v20 = vsub.f32 %v2702_v53, %v2724_v10  ;;  %v2737_v24 = vsub.f32 %v2703_v51, %v2724_v10  ;;  %v2738_v26 = vsub.f32 %v2704_v56, %v2724_v10  ;;  %v2739_v27 = vsub.f32 %v2705_v55, %v2724_v10  ;;  %v2683_v28 = vpop.f32.mrb[47].mxu0 }
 0xc86   : > { %v2740_v30 = vsub.f32 %v2706_v13, %v2724_v10  ;;  %v2741_v31 = vsub.f32 %v2707_v0, %v2724_v10  ;;  %v2711_v33 = vmul.f32 0.5, %v7101_v7  ;;  %v2710_v34 = vmul.f32 0.5, %v2683_v28 }
 0xc87   : > { %v2748_v35 = vmul.f32 1.442695, %v2736_v20  ;;  %v2750_v37 = vmul.f32 1.442695, %v2737_v24  ;;  %v2752_v39 = vmul.f32 1.442695, %v2738_v26 }
 0xc88   : > { %v2754_v41 = vmul.f32 1.442695, %v2739_v27  ;;  %v2729_v45 = vsel %vm788_vm1, %v2711_v33, -inf  ;;  %v2727_v48 = vsel %vm788_vm1, %v2710_v34, -inf  ;;  %v2756_v51 = vmul.f32 1.442695, %v2740_v30 }
 0xc89   : > { %7771 = vpow2.f32 %v2748_v35  ;;  %v2730_v53 = vmax.f32 %v2726_v42, %v2729_v45  ;;  %v2728_v54 = vmax.f32 %v2725_v16, %v2727_v48  ;;  %v2733_v55 = vsel %vm788_vm1, %v2713_v43, -inf }
 0xc8a   : > { %7773 = vpow2.f32 %v2750_v37  ;;  %v2758_v44 = vmul.f32 1.442695, %v2741_v31  ;;  %v2731_v56 = vsel %vm788_vm1, %v2712_v58, -inf }
 0xc8b   : > { %7775 = vpow2.f32 %v2752_v39  ;;  %v2734_v40 = vmax.f32 %v2730_v53, %v2733_v55  ;;  %v2732_v57 = vmax.f32 %v2728_v54, %v2731_v56 }
 0xc8c   : > { %7777 = vpow2.f32 %v2754_v41 }
 0xc8d   : > { %7779 = vpow2.f32 %v2756_v51  ;;  %v2735_v59 = vmax.f32 %v2732_v57, %v2734_v40 }
 0xc8e   : > { %7781 = vpow2.f32 %v2758_v44 }
 0xc8f   : > { %v2742_v61 = vsub.f32 %v2708_v62, %v2735_v59  ;;  %v2743_v63 = vsub.f32 %v2709_v60, %v2735_v59  ;;  %v2744_v1 = vsub.f32 %v2710_v34, %v2735_v59  ;;  %v2745_v4 = vsub.f32 %v2711_v33, %v2735_v59 }
 0xc90   : > { %v2746_v11 = vsub.f32 %v2712_v58, %v2735_v59  ;;  %v2747_v0 = vsub.f32 %v2713_v43, %v2735_v59 }
 0xc91   : > { %v2760_v47 = vmul.f32 1.442695, %v2742_v61  ;;  %v2762_v12 = vmul.f32 1.442695, %v2743_v63  ;;  %v2764_v13 = vmul.f32 1.442695, %v2744_v1 }
 0xc92   : > { %v2766_v15 = vmul.f32 1.442695, %v2745_v4  ;;  %v2768_v10 = vmul.f32 1.442695, %v2746_v11  ;;  %v2770_v43 = vmul.f32 1.442695, %v2747_v0 }
 0xc93   : > { %v7772_v14 = vpop.eup %7771  ;;  %7783 = vpow2.f32 %v2760_v47 }
 0xc94   : > { %v7774_v19 = vpop.eup %7773  ;;  %v2772_v21 = vsel %vm788_vm1, %v7772_v14, 0.0  ;;  %7785 = vpow2.f32 %v2762_v12 }
 0xc95   : > { %v7776_v22 = vpop.eup %7775  ;;  %v2773_v5 = vsel %vm788_vm1, %v7774_v19, 0.0  ;;  %7787 = vpow2.f32 %v2764_v13 }
 0xc96   : > { %v7778_v62 = vpop.eup %7777  ;;  %v2774_v60 = vadd.f32 %v2773_v5, %v2772_v21  ;;  %v2775_v58 = vsel %vm788_vm1, %v7776_v22, 0.0  ;;  %7789 = vpow2.f32 %v2766_v15  ;;  %v2976_v5 = vpop.permute.xlu0 %2975 }
 0xc97   : > { %v7780_v7 = vpop.eup %7779  ;;  %v2777_v26 = vsel %vm788_vm1, %v7778_v62, 0.0  ;;  %7791 = vpow2.f32 %v2768_v10 }
 0xc98   : > { %v2776_v20 = vadd.f32 %v2775_v58, %v2774_v60  ;;  %v7782_v24 = vpop.eup %7781  ;;  %v2779_v28 = vsel %vm788_vm1, %v7780_v7, 0.0  ;;  %7793 = vpow2.f32 %v2770_v43 }
 0xc99   : > { %v2781_v31 = vsel %vm788_vm1, %v7782_v24, 0.0 }
 0xc9a   : > { %v2778_v27 = vadd.f32 %v2777_v26, %v2776_v20 }
 0xc9c   : > { %v2780_v30 = vadd.f32 %v2779_v28, %v2778_v27 }
 0xc9d   : > { %v7784_v33 = vpop.eup %7783 }
 0xc9e   : > { %v2782_v34 = vadd.f32 %v2781_v31, %v2780_v30  ;;  %v7786_v35 = vpop.eup %7785  ;;  %v2783_v37 = vsel %vm788_vm1, %v7784_v33, 0.0 }
 0xc9f   : > { %v7788_v39 = vpop.eup %7787  ;;  %v2784_v41 = vsel %vm788_vm1, %v7786_v35, 0.0 }
 0xca0   : > { %7795 = vrcp.f32 %v2782_v34  ;;  %v7790_v42 = vpop.eup %7789  ;;  %v2785_v16 = vadd.f32 %v2784_v41, %v2783_v37  ;;  %v2786_v45 = vsel %vm788_vm1, %v7788_v39, 0.0 }
 0xca1   : > { %v7792_v48 = vpop.eup %7791  ;;  %v2788_v53 = vsel %vm788_vm1, %v7790_v42, 0.0 }
 0xca2   : > { %v2787_v51 = vadd.f32 %v2786_v45, %v2785_v16  ;;  %v7794_v54 = vpop.eup %7793  ;;  %v2790_v44 = vsel %vm788_vm1, %v7792_v48, 0.0 }
 0xca3   : > { %v2792_v40 = vsel %vm788_vm1, %v7794_v54, 0.0 }
 0xca4   : > { %v2789_v55 = vadd.f32 %v2788_v53, %v2787_v51 }
 0xca6   : > { %v2791_v56 = vadd.f32 %v2790_v44, %v2789_v55 }
 0xca8   : > { %v2793_v57 = vadd.f32 %v2792_v40, %v2791_v56 }
 0xcaa   : > { %v7796_v59 = vpop.eup %7795  ;;  %7797 = vrcp.f32 %v2793_v57 }
 0xcab   : > { %v2796_v61 = vmul.f32 %v7796_v59, %v7772_v14  ;;  %v2797_v63 = vmul.f32 %v7796_v59, %v7774_v19  ;;  %v2798_v1 = vmul.f32 %v7796_v59, %v7776_v22  ;;  %v2799_v4 = vmul.f32 %v7796_v59, %v7778_v62  ;;  %v2978_v22 = vpop.permute.xlu1 %2977 }
 0xcac   : > { %v2800_v11 = vmul.f32 %v7796_v59, %v7780_v7  ;;  %v2801_v0 = vmul.f32 %v7796_v59, %v7782_v24  ;;  %v2980_v7 = vpop.permute.xlu0 %2979 }
 0xcad   : > { %7107 = vmatprep.mubr.msk.f32.mxu1 %vm788_vm1, %v2796_v61 }
 0xcae   : > { %7108 = vmatmul.mubr.msk.f32.vlgmr.msra.gmra.mrb[42].mxu1 %vm788_vm1, %v2797_v63 }
 0xcaf   : > { %7110 = vmatprep.mubr.msk.f32.mxu1 %vm788_vm1, %v2798_v1  ;;  %7505 = vmatpush3.bf16.msra.mxu1 %v8529_v52  ;;  %v2982_v58 = vpop.permute.xlu1 %2981 }
 0xcb0   : > { %7507 = vmatprep.subr.bf16.mxu1 %v8553_v50  ;;  %v2984_v37 = vpop.permute.xlu0 %2983 }
 0xcb2   : > { %7111 = vmatmul.mubr.msk.f32.gmra.mrb[44].mxu1 %vm788_vm1, %v2799_v4 }
 0xcb3   : > { %7113 = vmatprep.mubr.msk.f32.mxu1 %vm788_vm1, %v2800_v11  ;;  %7509 = vmatpush3.bf16.msra.mxu1 %v8553_v50 }
 0xcb4   : > { %7179 = vmatprep.subr.mxu1 %v8837_v18  ;;  %v7798_v47 = vpop.eup %7797 }
 0xcb5   : > { %v2802_v12 = vmul.f32 %v7798_v47, %v7784_v33  ;;  %v2803_v13 = vmul.f32 %v7798_v47, %v7786_v35  ;;  %v2804_v14 = vmul.f32 %v7798_v47, %v7788_v39  ;;  %v2805_v15 = vmul.f32 %v7798_v47, %v7790_v42  ;;  %v2986_v33 = vpop.permute.xlu1 %2985 }
 0xcb6   : > { %7114 = vmatmul.mubr.msk.f32.gmra.mrb[46].mxu1 %vm788_vm1, %v2801_v0  ;;  %v2806_v19 = vmul.f32 %v7798_v47, %v7792_v48  ;;  %v2807_v21 = vmul.f32 %v7798_v47, %v7794_v54 }
 0xcb7   : > { %7116 = vmatprep.mubr.msk.f32.mxu1 %vm788_vm1, %v2802_v12 }
 0xcba   : > { %7117 = vmatmul.mubr.msk.f32.gmra.mrb[48].mxu1 %vm788_vm1, %v2803_v13 }
 0xcbb   : > { %7119 = vmatprep.mubr.msk.f32.mxu1 %vm788_vm1, %v2804_v14 }
 0xcbe   : > { %7120 = vmatmul.mubr.msk.f32.gmra.mrb[50].mxu1 %vm788_vm1, %v2805_v15 }
 0xcbf   : > { %7122 = vmatprep.mubr.msk.f32.mxu1 %vm788_vm1, %v2806_v19 }
 0xcc2   : > { %7123 = vmatmul.mubr.msk.f32.gmra.mrb[52].mxu1 %vm788_vm1, %v2807_v21 }
 0xd81   : > { %v7109_v10 = vpop.f32.mrb[42].mxu1 }
 0xd82   : > { %v2994_v62 = vmul.f32 %v7109_v10, %v2978_v22  ;;  %v2910_v60 = vpop.f32.mrb[43].mxu1 }
 0xd83   : > { %v2993_v43 = vmul.f32 %v2976_v5, %v2910_v60 }
 0xd84   : > { %v3006_v20 = vsel %vm489_vm0, %v2994_v62, 0.0 }
 0xd85   : > { %v3005_v24 = vsel %vm489_vm0, %v2993_v43, 0.0  ;;  %v7112_v26 = vpop.f32.mrb[44].mxu1  ;;  %v7917_v43 = vld [vmem:[%s9558_s3] ss:$0 sm:$0xff] }
 0xd86   : > { %v3007_v27 = vadd.f32 %v3006_v20, %v3005_v24  ;;  %v2920_v28 = vpop.f32.mrb[45].mxu1  ;;  %v2996_v30 = vmul.f32 %v7112_v26, %v2982_v58 }
 0xd87   : > { %v2995_v31 = vmul.f32 %v2980_v7, %v2920_v28 }
 0xd88   : > { %v3010_v42 = vsel %vm489_vm0, %v2996_v30, 0.0 }
 0xd89   : > { %v3008_v34 = vsel %vm489_vm0, %v2995_v31, 0.0  ;;  %v7115_v35 = vpop.f32.mrb[46].mxu1  ;;  %v7918_v31 = vld [vmem:[%s9595_s19] ss:$0 sm:$0xff] }
 0xd8a   : > { %v3009_v39 = vadd.f32 %v3008_v34, %v3007_v27  ;;  %v2930_v41 = vpop.f32.mrb[47].mxu1  ;;  %v2998_v16 = vmul.f32 %v7115_v35, %v2986_v33 }
 0xd8b   : > { %v2997_v45 = vmul.f32 %v2984_v37, %v2930_v41 }
 0xd8c   : > { %v3011_v48 = vadd.f32 %v3010_v42, %v3009_v39  ;;  %v3014_v56 = vsel %vm489_vm0, %v2998_v16, 0.0 }
 0xd8d   : > { %v3012_v51 = vsel %vm489_vm0, %v2997_v45, 0.0  ;;  %v7118_v53 = vpop.f32.mrb[48].mxu1 }
 0xd8e   : > { %v3013_v54 = vadd.f32 %v3012_v51, %v3011_v48  ;;  %v3000_v55 = vmul.f32 %v7118_v53, %v2978_v22  ;;  %v2940_v44 = vpop.f32.mrb[49].mxu1 }
 0xd8f   : > { %v2999_v40 = vmul.f32 %v2976_v5, %v2940_v44 }
 0xd90   : > { %v3015_v57 = vadd.f32 %v3014_v56, %v3013_v54  ;;  %v3017_v59 = vsel %vm489_vm0, %v3000_v55, 0.0 }
 0xd91   : > { %v3016_v61 = vsel %vm489_vm0, %v2999_v40, 0.0  ;;  %v7121_v63 = vpop.f32.mrb[50].mxu1 }
 0xd92   : > { %v3018_v1 = vadd.f32 %v3017_v59, %v3016_v61  ;;  %v2950_v4 = vpop.f32.mrb[51].mxu1  ;;  %7133 = vmatprep.mubr.msk.f32.mxu0 %vm489_vm0, %v3015_v57  ;;  %v3002_v11 = vmul.f32 %v7121_v63, %v2982_v58 }
 0xd93   : > { %v3001_v0 = vmul.f32 %v2980_v7, %v2950_v4 }
 0xd94   : > { %v3021_v15 = vsel %vm489_vm0, %v3002_v11, 0.0 }
 0xd95   : > { %v3019_v47 = vsel %vm489_vm0, %v3001_v0, 0.0  ;;  %v7124_v12 = vpop.f32.mrb[52].mxu1 }
 0xd96   : > { %v3020_v13 = vadd.f32 %v3019_v47, %v3018_v1  ;;  %v2960_v14 = vpop.f32.mrb[53].mxu1  ;;  %v3004_v19 = vmul.f32 %v7124_v12, %v2986_v33 }
 0xd97   : > { %v3003_v21 = vmul.f32 %v2984_v37, %v2960_v14 }
 0xd98   : > { %v3022_v22 = vadd.f32 %v3021_v15, %v3020_v13  ;;  %v3025_v62 = vsel %vm489_vm0, %v3004_v19, 0.0 }
 0xd99   : > { %v3023_v5 = vsel %vm489_vm0, %v3003_v21, 0.0 }
 0xd9a   : > { %v3024_v10 = vadd.f32 %v3023_v5, %v3022_v22 }
 0xd9c   : > { %v3026_v60 = vadd.f32 %v3025_v62, %v3024_v10 }
 0xd9e   : > { %7134 = vmatmul.mubr.msk.f32.vlgmr.msra.gmra.mrb[48].mxu0 %vm489_vm0, %v3026_v60 }
 0xd9f   : > { %7513 = vmatpush3.bf16.msra.mxu0 %v8422_v9 }
 0xda0   : > { %7515 = vmatprep.subr.bf16.mxu0 %v8443_v17 }
 0xda3   : > { %7517 = vmatpush3.bf16.msra.mxu0 %v8443_v17 }
 0xda4   : > { %7519 = vmatprep.subr.bf16.mxu0 %v8745_v29 }
 0xe71   : > { %v7135_v58 = vpop.f32.mrb[48].mxu0 }
 0xe72   : > { %v3105_v7 = vadd.f32 %v7917_v43, %v7135_v58  ;;  %v3099_v20 = vpop.f32.mrb[49].mxu0 }
 0xe73   : > { %v3100_v24 = vadd.f32 %v7917_v43, %v3099_v20 }
 0xe74   : > { %v3109_v27 = vmax.f32 %v3105_v7, 0.0 }
 0xe75   : > { %v3108_v26 = vmax.f32 %v3100_v24, 0.0 }
 0xe77   : > { %7144 = vmatprep.mubr.msk.f32.mxu1 %vm489_vm0, %v3108_v26 }
 0xe78   : > { %7145 = vmatmul.mubr.msk.f32.vlgmr.msra.gmra.mrb[54].mxu1 %vm489_vm0, %v3109_v27 }
 0xe79   : > { %7180 = vmatpush3.msra.mxu1 %v8837_v18 }
 0xe7a   : > { %7527 = vmatprep.subr.bf16.mxu1 %v8753_v36 }
 0xf4b   : > { %v7146_v28 = vpop.f32.mrb[54].mxu1 }
 0xf4c   : > { %v3182_v30 = vpop.f32.mrb[55].mxu1  ;;  %v8952_v45 = vadd.f32 %v7918_v31, %v7146_v28 }
 0xf4d   : > { %v8942_v33 = vadd.f32 %v7918_v31, %v3182_v30 }
 0xf4e   : > { %v3249_v40 = vrot.slane %v8952_v45, %v8567_v2  ;;  %v3242_v4 = vcombine.high %v8952_v45, %v8952_v45 }
 0xf4f   : > { %v3200_v34 = vrot.slane %v8942_v33, %v8567_v2  ;;  %v3193_v35 = vcombine.high %v8942_v33, %v8942_v33 }
 0xf50   : > { %v3257_v1 = vcombine.high %v3249_v40, %v3249_v40  ;;  %v3265_v0 = vrot.slane %v3249_v40, %v8567_v2  ;;  %v3256_v13 = vrot.slane %v3242_v4, %v8567_v2 }
 0xf51   : > { %v3216_v37 = vrot.slane %v3200_v34, %v8567_v2  ;;  %v3208_v39 = vcombine.high %v3200_v34, %v3200_v34  ;;  %v3207_v18 = vrot.slane %v3193_v35, %v8567_v2 }
 0xf52   : > { %v3279_v12 = vrot.slane %v3257_v1, %v8567_v2  ;;  %v3326_v14 = vrot.slane %v3265_v0, %v8573_v8  ;;  %v3287_v15 = vcombine.high %v3265_v0, %v3265_v0  ;;  %v3258_v22 = vcombine.high %v3256_v13, %v3256_v13 }
 0xf53   : > { %v3294_v41 = vrot.slane %v3216_v37, %v8573_v8  ;;  %v3230_v42 = vrot.slane %v3208_v39, %v8567_v2  ;;  %v3238_v16 = vcombine.high %v3216_v37, %v3216_v37  ;;  %v3209_v53 = vcombine.high %v3207_v18, %v3207_v18 }
 0xf54   : > { %v3223_v55 = vrot.slane %v3207_v18, %v8567_v2  ;;  %v3330_v19 = vrot.slane %v3279_v12, %v8573_v8  ;;  %v3289_v21 = vcombine.high %v3279_v12, %v3279_v12  ;;  %v3334_v5 = vrot.slane %v3287_v15, %v8573_v8 }
 0xf55   : > { %3355 = vrot.lane.b32.xlu0 %v3294_v41, %s8125_s10  ;;  %v3298_v48 = vrot.slane %v3230_v42, %v8573_v8  ;;  %v3240_v51 = vcombine.high %v3230_v42, %v3230_v42  ;;  %v3302_v54 = vrot.slane %v3238_v16, %v8573_v8  ;;  %v3237_v56 = vrot.slane %v3209_v53, %v8567_v2 }
 0xf56   : > { %v3310_v57 = vrot.slane %v3223_v55, %v8573_v8  ;;  %v3239_v59 = vcombine.high %v3223_v55, %v3223_v55  ;;  %v3272_v10 = vrot.slane %v3256_v13, %v8567_v2  ;;  %v3338_v62 = vrot.slane %v3289_v21, %v8573_v8 }
 0xf57   : > { %3357 = vrot.lane.b32.xlu1 %v3298_v48, %s8125_s10  ;;  %v3306_v44 = vrot.slane %v3240_v51, %v8573_v8  ;;  %v3314_v61 = vrot.slane %v3237_v56, %v8573_v8  ;;  %v3241_v63 = vcombine.high %v3237_v56, %v3237_v56  ;;  %v3286_v60 = vrot.slane %v3258_v22, %v8567_v2 }
 0xf58   : > { %v3318_v11 = vrot.slane %v3239_v59, %v8573_v8  ;;  %v3342_v58 = vrot.slane %v3272_v10, %v8573_v8  ;;  %v3288_v43 = vcombine.high %v3272_v10, %v3272_v10 }
 0xf59   : > { %3359 = vrot.lane.b32.xlu0 %v3302_v54, %s8125_s10  ;;  %v3322_v47 = vrot.slane %v3241_v63, %v8573_v8  ;;  %v3346_v7 = vrot.slane %v3286_v60, %v8573_v8  ;;  %v3290_v20 = vcombine.high %v3286_v60, %v3286_v60 }
 0xf5a   : > { %v3350_v24 = vrot.slane %v3288_v43, %v8573_v8 }
 0xf5b   : > { %3361 = vrot.lane.b32.xlu1 %v3306_v44, %s8125_s10  ;;  %v3354_v26 = vrot.slane %v3290_v20, %v8573_v8 }
 0xf5d   : > { %3363 = vrot.lane.b32.xlu0 %v3310_v57, %s8125_s10 }
 0xf5f   : > { %3365 = vrot.lane.b32.xlu1 %v3314_v61, %s8125_s10 }
 0xf61   : > { %3367 = vrot.lane.b32.xlu0 %v3318_v11, %s8125_s10 }
 0xf63   : > { %3369 = vrot.lane.b32.xlu1 %v3322_v47, %s8125_s10 }
 0xf65   : > { %3371 = vrot.lane.b32.xlu0 %v3326_v14, %s8125_s10 }
 0xf67   : > { %3373 = vrot.lane.b32.xlu1 %v3330_v19, %s8125_s10 }
 0xf69   : > { %3375 = vrot.lane.b32.xlu0 %v3334_v5, %s8125_s10 }
 0xf6b   : > { %3377 = vrot.lane.b32.xlu1 %v3338_v62, %s8125_s10 }
 0xf6d   : > { %3379 = vrot.lane.b32.xlu0 %v3342_v58, %s8125_s10 }
 0xf6f   : > { %3381 = vrot.lane.b32.xlu1 %v3346_v7, %s8125_s10 }
 0xf71   : > { %3383 = vrot.lane.b32.xlu0 %v3350_v24, %s8125_s10 }
 0xf73   : > { %3385 = vrot.lane.b32.xlu1 %v3354_v26, %s8125_s10 }
 0xf75   : > { %3947 = vrot.lane.b32.xlu0 %v3294_v41, %s8127_s21 }
 0xf77   : > { %3949 = vrot.lane.b32.xlu1 %v3298_v48, %s8127_s21 }
 0xf79   : > { %3963 = vrot.lane.b32.xlu0 %v3326_v14, %s8127_s21 }
 0xf7b   : > { %3965 = vrot.lane.b32.xlu1 %v3330_v19, %s8127_s21 }
 0xf7d   : > { %3951 = vrot.lane.b32.xlu0 %v3302_v54, %s8127_s21 }
 0xf7f   : > { %3967 = vrot.lane.b32.xlu1 %v3334_v5, %s8127_s21 }
 0xf81   : > { %3953 = vrot.lane.b32.xlu0 %v3306_v44, %s8127_s21 }
 0xf83   : > { %3969 = vrot.lane.b32.xlu1 %v3338_v62, %s8127_s21 }
 0xf85   : > { %3955 = vrot.lane.b32.xlu0 %v3310_v57, %s8127_s21 }
 0xf87   : > { %3971 = vrot.lane.b32.xlu1 %v3342_v58, %s8127_s21 }
 0xf89   : > { %3957 = vrot.lane.b32.xlu0 %v3314_v61, %s8127_s21 }
 0xf8b   : > { %3973 = vrot.lane.b32.xlu1 %v3346_v7, %s8127_s21 }
 0xf8d   : > { %3959 = vrot.lane.b32.xlu0 %v3318_v11, %s8127_s21 }
 0xf8f   : > { %3975 = vrot.lane.b32.xlu1 %v3350_v24, %s8127_s21 }
 0xf91   : > { %3961 = vrot.lane.b32.xlu0 %v3322_v47, %s8127_s21 }
 0xf93   : > { %3977 = vrot.lane.b32.xlu1 %v3354_v26, %s8127_s21 }
 0xfc7   : > { %v3356_v27 = vpop.permute.xlu0 %3355 }
 0xfc8   : > { %v3403_v28 = vmul.f32 %v3356_v27, %v8942_v33 }
 0xfc9   : > { %v3358_v30 = vpop.permute.xlu1 %3357 }
 0xfca   : > { %v3404_v31 = vmul.f32 %v3358_v30, %v8942_v33  ;;  %7155 = vmatprep.mubr.msk.f32.mxu0 %vm489_vm0, %v3403_v28 }
 0xfcb   : > { %v3360_v34 = vpop.permute.xlu0 %3359 }
 0xfcc   : > { %v3405_v35 = vmul.f32 %v3360_v34, %v8942_v33  ;;  %7156 = vmatmul.mubr.msk.f32.vlgmr.msra.gmra.mrb[50].mxu0 %vm489_vm0, %v3404_v31 }
 0xfcd   : > { %v3362_v37 = vpop.permute.xlu1 %3361  ;;  %7521 = vmatpush3.bf16.msra.mxu0 %v8745_v29 }
 0xfce   : > { %v3406_v39 = vmul.f32 %v3362_v37, %v8942_v33  ;;  %7158 = vmatprep.mubr.msk.f32.mxu0 %vm489_vm0, %v3405_v35  ;;  %7523 = vmatprep.subr.bf16.mxu0 %v8749_v32 }
 0xfcf   : > { %v3364_v18 = vpop.permute.xlu0 %3363 }
 0xfd0   : > { %v3407_v41 = vmul.f32 %v3364_v18, %v8942_v33  ;;  %7159 = vmatmul.mubr.msk.f32.gmra.mrb[52].mxu0 %vm489_vm0, %v3406_v39 }
 0xfd1   : > { %v3366_v42 = vpop.permute.xlu1 %3365  ;;  %7525 = vmatpush3.bf16.msra.mxu0 %v8749_v32 }
 0xfd2   : > { %v3408_v16 = vmul.f32 %v3366_v42, %v8942_v33  ;;  %7161 = vmatprep.mubr.msk.f32.mxu0 %vm489_vm0, %v3407_v41  ;;  %7535 = vmatprep.subr.bf16.mxu0 %v8789_v23 }
 0xfd3   : > { %v3368_v48 = vpop.permute.xlu0 %3367 }
 0xfd4   : > { %v3409_v51 = vmul.f32 %v3368_v48, %v8942_v33  ;;  %7162 = vmatmul.mubr.msk.f32.gmra.mrb[54].mxu0 %vm489_vm0, %v3408_v16 }
 0xfd5   : > { %v3370_v53 = vpop.permute.xlu1 %3369 }
 0xfd6   : > { %v3410_v54 = vmul.f32 %v3370_v53, %v8942_v33  ;;  %7164 = vmatprep.mubr.msk.f32.mxu0 %vm489_vm0, %v3409_v51 }
 0xfd7   : > { %v3372_v55 = vpop.permute.xlu0 %3371 }
 0xfd8   : > { %v3411_v44 = vmul.f32 %v3372_v55, %v8952_v45  ;;  %7165 = vmatmul.mubr.msk.f32.gmra.mrb[56].mxu0 %vm489_vm0, %v3410_v54 }
 0xfd9   : > { %v3374_v56 = vpop.permute.xlu1 %3373 }
 0xfda   : > { %v3412_v40 = vmul.f32 %v3374_v56, %v8952_v45  ;;  %7167 = vmatprep.mubr.msk.f32.mxu0 %vm489_vm0, %v3411_v44 }
 0xfdb   : > { %v3376_v57 = vpop.permute.xlu0 %3375 }
 0xfdc   : > { %v3413_v59 = vmul.f32 %v3376_v57, %v8952_v45  ;;  %7168 = vmatmul.mubr.msk.f32.gmra.mrb[58].mxu0 %vm489_vm0, %v3412_v40 }
 0xfdd   : > { %v3378_v61 = vpop.permute.xlu1 %3377 }
 0xfde   : > { %v3414_v33 = vmul.f32 %v3378_v61, %v8952_v45  ;;  %7170 = vmatprep.mubr.msk.f32.mxu0 %vm489_vm0, %v3413_v59 }
 0xfdf   : > { %v3380_v63 = vpop.permute.xlu0 %3379 }
 0xfe0   : > { %v3415_v1 = vmul.f32 %v3380_v63, %v8952_v45  ;;  %7171 = vmatmul.mubr.msk.f32.gmra.mrb[60].mxu0 %vm489_vm0, %v3414_v33 }
 0xfe1   : > { %v3382_v4 = vpop.permute.xlu1 %3381 }
 0xfe2   : > { %v3416_v11 = vmul.f32 %v3382_v4, %v8952_v45  ;;  %7173 = vmatprep.mubr.msk.f32.mxu0 %vm489_vm0, %v3415_v1 }
 0xfe3   : > { %v3384_v0 = vpop.permute.xlu0 %3383 }
 0xfe4   : > { %v3417_v47 = vmul.f32 %v3384_v0, %v8952_v45  ;;  %7174 = vmatmul.mubr.msk.f32.gmra.mrb[62].mxu0 %vm489_vm0, %v3416_v11 }
 0xfe5   : > { %v3386_v12 = vpop.permute.xlu1 %3385 }
 0xfe6   : > { %v3418_v13 = vmul.f32 %v3386_v12, %v8952_v45  ;;  %7176 = vmatprep.mubr.msk.f32.mxu0 %vm489_vm0, %v3417_v47 }
 0xfe8   : > { %7177 = vmatmul.mubr.msk.f32.gmra.mrb[64].mxu0 %vm489_vm0, %v3418_v13 }
0x109f   : > { %v7157_v14 = vpop.f32.mrb[50].mxu0 }
0x10a0   : > { %v3533_v15 = vpop.f32.mrb[51].mxu0  ;;  %v3613_v19 = vmul.f32 0.5, %v7157_v14 }
0x10a1   : > { %v3612_v21 = vmul.f32 0.5, %v3533_v15 }
0x10a2   : > { %v3629_v60 = vsel %vm788_vm1, %v3613_v19, -inf }
0x10a3   : > { %v7160_v22 = vpop.f32.mrb[52].mxu0  ;;  %v3628_v43 = vsel %vm788_vm1, %v3612_v21, -inf }
0x10a4   : > { %v3615_v5 = vmul.f32 0.5, %v7160_v22  ;;  %v3543_v10 = vpop.f32.mrb[53].mxu0 }
0x10a5   : > { %v3614_v62 = vmul.f32 0.5, %v3543_v10 }
0x10a6   : > { %v3632_v58 = vsel %vm788_vm1, %v3615_v5, -inf }
0x10a7   : > { %v3633_v7 = vmax.f32 %v3629_v60, %v3632_v58  ;;  %v3630_v45 = vsel %vm788_vm1, %v3614_v62, -inf  ;;  %v7163_v20 = vpop.f32.mrb[54].mxu0 }
0x10a8   : > { %v3631_v24 = vmax.f32 %v3628_v43, %v3630_v45  ;;  %v3617_v26 = vmul.f32 0.5, %v7163_v20  ;;  %v3553_v27 = vpop.f32.mrb[55].mxu0 }
0x10a9   : > { %v3616_v28 = vmul.f32 0.5, %v3553_v27 }
0x10aa   : > { %v3636_v30 = vsel %vm788_vm1, %v3617_v26, -inf }
0x10ab   : > { %v3637_v31 = vmax.f32 %v3633_v7, %v3636_v30  ;;  %v3634_v34 = vsel %vm788_vm1, %v3616_v28, -inf  ;;  %v7166_v35 = vpop.f32.mrb[56].mxu0 }
0x10ac   : > { %v3635_v37 = vmax.f32 %v3631_v24, %v3634_v34  ;;  %v3619_v39 = vmul.f32 0.5, %v7166_v35  ;;  %v3563_v18 = vpop.f32.mrb[57].mxu0 }
0x10ad   : > { %v3618_v41 = vmul.f32 0.5, %v3563_v18 }
0x10ae   : > { %v3640_v42 = vsel %vm788_vm1, %v3619_v39, -inf }
0x10af   : > { %v3641_v16 = vmax.f32 %v3637_v31, %v3640_v42  ;;  %v3638_v48 = vsel %vm788_vm1, %v3618_v41, -inf  ;;  %v7169_v51 = vpop.f32.mrb[58].mxu0 }
0x10b0   : > { %v3639_v53 = vmax.f32 %v3635_v37, %v3638_v48  ;;  %v3573_v54 = vpop.f32.mrb[59].mxu0  ;;  %v9056_v44 = vmul.f32 0.5, %v7169_v51 }
0x10b1   : > { %v9058_v56 = vmul.f32 0.5, %v3573_v54 }
0x10b2   : > { %v3642_v55 = vmax.f32 %v3639_v53, %v3641_v16  ;;  %v3644_v15 = vsel %vm788_vm1, %v9056_v44, -inf }
0x10b3   : > { %v7172_v40 = vpop.f32.mrb[60].mxu0  ;;  %v3643_v22 = vsel %vm788_vm1, %v9058_v56, -inf }
0x10b4   : > { %v3658_v57 = vsub.f32 %v3612_v21, %v3642_v55  ;;  %v3659_v59 = vsub.f32 %v3613_v19, %v3642_v55  ;;  %v3660_v61 = vsub.f32 %v3614_v62, %v3642_v55  ;;  %v3661_v33 = vsub.f32 %v3615_v5, %v3642_v55  ;;  %v3583_v63 = vpop.f32.mrb[61].mxu0 }
0x10b5   : > { %v3662_v1 = vsub.f32 %v3616_v28, %v3642_v55  ;;  %v3663_v4 = vsub.f32 %v3617_v26, %v3642_v55  ;;  %v3664_v11 = vsub.f32 %v3618_v41, %v3642_v55  ;;  %v3665_v0 = vsub.f32 %v3619_v39, %v3642_v55 }
0x10b6   : > { %v3674_v47 = vmul.f32 1.442695, %v3658_v57  ;;  %v3676_v12 = vmul.f32 1.442695, %v3659_v59  ;;  %v3678_v13 = vmul.f32 1.442695, %v3660_v61 }
0x10b7   : > { %v3680_v14 = vmul.f32 1.442695, %v3661_v33  ;;  %v3623_v21 = vmul.f32 0.5, %v7172_v40  ;;  %v7175_v19 = vpop.f32.mrb[62].mxu0  ;;  %v3682_v5 = vmul.f32 1.442695, %v3662_v1 }
0x10b8   : > { %7799 = vpow2.f32 %v3674_v47  ;;  %v3622_v10 = vmul.f32 0.5, %v3583_v63  ;;  %v3625_v62 = vmul.f32 0.5, %v7175_v19  ;;  %v3593_v60 = vpop.f32.mrb[63].mxu0  ;;  %v3684_v58 = vmul.f32 1.442695, %v3663_v4 }
0x10b9   : > { %7801 = vpow2.f32 %v3676_v12  ;;  %v3647_v43 = vsel %vm788_vm1, %v3623_v21, -inf  ;;  %v3624_v7 = vmul.f32 0.5, %v3593_v60  ;;  %v3686_v34 = vmul.f32 1.442695, %v3664_v11 }
0x10ba   : > { %7803 = vpow2.f32 %v3678_v13  ;;  %v3648_v45 = vmax.f32 %v3644_v15, %v3647_v43  ;;  %v3645_v20 = vsel %vm788_vm1, %v3622_v10, -inf  ;;  %v3651_v24 = vsel %vm788_vm1, %v3625_v62, -inf }
0x10bb   : > { %7805 = vpow2.f32 %v3680_v14  ;;  %v7178_v26 = vpop.f32.mrb[64].mxu0  ;;  %v3646_v27 = vmax.f32 %v3643_v22, %v3645_v20  ;;  %v3649_v28 = vsel %vm788_vm1, %v3624_v7, -inf  ;;  %v3688_v41 = vmul.f32 1.442695, %v3665_v0 }
0x10bc   : > { %v3627_v30 = vmul.f32 0.5, %v7178_v26  ;;  %v3603_v31 = vpop.f32.mrb[65].mxu0  ;;  %7807 = vpow2.f32 %v3682_v5  ;;  %v3652_v35 = vmax.f32 %v3648_v45, %v3651_v24 }
0x10bd   : > { %v3626_v37 = vmul.f32 0.5, %v3603_v31  ;;  %v3650_v39 = vmax.f32 %v3646_v27, %v3649_v28  ;;  %7809 = vpow2.f32 %v3684_v58 }
0x10be   : > { %v3655_v18 = vsel %vm788_vm1, %v3627_v30, -inf  ;;  %7811 = vpow2.f32 %v3686_v34 }
0x10bf   : > { %v3656_v42 = vmax.f32 %v3652_v35, %v3655_v18  ;;  %v3653_v16 = vsel %vm788_vm1, %v3626_v37, -inf  ;;  %7813 = vpow2.f32 %v3688_v41 }
0x10c0   : > { %v3654_v48 = vmax.f32 %v3650_v39, %v3653_v16 }
0x10c2   : > { %v9070_v51 = vpop.eup %7799  ;;  %v3657_v53 = vmax.f32 %v3654_v48, %v3656_v42 }
0x10c3   : > { %v9072_v54 = vpop.eup %7801  ;;  %v3706_v55 = vsel %vm788_vm1, %v9070_v51, 0.0 }
0x10c4   : > { %v9076_v40 = vpop.eup %7803  ;;  %v3707_v57 = vsel %vm788_vm1, %v9072_v54, 0.0  ;;  %v3666_v59 = vsub.f32 %v9058_v56, %v3657_v53  ;;  %v3667_v61 = vsub.f32 %v9056_v44, %v3657_v53  ;;  %v3668_v33 = vsub.f32 %v3622_v10, %v3657_v53 }
0x10c5   : > { %v9082_v63 = vpop.eup %7805  ;;  %v3708_v1 = vadd.f32 %v3707_v57, %v3706_v55  ;;  %v3669_v4 = vsub.f32 %v3623_v21, %v3657_v53  ;;  %v3670_v11 = vsub.f32 %v3624_v7, %v3657_v53  ;;  %v3709_v0 = vsel %vm788_vm1, %v9076_v40, 0.0 }
0x10c6   : > { %v3671_v47 = vsub.f32 %v3625_v62, %v3657_v53  ;;  %v3672_v12 = vsub.f32 %v3626_v37, %v3657_v53  ;;  %v3673_v13 = vsub.f32 %v3627_v30, %v3657_v53  ;;  %v7808_v14 = vpop.eup %7807  ;;  %v3690_v22 = vmul.f32 1.442695, %v3666_v59 }
0x10c7   : > { %v3710_v15 = vadd.f32 %v3709_v0, %v3708_v1  ;;  %v3692_v19 = vmul.f32 1.442695, %v3667_v61  ;;  %v3711_v56 = vsel %vm788_vm1, %v9082_v63, 0.0  ;;  %v3694_v44 = vmul.f32 1.442695, %v3668_v33  ;;  %v7810_v10 = vpop.eup %7809 }
0x10c8   : > { %v3696_v5 = vmul.f32 1.442695, %v3669_v4  ;;  %7815 = vpow2.f32 %v3690_v22  ;;  %v3713_v21 = vsel %vm788_vm1, %v7808_v14, 0.0  ;;  %v3698_v58 = vmul.f32 1.442695, %v3670_v11  ;;  %v7812_v43 = vpop.eup %7811 }
0x10c9   : > { %v3712_v60 = vadd.f32 %v3711_v56, %v3710_v15  ;;  %7817 = vpow2.f32 %v3692_v19  ;;  %v3700_v7 = vmul.f32 1.442695, %v3671_v47  ;;  %v3715_v45 = vsel %vm788_vm1, %v7810_v10, 0.0  ;;  %v7814_v24 = vpop.eup %7813 }
0x10ca   : > { %7819 = vpow2.f32 %v3694_v44  ;;  %v3702_v20 = vmul.f32 1.442695, %v3672_v12  ;;  %v3717_v27 = vsel %vm788_vm1, %v7812_v43, 0.0  ;;  %v3719_v30 = vsel %vm788_vm1, %v7814_v24, 0.0 }
0x10cb   : > { %v3714_v62 = vadd.f32 %v3713_v21, %v3712_v60  ;;  %7821 = vpow2.f32 %v3696_v5  ;;  %v3704_v31 = vmul.f32 1.442695, %v3673_v13 }
0x10cc   : > { %7823 = vpow2.f32 %v3698_v58 }
0x10cd   : > { %v3716_v26 = vadd.f32 %v3715_v45, %v3714_v62  ;;  %7825 = vpow2.f32 %v3700_v7 }
0x10ce   : > { %7827 = vpow2.f32 %v3702_v20 }
0x10cf   : > { %v3718_v28 = vadd.f32 %v3717_v27, %v3716_v26 }
0x10d1   : > { %v3720_v34 = vadd.f32 %v3719_v30, %v3718_v28  ;;  %v3950_v28 = vpop.permute.xlu1 %3949 }
0x10d2   : > { %v7816_v35 = vpop.eup %7815 }
0x10d3   : > { %7829 = vrcp.f32 %v3720_v34  ;;  %v7818_v37 = vpop.eup %7817  ;;  %v3721_v39 = vsel %vm788_vm1, %v7816_v35, 0.0 }
0x10d4   : > { %7831 = vpow2.f32 %v3704_v31  ;;  %v7820_v18 = vpop.eup %7819  ;;  %v3722_v41 = vsel %vm788_vm1, %v7818_v37, 0.0 }
0x10d5   : > { %v7822_v42 = vpop.eup %7821  ;;  %v3723_v16 = vadd.f32 %v3722_v41, %v3721_v39  ;;  %v3724_v48 = vsel %vm788_vm1, %v7820_v18, 0.0  ;;  %v3966_v31 = vpop.permute.xlu1 %3965 }
0x10d6   : > { %v7824_v53 = vpop.eup %7823  ;;  %v3726_v59 = vsel %vm788_vm1, %v7822_v42, 0.0 }
0x10d7   : > { %v3725_v55 = vadd.f32 %v3724_v48, %v3723_v16  ;;  %v7826_v57 = vpop.eup %7825  ;;  %v3728_v1 = vsel %vm788_vm1, %v7824_v53, 0.0 }
0x10d8   : > { %v7828_v61 = vpop.eup %7827  ;;  %v3730_v0 = vsel %vm788_vm1, %v7826_v57, 0.0 }
0x10d9   : > { %v3727_v33 = vadd.f32 %v3726_v59, %v3725_v55  ;;  %v3732_v47 = vsel %vm788_vm1, %v7828_v61, 0.0 }
0x10db   : > { %v3729_v4 = vadd.f32 %v3728_v1, %v3727_v33 }
0x10dd   : > { %v7830_v11 = vpop.eup %7829  ;;  %v3731_v13 = vadd.f32 %v3730_v0, %v3729_v4 }
0x10de   : > { %v7832_v12 = vpop.eup %7831  ;;  %v3738_v15 = vmul.f32 %v7830_v11, %v9070_v51  ;;  %v3739_v22 = vmul.f32 %v7830_v11, %v9072_v54  ;;  %v3740_v19 = vmul.f32 %v7830_v11, %v9076_v40  ;;  %v3741_v56 = vmul.f32 %v7830_v11, %v9082_v63 }
0x10df   : > { %v3742_v44 = vmul.f32 %v7830_v11, %v7808_v14  ;;  %v3743_v5 = vmul.f32 %v7830_v11, %v7810_v10  ;;  %v3744_v60 = vmul.f32 %v7830_v11, %v7812_v43  ;;  %v3733_v21 = vadd.f32 %v3732_v47, %v3731_v13 }
0x10e0   : > { %7181 = vmatprep.mubr.msk.f32.mxu1 %vm788_vm1, %v3738_v15  ;;  %v3745_v58 = vmul.f32 %v7830_v11, %v7814_v24  ;;  %v3734_v62 = vsel %vm788_vm1, %v7832_v12, 0.0  ;;  %v3948_v24 = vpop.permute.xlu0 %3947 }
0x10e1   : > { %7182 = vmatmul.mubr.msk.f32.vlgmr.msra.gmra.mrb[56].mxu1 %vm788_vm1, %v3739_v22  ;;  %v3735_v7 = vadd.f32 %v3734_v62, %v3733_v21 }
0x10e2   : > { %7184 = vmatprep.mubr.msk.f32.mxu1 %vm788_vm1, %v3740_v19  ;;  %7529 = vmatpush3.bf16.msra.mxu1 %v8753_v36 }
0x10e3   : > { %7531 = vmatprep.subr.bf16.mxu1 %v8755_v38  ;;  %7833 = vrcp.f32 %v3735_v7 }
0x10e4   : > { %v3964_v26 = vpop.permute.xlu0 %3963 }
0x10e5   : > { %7185 = vmatmul.mubr.msk.f32.gmra.mrb[58].mxu1 %vm788_vm1, %v3741_v56 }
0x10e6   : > { %7187 = vmatprep.mubr.msk.f32.mxu1 %vm788_vm1, %v3742_v44  ;;  %7533 = vmatpush3.bf16.msra.mxu1 %v8755_v38 }
0x10e7   : > { %7543 = vmatprep.subr.bf16.mxu1 %v8409_v3 }
0x10e8   : > { %v3952_v27 = vpop.permute.xlu0 %3951 }
0x10e9   : > { %7188 = vmatmul.mubr.msk.f32.gmra.mrb[60].mxu1 %vm788_vm1, %v3743_v5 }
0x10ea   : > { %7190 = vmatprep.mubr.msk.f32.mxu1 %vm788_vm1, %v3744_v60 }
0x10ec   : > { %v3954_v30 = vpop.permute.xlu0 %3953 }
0x10ed   : > { %7191 = vmatmul.mubr.msk.f32.gmra.mrb[62].mxu1 %vm788_vm1, %v3745_v58  ;;  %v7834_v51 = vpop.eup %7833 }
0x10ee   : > { %v3746_v54 = vmul.f32 %v7834_v51, %v7816_v35  ;;  %v3747_v40 = vmul.f32 %v7834_v51, %v7818_v37  ;;  %v3748_v63 = vmul.f32 %v7834_v51, %v7820_v18  ;;  %v3749_v14 = vmul.f32 %v7834_v51, %v7822_v42  ;;  %v3968_v35 = vpop.permute.xlu1 %3967 }
0x10ef   : > { %v3750_v10 = vmul.f32 %v7834_v51, %v7824_v53  ;;  %v3751_v43 = vmul.f32 %v7834_v51, %v7826_v57  ;;  %v3752_v45 = vmul.f32 %v7834_v51, %v7828_v61  ;;  %v3753_v20 = vmul.f32 %v7834_v51, %v7832_v12 }
0x10f0   : > { %7193 = vmatprep.mubr.msk.f32.mxu1 %vm788_vm1, %v3746_v54  ;;  %v3956_v34 = vpop.permute.xlu0 %3955 }
0x10f1   : > { %7194 = vmatmul.mubr.msk.f32.gmra.mrb[64].mxu1 %vm788_vm1, %v3747_v40 }
0x10f2   : > { %7196 = vmatprep.mubr.msk.f32.mxu1 %vm788_vm1, %v3748_v63  ;;  %v3970_v59 = vpop.permute.xlu1 %3969 }
0x10f4   : > { %v3958_v39 = vpop.permute.xlu0 %3957 }
0x10f5   : > { %7197 = vmatmul.mubr.msk.f32.gmra.mrb[66].mxu1 %vm788_vm1, %v3749_v14 }
0x10f6   : > { %7199 = vmatprep.mubr.msk.f32.mxu1 %vm788_vm1, %v3750_v10  ;;  %v3972_v19 = vpop.permute.xlu1 %3971 }
0x10f8   : > { %v3960_v1 = vpop.permute.xlu0 %3959 }
0x10f9   : > { %7200 = vmatmul.mubr.msk.f32.gmra.mrb[68].mxu1 %vm788_vm1, %v3751_v43 }
0x10fa   : > { %7202 = vmatprep.mubr.msk.f32.mxu1 %vm788_vm1, %v3752_v45  ;;  %v3974_v14 = vpop.permute.xlu1 %3973 }
0x10fc   : > { %v3962_v5 = vpop.permute.xlu0 %3961 }
0x10fd   : > { %7203 = vmatmul.mubr.msk.f32.gmra.mrb[70].mxu1 %vm788_vm1, %v3753_v20 }
0x11b4   : > { %v7183_v37 = vpop.f32.mrb[56].mxu1 }
0x11b5   : > { %v3996_v18 = vmul.f32 %v7183_v37, %v3950_v28  ;;  %v3868_v41 = vpop.f32.mrb[57].mxu1 }
0x11b6   : > { %v3995_v42 = vmul.f32 %v3948_v24, %v3868_v41  ;;  %v3976_v41 = vpop.permute.xlu1 %3975 }
0x11b7   : > { %v4012_v16 = vsel %vm489_vm0, %v3996_v18, 0.0 }
0x11b8   : > { %v4011_v48 = vsel %vm489_vm0, %v3995_v42, 0.0  ;;  %v7186_v53 = vpop.f32.mrb[58].mxu1 }
0x11b9   : > { %v4013_v55 = vadd.f32 %v4012_v16, %v4011_v48  ;;  %v3878_v57 = vpop.f32.mrb[59].mxu1  ;;  %v3998_v61 = vmul.f32 %v7186_v53, %v3954_v30 }
0x11ba   : > { %v3997_v33 = vmul.f32 %v3952_v27, %v3878_v57 }
0x11bb   : > { %v4016_v12 = vsel %vm489_vm0, %v3998_v61, 0.0 }
0x11bc   : > { %v4014_v4 = vsel %vm489_vm0, %v3997_v33, 0.0  ;;  %v7189_v11 = vpop.f32.mrb[60].mxu1 }
0x11bd   : > { %v4015_v0 = vadd.f32 %v4014_v4, %v4013_v55  ;;  %v3888_v47 = vpop.f32.mrb[61].mxu1  ;;  %v4000_v13 = vmul.f32 %v7189_v11, %v3958_v39 }
0x11be   : > { %v3999_v15 = vmul.f32 %v3956_v34, %v3888_v47 }
0x11bf   : > { %v4017_v22 = vadd.f32 %v4016_v12, %v4015_v0  ;;  %v4020_v58 = vsel %vm489_vm0, %v4000_v13, 0.0 }
0x11c0   : > { %v4018_v56 = vsel %vm489_vm0, %v3999_v15, 0.0  ;;  %v7192_v44 = vpop.f32.mrb[62].mxu1 }
0x11c1   : > { %v4019_v60 = vadd.f32 %v4018_v56, %v4017_v22  ;;  %v3898_v21 = vpop.f32.mrb[63].mxu1  ;;  %v4002_v62 = vmul.f32 %v7192_v44, %v3962_v5  ;;  %v7919_v56 = vld [vmem:[%s9558_s3 + $0x1] ss:$0 sm:$0xff] }
0x11c2   : > { %v4001_v7 = vmul.f32 %v3960_v1, %v3898_v21  ;;  %v3978_v1 = vpop.permute.xlu1 %3977 }
0x11c3   : > { %v4021_v51 = vadd.f32 %v4020_v58, %v4019_v60  ;;  %v4024_v10 = vsel %vm489_vm0, %v4002_v62, 0.0  ;;  %v9157_v62 = vld [vmem:[%s9564_s9] sm:$0xff] }
0x11c4   : > { %v4022_v54 = vsel %vm489_vm0, %v4001_v7, 0.0  ;;  %v7195_v63 = vpop.f32.mrb[64].mxu1 }
0x11c5   : > { %v4023_v40 = vadd.f32 %v4022_v54, %v4021_v51  ;;  %v4004_v43 = vmul.f32 %v7195_v63, %v3966_v31  ;;  %v3908_v45 = vpop.f32.mrb[65].mxu1  ;;  %v7921_v51 = vld [vmem:[%s9560_s5 + $0x1] ss:$0 sm:$0xff] }
0x11c6   : > { %v4003_v24 = vmul.f32 %v3964_v26, %v3908_v45  ;;  %v7922_v45 = vld [vmem:[%s9558_s3 + $0x2] ss:$0 sm:$0xff] }
0x11c7   : > { %v4025_v20 = vadd.f32 %v4024_v10, %v4023_v40  ;;  %v4027_v27 = vsel %vm489_vm0, %v4004_v43, 0.0 }
0x11c8   : > { %v4026_v28 = vsel %vm489_vm0, %v4003_v24, 0.0  ;;  %v7198_v30 = vpop.f32.mrb[66].mxu1 }
0x11c9   : > { %7213 = vmatprep.mubr.msk.f32.mxu0 %vm489_vm0, %v4025_v20  ;;  %v4028_v34 = vadd.f32 %v4027_v27, %v4026_v28  ;;  %v3918_v37 = vpop.f32.mrb[67].mxu1  ;;  %v4006_v39 = vmul.f32 %v7198_v30, %v3970_v59 }
0x11ca   : > { %v4005_v18 = vmul.f32 %v3968_v35, %v3918_v37 }
0x11cb   : > { %v4031_v53 = vsel %vm489_vm0, %v4006_v39, 0.0 }
0x11cc   : > { %v4029_v42 = vsel %vm489_vm0, %v4005_v18, 0.0  ;;  %v7201_v16 = vpop.f32.mrb[68].mxu1 }
0x11cd   : > { %v4030_v48 = vadd.f32 %v4029_v42, %v4028_v34  ;;  %v3928_v31 = vpop.f32.mrb[69].mxu1  ;;  %v4008_v26 = vmul.f32 %v7201_v16, %v3974_v14 }
0x11ce   : > { %v4007_v55 = vmul.f32 %v3972_v19, %v3928_v31 }
0x11cf   : > { %v4032_v57 = vadd.f32 %v4031_v53, %v4030_v48  ;;  %v4035_v59 = vsel %vm489_vm0, %v4008_v26, 0.0  ;;  %v438_v53 = vld [vmem:[#allocation5 + $0x20] sm:$0xff]  ;;  %v439_v26 = vld [vmem:[#allocation5 + $0x28] sm:$0xff] }
0x11d0   : > { %v4033_v61 = vsel %vm489_vm0, %v4007_v55, 0.0  ;;  %v7204_v33 = vpop.f32.mrb[70].mxu1 }
0x11d1   : > { %v4034_v4 = vadd.f32 %v4033_v61, %v4032_v57  ;;  %v3938_v11 = vpop.f32.mrb[71].mxu1  ;;  %v4010_v35 = vmul.f32 %v7204_v33, %v3978_v1  ;;  %v430_v1 = vld [vmem:[%s8395_s12 + $0x40] sm:$0xff] }
0x11d2   : > { %v4009_v0 = vmul.f32 %v3976_v41, %v3938_v11  ;;  %v432_v11 = vld [vmem:[%s8395_s12 + $0x50] sm:$0xff] }
0x11d3   : > { %v4036_v47 = vadd.f32 %v4035_v59, %v4034_v4  ;;  %v4039_v15 = vsel %vm489_vm0, %v4010_v35, 0.0  ;;  %v431_v4 = vld [vmem:[%s8395_s12 + $0x48] sm:$0xff]  ;;  %v433_v59 = vld [vmem:[%s8395_s12 + $0x58] sm:$0xff] }
0x11d4   : > { %v4037_v12 = vsel %vm489_vm0, %v4009_v0, 0.0  ;;  %v7923_v0 = vld [vmem:[%s9560_s5] ss:$0 sm:$0xff] }
0x11d5   : > { %v4038_v13 = vadd.f32 %v4037_v12, %v4036_v47 }
0x11d7   : > { %v4040_v22 = vadd.f32 %v4039_v15, %v4038_v13 }
0x11d9   : > { %7214 = vmatmul.mubr.msk.f32.vlgmr.msra.gmra.mrb[66].mxu0 %vm489_vm0, %v4040_v22 }
0x11da   : > { %7537 = vmatpush3.bf16.msra.mxu0 %v8789_v23 }
0x11db   : > { %7539 = vmatprep.subr.bf16.mxu0 %v8791_v25 }
0x11de   : > { %7541 = vmatpush3.bf16.msra.mxu0 %v8791_v25 }
0x11df   : > { %7551 = vmatprep.subr.bf16.mxu0 %v8422_v9 }
0x12ac   : > { %v7215_v19 = vpop.f32.mrb[66].mxu0 }
0x12ad   : > { %v4119_v44 = vadd.f32 %v7919_v56, %v7215_v19  ;;  %v4113_v5 = vpop.f32.mrb[67].mxu0 }
0x12ae   : > { %v4114_v60 = vadd.f32 %v7919_v56, %v4113_v5 }
0x12af   : > { %v4123_v58 = vmax.f32 %v4119_v44, 0.0 }
0x12b0   : > { %v4122_v21 = vmax.f32 %v4114_v60, 0.0 }
0x12b2   : > { %7224 = vmatprep.mubr.msk.f32.mxu1 %vm489_vm0, %v4122_v21 }
0x12b3   : > { %7225 = vmatmul.mubr.msk.f32.vlgmr.msra.gmra.mrb[72].mxu1 %vm489_vm0, %v4123_v58 }
0x12b4   : > { %7545 = vmatpush3.bf16.msra.mxu1 %v8409_v3 }
0x12b5   : > { %7547 = vmatprep.subr.bf16.mxu1 %v8411_v6 }
0x12b8   : > { %7549 = vmatpush3.bf16.msra.mxu1 %v8411_v6 }
0x12b9   : > { %7281 = vmatprep.subr.mxu1 %v9157_v62 }
0x1386   : > { %v7226_v7 = vpop.f32.mrb[72].mxu1 }
0x1387   : > { %v4202_v54 = vadd.f32 %v7921_v51, %v7226_v7  ;;  %v4196_v40 = vpop.f32.mrb[73].mxu1 }
0x1388   : > { %v4197_v63 = vadd.f32 %v7921_v51, %v4196_v40 }
0x1389   : > { %v4206_v3 = vmax.f32 %v4202_v54, 0.0 }
0x138a   : > { %v4205_v14 = vmax.f32 %v4197_v63, 0.0 }
0x138b   : > { %4211 = vrot.lane.b32.xlu1 %v4206_v3, %s8125_s10 }
0x138c   : > { %4209 = vrot.lane.b32.xlu0 %v4205_v14, %s8125_s10 }
0x13fd   : > { %v4212_v10 = vpop.permute.xlu1 %4211 }
0x13fe   : > { %v4210_v6 = vpop.permute.xlu0 %4209 }
0x13ff   : > { %7235 = vmatprep.mubr.msk.f32.mxu0 %vm489_vm0, %v4210_v6 }
0x1400   : > { %7236 = vmatmul.mubr.msk.f32.vlgmr.msra.gmra.mrb[68].mxu0 %vm489_vm0, %v4212_v10 }
0x1401   : > { %7553 = vmatpush3.bf16.msra.mxu0 %v8422_v9 }
0x1402   : > { %7555 = vmatprep.subr.bf16.mxu0 %v8443_v17 }
0x1405   : > { %7557 = vmatpush3.bf16.msra.mxu0 %v8443_v17 }
0x1406   : > { %7559 = vmatprep.subr.bf16.mxu0 %v8515_v46 }
0x14d3   : > { %v7237_v43 = vpop.f32.mrb[68].mxu0 }
0x14d4   : > { %v4289_v20 = vadd.f32 %v7922_v45, %v7237_v43  ;;  %v4283_v24 = vpop.f32.mrb[69].mxu0 }
0x14d5   : > { %v4284_v27 = vadd.f32 %v7922_v45, %v4283_v24 }
0x14d6   : > { %v6490_v28 = vmul.f32 -1.442695, %v4289_v20 }
0x14d7   : > { %v6489_v30 = vmul.f32 -1.442695, %v4284_v27 }
0x14d8   : > { %7835 = vpow2.f32 %v6490_v28 }
0x14d9   : > { %7837 = vpow2.f32 %v6489_v30 }
0x14e2   : > { %v7836_v34 = vpop.eup %7835 }
0x14e3   : > { %v7838_v37 = vpop.eup %7837  ;;  %v4299_v39 = vadd.f32 1.0, %v7836_v34 }
0x14e4   : > { %v4298_v18 = vadd.f32 1.0, %v7838_v37 }
0x14e5   : > { %7839 = vrcp.f32 %v4299_v39 }
0x14e6   : > { %7841 = vrcp.f32 %v4298_v18 }
0x14ef   : > { %v7840_v41 = vpop.eup %7839 }
0x14f0   : > { %v7842_v42 = vpop.eup %7841  ;;  %v4305_v16 = vmul.f32 %v7840_v41, %v4202_v54 }
0x14f1   : > { %v4304_v48 = vmul.f32 %v7842_v42, %v4197_v63 }
0x14f2   : > { %v4307_v31 = vsel %vm489_vm0, %v4305_v16, 0.0 }
0x14f3   : > { %v4306_v55 = vsel %vm489_vm0, %v4304_v48, 0.0 }
0x14f4   : > { %v4308_v57 = vadd.f32 %v4307_v31, %v4306_v55 }
0x14f6   : > { %v4309_v61 = vadd.f32 %v4308_v57, %v438_v53  ;;  %v4310_v33 = vadd.f32 %v4308_v57, %v439_v26  ;;  %6205 = vst.msk [vmem:[%s8817_s11 + $0x8] sm:$0xff] %vm489_vm0, %v4308_v57 }
0x14f8   : > { %7246 = vmatprep.mubr.msk.f32.mxu1 %vm489_vm0, %v4309_v61 }
0x14f9   : > { %7247 = vmatmul.mubr.msk.f32.vlgmr.msra.gmra.mrb[74].mxu1 %vm489_vm0, %v4310_v33 }
0x14fa   : > { %7249 = vmatprep.mubr.msk.f32.mxu1 %vm489_vm0, %v430_v1  ;;  %7282 = vmatpush3.msra.mxu1 %v9157_v62 }
0x14fb   : > { %7567 = vmatprep.subr.bf16.mxu1 %v8529_v52 }
0x14fd   : > { %7250 = vmatmul.mubr.msk.f32.gmra.mrb[76].mxu1 %vm489_vm0, %v431_v4 }
0x14fe   : > { %7252 = vmatprep.mubr.msk.f32.mxu1 %vm489_vm0, %v432_v11 }
0x1501   : > { %7253 = vmatmul.mubr.msk.f32.gmra.mrb[78].mxu1 %vm489_vm0, %v433_v59 }
0x15cc   : > { %v7248_v35 = vpop.f32.mrb[74].mxu1 }
0x15cd   : > { %v4401_v47 = vadd.f32 %v7923_v0, %v7248_v35  ;;  %v4395_v12 = vpop.f32.mrb[75].mxu1 }
0x15ce   : > { %v4396_v13 = vadd.f32 %v7923_v0, %v4395_v12 }
0x15cf   : > { %4872 = vrot.lane.b32.xlu1 %v4401_v47, %s8125_s10  ;;  %v4425_v19 = vmul.f32 %v4401_v47, %v4309_v61  ;;  %v4431_v3 = vmul.f32 %v4401_v47, %v4310_v33 }
0x15d0   : > { %v4424_v15 = vmul.f32 %v4396_v13, %v4309_v61  ;;  %v7251_v22 = vpop.f32.mrb[76].mxu1  ;;  %4870 = vrot.lane.b32.xlu0 %v4396_v13, %s8125_s10 }
0x15d1   : > { %v4411_v56 = vadd.f32 %v7923_v0, %v7251_v22  ;;  %v4405_v44 = vpop.f32.mrb[77].mxu1 }
0x15d2   : > { %v4406_v5 = vadd.f32 %v7923_v0, %v4405_v44  ;;  %7263 = vmatprep.mubr.msk.f32.mxu0 %vm489_vm0, %v4424_v15 }
0x15d3   : > { %4876 = vrot.lane.b32.xlu1 %v4411_v56, %s8125_s10  ;;  %7264 = vmatmul.mubr.msk.f32.vlgmr.msra.gmra.mrb[70].mxu0 %vm489_vm0, %v4425_v19  ;;  %v4427_v58 = vmul.f32 %v4411_v56, %v4309_v61  ;;  %v4433_v6 = vmul.f32 %v4411_v56, %v4310_v33 }
0x15d4   : > { %v4426_v60 = vmul.f32 %v4406_v5, %v4309_v61  ;;  %v7254_v21 = vpop.f32.mrb[78].mxu1  ;;  %4874 = vrot.lane.b32.xlu0 %v4406_v5, %s8125_s10  ;;  %7561 = vmatpush3.bf16.msra.mxu0 %v8515_v46  ;;  %v4430_v46 = vmul.f32 %v4396_v13, %v4310_v33  ;;  %v4432_v14 = vmul.f32 %v4406_v5, %v4310_v33 }
0x15d5   : > { %v4421_v7 = vadd.f32 %v7923_v0, %v7254_v21  ;;  %v4415_v51 = vpop.f32.mrb[79].mxu1  ;;  %7563 = vmatprep.subr.bf16.mxu0 %v8519_v49 }
0x15d6   : > { %v4416_v54 = vadd.f32 %v7923_v0, %v4415_v51  ;;  %7266 = vmatprep.mubr.msk.f32.mxu0 %vm489_vm0, %v4426_v60 }
0x15d7   : > { %4880 = vrot.lane.b32.xlu1 %v4421_v7, %s8125_s10  ;;  %7267 = vmatmul.mubr.msk.f32.gmra.mrb[72].mxu0 %vm489_vm0, %v4427_v58  ;;  %v4429_v63 = vmul.f32 %v4421_v7, %v4309_v61 }
0x15d8   : > { %v4428_v40 = vmul.f32 %v4416_v54, %v4309_v61  ;;  %4878 = vrot.lane.b32.xlu0 %v4416_v54, %s8125_s10  ;;  %7565 = vmatpush3.bf16.msra.mxu0 %v8519_v49  ;;  %v4434_v10 = vmul.f32 %v4416_v54, %v4310_v33  ;;  %v4435_v49 = vmul.f32 %v4421_v7, %v4310_v33 }
0x15d9   : > { %7575 = vmatprep.subr.bf16.mxu0 %v8422_v9 }
0x15da   : > { %7269 = vmatprep.mubr.msk.f32.mxu0 %vm489_vm0, %v4428_v40 }
0x15db   : > { %7270 = vmatmul.mubr.msk.f32.gmra.mrb[74].mxu0 %vm489_vm0, %v4429_v63 }
0x15dc   : > { %7272 = vmatprep.mubr.msk.f32.mxu0 %vm489_vm0, %v4430_v46 }
0x15df   : > { %7273 = vmatmul.mubr.msk.f32.gmra.mrb[76].mxu0 %vm489_vm0, %v4431_v3 }
0x15e0   : > { %7275 = vmatprep.mubr.msk.f32.mxu0 %vm489_vm0, %v4432_v14 }
0x15e3   : > { %7276 = vmatmul.mubr.msk.f32.gmra.mrb[78].mxu0 %vm489_vm0, %v4433_v6 }
0x15e4   : > { %7278 = vmatprep.mubr.msk.f32.mxu0 %vm489_vm0, %v4434_v10 }
0x15e7   : > { %7279 = vmatmul.mubr.msk.f32.gmra.mrb[80].mxu0 %vm489_vm0, %v4435_v49 }
0x16a6   : > { %v7265_v43 = vpop.f32.mrb[70].mxu0 }
0x16a7   : > { %v4538_v45 = vpop.f32.mrb[71].mxu0  ;;  %v4598_v20 = vmul.f32 0.5, %v7265_v43 }
0x16a8   : > { %v4597_v24 = vmul.f32 0.5, %v4538_v45 }
0x16a9   : > { %v4610_v37 = vsel %vm788_vm1, %v4598_v20, -inf }
0x16aa   : > { %v7268_v27 = vpop.f32.mrb[72].mxu0  ;;  %v4609_v18 = vsel %vm788_vm1, %v4597_v24, -inf }
0x16ab   : > { %v4600_v28 = vmul.f32 0.5, %v7268_v27  ;;  %v4548_v30 = vpop.f32.mrb[73].mxu0 }
0x16ac   : > { %v4599_v34 = vmul.f32 0.5, %v4548_v30 }
0x16ad   : > { %v4613_v39 = vsel %vm788_vm1, %v4600_v28, -inf }
0x16ae   : > { %v4614_v41 = vmax.f32 %v4610_v37, %v4613_v39  ;;  %v4611_v42 = vsel %vm788_vm1, %v4599_v34, -inf  ;;  %v7271_v16 = vpop.f32.mrb[74].mxu0 }
0x16af   : > { %v4612_v48 = vmax.f32 %v4609_v18, %v4611_v42  ;;  %v4602_v31 = vmul.f32 0.5, %v7271_v16  ;;  %v4558_v53 = vpop.f32.mrb[75].mxu0 }
0x16b0   : > { %v4601_v26 = vmul.f32 0.5, %v4558_v53 }
0x16b1   : > { %v4617_v55 = vsel %vm788_vm1, %v4602_v31, -inf }
0x16b2   : > { %v4618_v57 = vmax.f32 %v4614_v41, %v4617_v55  ;;  %v4615_v61 = vsel %vm788_vm1, %v4601_v26, -inf  ;;  %v7274_v33 = vpop.f32.mrb[76].mxu0 }
0x16b3   : > { %v4616_v1 = vmax.f32 %v4612_v48, %v4615_v61  ;;  %v4568_v4 = vpop.f32.mrb[77].mxu0  ;;  %v4604_v59 = vmul.f32 0.5, %v7274_v33 }
0x16b4   : > { %v4603_v35 = vmul.f32 0.5, %v4568_v4 }
0x16b5   : > { %v4619_v11 = vmax.f32 %v4616_v1, %v4618_v57  ;;  %v4621_v51 = vsel %vm788_vm1, %v4604_v59, -inf }
0x16b6   : > { %v7277_v0 = vpop.f32.mrb[78].mxu0  ;;  %v4620_v54 = vsel %vm788_vm1, %v4603_v35, -inf }
0x16b7   : > { %v4631_v47 = vsub.f32 %v4597_v24, %v4619_v11  ;;  %v4632_v12 = vsub.f32 %v4598_v20, %v4619_v11  ;;  %v4633_v13 = vsub.f32 %v4599_v34, %v4619_v11  ;;  %v4634_v15 = vsub.f32 %v4600_v28, %v4619_v11  ;;  %v4578_v22 = vpop.f32.mrb[79].mxu0 }
0x16b8   : > { %v4635_v19 = vsub.f32 %v4601_v26, %v4619_v11  ;;  %v4636_v56 = vsub.f32 %v4602_v31, %v4619_v11  ;;  %v4606_v44 = vmul.f32 0.5, %v7277_v0  ;;  %v4605_v5 = vmul.f32 0.5, %v4578_v22 }
0x16b9   : > { %v4643_v60 = vmul.f32 1.442695, %v4631_v47  ;;  %v4645_v21 = vmul.f32 1.442695, %v4632_v12  ;;  %v4647_v58 = vmul.f32 1.442695, %v4633_v13 }
0x16ba   : > { %v4649_v7 = vmul.f32 1.442695, %v4634_v15  ;;  %v4651_v40 = vmul.f32 1.442695, %v4635_v19  ;;  %v4624_v63 = vsel %vm788_vm1, %v4606_v44, -inf  ;;  %v4622_v46 = vsel %vm788_vm1, %v4605_v5, -inf }
0x16bb   : > { %7843 = vpow2.f32 %v4643_v60  ;;  %v7280_v3 = vpop.f32.mrb[80].mxu0  ;;  %v4625_v14 = vmax.f32 %v4621_v51, %v4624_v63  ;;  %v4623_v6 = vmax.f32 %v4620_v54, %v4622_v46  ;;  %v4653_v45 = vmul.f32 1.442695, %v4636_v56 }
0x16bc   : > { %7845 = vpow2.f32 %v4645_v21  ;;  %v4608_v10 = vmul.f32 0.5, %v7280_v3  ;;  %v4588_v49 = vpop.f32.mrb[81].mxu0 }
0x16bd   : > { %7847 = vpow2.f32 %v4647_v58  ;;  %v4607_v43 = vmul.f32 0.5, %v4588_v49 }
0x16be   : > { %7849 = vpow2.f32 %v4649_v7  ;;  %v4628_v20 = vsel %vm788_vm1, %v4608_v10, -inf }
0x16bf   : > { %v4629_v24 = vmax.f32 %v4625_v14, %v4628_v20  ;;  %v4626_v27 = vsel %vm788_vm1, %v4607_v43, -inf  ;;  %7851 = vpow2.f32 %v4651_v40 }
0x16c0   : > { %v4627_v28 = vmax.f32 %v4623_v6, %v4626_v27  ;;  %7853 = vpow2.f32 %v4653_v45 }
0x16c2   : > { %v4630_v30 = vmax.f32 %v4627_v28, %v4629_v24 }
0x16c4   : > { %v4637_v34 = vsub.f32 %v4603_v35, %v4630_v30  ;;  %v4638_v37 = vsub.f32 %v4604_v59, %v4630_v30  ;;  %v4639_v39 = vsub.f32 %v4605_v5, %v4630_v30  ;;  %v4640_v18 = vsub.f32 %v4606_v44, %v4630_v30 }
0x16c5   : > { %v7844_v41 = vpop.eup %7843  ;;  %v4641_v42 = vsub.f32 %v4607_v43, %v4630_v30  ;;  %v4642_v16 = vsub.f32 %v4608_v10, %v4630_v30 }
0x16c6   : > { %v7846_v48 = vpop.eup %7845  ;;  %v4667_v31 = vsel %vm788_vm1, %v7844_v41, 0.0  ;;  %v4655_v53 = vmul.f32 1.442695, %v4637_v34  ;;  %v4657_v26 = vmul.f32 1.442695, %v4638_v37 }
0x16c7   : > { %v7848_v55 = vpop.eup %7847  ;;  %v4668_v57 = vsel %vm788_vm1, %v7846_v48, 0.0  ;;  %v4659_v61 = vmul.f32 1.442695, %v4639_v39  ;;  %v4661_v33 = vmul.f32 1.442695, %v4640_v18 }
0x16c8   : > { %v7850_v1 = vpop.eup %7849  ;;  %v4669_v4 = vadd.f32 %v4668_v57, %v4667_v31  ;;  %7855 = vpow2.f32 %v4655_v53  ;;  %v4670_v11 = vsel %vm788_vm1, %v7848_v55, 0.0  ;;  %v4663_v59 = vmul.f32 1.442695, %v4641_v42 }
0x16c9   : > { %7857 = vpow2.f32 %v4657_v26  ;;  %v7852_v35 = vpop.eup %7851  ;;  %v4672_v47 = vsel %vm788_vm1, %v7850_v1, 0.0  ;;  %v4665_v12 = vmul.f32 1.442695, %v4642_v16 }
0x16ca   : > { %v4671_v0 = vadd.f32 %v4670_v11, %v4669_v4  ;;  %7859 = vpow2.f32 %v4659_v61  ;;  %v7854_v13 = vpop.eup %7853  ;;  %v4674_v22 = vsel %vm788_vm1, %v7852_v35, 0.0 }
0x16cb   : > { %7861 = vpow2.f32 %v4661_v33  ;;  %v4676_v56 = vsel %vm788_vm1, %v7854_v13, 0.0 }
0x16cc   : > { %v4673_v15 = vadd.f32 %v4672_v47, %v4671_v0  ;;  %7863 = vpow2.f32 %v4663_v59 }
0x16cd   : > { %7865 = vpow2.f32 %v4665_v12 }
0x16ce   : > { %v4675_v19 = vadd.f32 %v4674_v22, %v4673_v15 }
0x16d0   : > { %v4677_v44 = vadd.f32 %v4676_v56, %v4675_v19 }
0x16d2   : > { %v7856_v5 = vpop.eup %7855  ;;  %7867 = vrcp.f32 %v4677_v44 }
0x16d3   : > { %v7858_v60 = vpop.eup %7857  ;;  %v4678_v21 = vsel %vm788_vm1, %v7856_v5, 0.0 }
0x16d4   : > { %v7860_v58 = vpop.eup %7859  ;;  %v4679_v7 = vsel %vm788_vm1, %v7858_v60, 0.0 }
0x16d5   : > { %v7862_v51 = vpop.eup %7861  ;;  %v4680_v54 = vadd.f32 %v4679_v7, %v4678_v21  ;;  %v4681_v40 = vsel %vm788_vm1, %v7860_v58, 0.0 }
0x16d6   : > { %v7864_v63 = vpop.eup %7863  ;;  %v4683_v3 = vsel %vm788_vm1, %v7862_v51, 0.0 }
0x16d7   : > { %v4682_v46 = vadd.f32 %v4681_v40, %v4680_v54  ;;  %v7866_v14 = vpop.eup %7865  ;;  %v4685_v10 = vsel %vm788_vm1, %v7864_v63, 0.0 }
0x16d8   : > { %v4687_v45 = vsel %vm788_vm1, %v7866_v14, 0.0 }
0x16d9   : > { %v4684_v6 = vadd.f32 %v4683_v3, %v4682_v46 }
0x16db   : > { %v4686_v49 = vadd.f32 %v4685_v10, %v4684_v6 }
0x16dc   : > { %v7868_v43 = vpop.eup %7867 }
0x16dd   : > { %v4688_v20 = vadd.f32 %v4687_v45, %v4686_v49  ;;  %v4691_v24 = vmul.f32 %v7868_v43, %v7844_v41  ;;  %v4692_v27 = vmul.f32 %v7868_v43, %v7846_v48  ;;  %v4693_v28 = vmul.f32 %v7868_v43, %v7848_v55 }
0x16de   : > { %v4694_v30 = vmul.f32 %v7868_v43, %v7850_v1  ;;  %v4695_v34 = vmul.f32 %v7868_v43, %v7852_v35  ;;  %v4696_v37 = vmul.f32 %v7868_v43, %v7854_v13 }
0x16df   : > { %7869 = vrcp.f32 %v4688_v20  ;;  %7283 = vmatprep.mubr.msk.f32.mxu1 %vm788_vm1, %v4691_v24 }
0x16e0   : > { %7284 = vmatmul.mubr.msk.f32.vlgmr.msra.gmra.mrb[80].mxu1 %vm788_vm1, %v4692_v27 }
0x16e1   : > { %7286 = vmatprep.mubr.msk.f32.mxu1 %vm788_vm1, %v4693_v28  ;;  %7569 = vmatpush3.bf16.msra.mxu1 %v8529_v52  ;;  %v4873_v52 = vpop.permute.xlu1 %4872 }
0x16e2   : > { %7571 = vmatprep.subr.bf16.mxu1 %v8553_v50 }
0x16e4   : > { %7287 = vmatmul.mubr.msk.f32.gmra.mrb[82].mxu1 %vm788_vm1, %v4694_v30 }
0x16e5   : > { %7289 = vmatprep.mubr.msk.f32.mxu1 %vm788_vm1, %v4695_v34  ;;  %7573 = vmatpush3.bf16.msra.mxu1 %v8553_v50  ;;  %v4871_v50 = vpop.permute.xlu0 %4870  ;;  %v4877_v57 = vpop.permute.xlu1 %4876 }
0x16e6   : > { %7355 = vmatprep.subr.mxu1 %v9157_v62 }
0x16e8   : > { %7290 = vmatmul.mubr.msk.f32.gmra.mrb[84].mxu1 %vm788_vm1, %v4696_v37 }
0x16e9   : > { %v7870_v39 = vpop.eup %7869  ;;  %v4875_v33 = vpop.permute.xlu0 %4874 }
0x16ea   : > { %v4697_v18 = vmul.f32 %v7870_v39, %v7856_v5  ;;  %v4698_v41 = vmul.f32 %v7870_v39, %v7858_v60  ;;  %v4699_v42 = vmul.f32 %v7870_v39, %v7860_v58  ;;  %v4700_v16 = vmul.f32 %v7870_v39, %v7862_v51  ;;  %v4881_v12 = vpop.permute.xlu1 %4880 }
0x16eb   : > { %v4701_v48 = vmul.f32 %v7870_v39, %v7864_v63  ;;  %v4702_v31 = vmul.f32 %v7870_v39, %v7866_v14 }
0x16ec   : > { %7292 = vmatprep.mubr.msk.f32.mxu1 %vm788_vm1, %v4697_v18 }
0x16ed   : > { %7293 = vmatmul.mubr.msk.f32.gmra.mrb[86].mxu1 %vm788_vm1, %v4698_v41  ;;  %v4879_v22 = vpop.permute.xlu0 %4878 }
0x16ee   : > { %7295 = vmatprep.mubr.msk.f32.mxu1 %vm788_vm1, %v4699_v42 }
0x16f1   : > { %7296 = vmatmul.mubr.msk.f32.gmra.mrb[88].mxu1 %vm788_vm1, %v4700_v16 }
0x16f2   : > { %7298 = vmatprep.mubr.msk.f32.mxu1 %vm788_vm1, %v4701_v48 }
0x16f5   : > { %7299 = vmatmul.mubr.msk.f32.gmra.mrb[90].mxu1 %vm788_vm1, %v4702_v31 }
0x17b3   : > { %v7285_v53 = vpop.f32.mrb[80].mxu1 }
0x17b4   : > { %v4889_v26 = vmul.f32 %v7285_v53, %v4873_v52  ;;  %v4805_v55 = vpop.f32.mrb[81].mxu1 }
0x17b5   : > { %v4888_v61 = vmul.f32 %v4871_v50, %v4805_v55 }
0x17b6   : > { %v4901_v1 = vsel %vm489_vm0, %v4889_v26, 0.0 }
0x17b7   : > { %v4900_v4 = vsel %vm489_vm0, %v4888_v61, 0.0  ;;  %v7288_v11 = vpop.f32.mrb[82].mxu1  ;;  %v7925_v61 = vld [vmem:[%s9595_s19] ss:$0 sm:$0xff] }
0x17b8   : > { %v4902_v59 = vadd.f32 %v4901_v1, %v4900_v4  ;;  %v4815_v35 = vpop.f32.mrb[83].mxu1  ;;  %v4891_v0 = vmul.f32 %v7288_v11, %v4877_v57 }
0x17b9   : > { %v4890_v47 = vmul.f32 %v4875_v33, %v4815_v35 }
0x17ba   : > { %v4905_v44 = vsel %vm489_vm0, %v4891_v0, 0.0 }
0x17bb   : > { %v4903_v13 = vsel %vm489_vm0, %v4890_v47, 0.0  ;;  %v7291_v15 = vpop.f32.mrb[84].mxu1 }
0x17bc   : > { %v4904_v19 = vadd.f32 %v4903_v13, %v4902_v59  ;;  %v4825_v56 = vpop.f32.mrb[85].mxu1  ;;  %v4893_v5 = vmul.f32 %v7291_v15, %v4881_v12 }
0x17bd   : > { %v4892_v60 = vmul.f32 %v4879_v22, %v4825_v56 }
0x17be   : > { %v4906_v21 = vadd.f32 %v4905_v44, %v4904_v19  ;;  %v4909_v54 = vsel %vm489_vm0, %v4893_v5, 0.0 }
0x17bf   : > { %v4907_v58 = vsel %vm489_vm0, %v4892_v60, 0.0 }
0x17c0   : > { %v4908_v7 = vadd.f32 %v4907_v58, %v4906_v21  ;;  %v7294_v51 = vpop.f32.mrb[86].mxu1 }
0x17c1   : > { %v4895_v40 = vmul.f32 %v7294_v51, %v4873_v52  ;;  %v4835_v63 = vpop.f32.mrb[87].mxu1  ;;  %v7924_v52 = vld [vmem:[%s9558_s3] ss:$0 sm:$0xff] }
0x17c2   : > { %v4910_v46 = vadd.f32 %v4909_v54, %v4908_v7  ;;  %v4894_v3 = vmul.f32 %v4871_v50, %v4835_v63 }
0x17c3   : > { %v4912_v14 = vsel %vm489_vm0, %v4895_v40, 0.0 }
0x17c4   : > { %v4911_v6 = vsel %vm489_vm0, %v4894_v3, 0.0  ;;  %v7297_v10 = vpop.f32.mrb[88].mxu1  ;;  %7309 = vmatprep.mubr.msk.f32.mxu0 %vm489_vm0, %v4910_v46 }
0x17c5   : > { %v4913_v49 = vadd.f32 %v4912_v14, %v4911_v6  ;;  %v4845_v43 = vpop.f32.mrb[89].mxu1  ;;  %v4897_v45 = vmul.f32 %v7297_v10, %v4877_v57 }
0x17c6   : > { %v4896_v20 = vmul.f32 %v4875_v33, %v4845_v43 }
0x17c7   : > { %v4916_v34 = vsel %vm489_vm0, %v4897_v45, 0.0 }
0x17c8   : > { %v4914_v24 = vsel %vm489_vm0, %v4896_v20, 0.0  ;;  %v7300_v27 = vpop.f32.mrb[90].mxu1 }
0x17c9   : > { %v4915_v28 = vadd.f32 %v4914_v24, %v4913_v49  ;;  %v4855_v30 = vpop.f32.mrb[91].mxu1  ;;  %v4899_v37 = vmul.f32 %v7300_v27, %v4881_v12 }
0x17ca   : > { %v4898_v39 = vmul.f32 %v4879_v22, %v4855_v30 }
0x17cb   : > { %v4917_v18 = vadd.f32 %v4916_v34, %v4915_v28  ;;  %v4920_v16 = vsel %vm489_vm0, %v4899_v37, 0.0 }
0x17cc   : > { %v4918_v41 = vsel %vm489_vm0, %v4898_v39, 0.0 }
0x17cd   : > { %v4919_v42 = vadd.f32 %v4918_v41, %v4917_v18 }
0x17cf   : > { %v4921_v48 = vadd.f32 %v4920_v16, %v4919_v42 }
0x17d1   : > { %7310 = vmatmul.mubr.msk.f32.vlgmr.msra.gmra.mrb[82].mxu0 %vm489_vm0, %v4921_v48 }
0x17d2   : > { %7577 = vmatpush3.bf16.msra.mxu0 %v8422_v9 }
0x17d3   : > { %7579 = vmatprep.subr.bf16.mxu0 %v8443_v17 }
0x17d6   : > { %7581 = vmatpush3.bf16.msra.mxu0 %v8443_v17 }
0x17d7   : > { %7583 = vmatprep.subr.bf16.mxu0 %v8745_v29 }
0x18a4   : > { %v7311_v31 = vpop.f32.mrb[82].mxu0 }
0x18a5   : > { %v5000_v50 = vadd.f32 %v7924_v52, %v7311_v31  ;;  %v4994_v53 = vpop.f32.mrb[83].mxu0 }
0x18a6   : > { %v4995_v26 = vadd.f32 %v7924_v52, %v4994_v53 }
0x18a7   : > { %v5004_v57 = vmax.f32 %v5000_v50, 0.0 }
0x18a8   : > { %v5003_v55 = vmax.f32 %v4995_v26, 0.0 }
0x18aa   : > { %7320 = vmatprep.mubr.msk.f32.mxu1 %vm489_vm0, %v5003_v55 }
0x18ab   : > { %7321 = vmatmul.mubr.msk.f32.vlgmr.msra.gmra.mrb[92].mxu1 %vm489_vm0, %v5004_v57 }
0x18ac   : > { %7356 = vmatpush3.msra.mxu1 %v9157_v62 }
0x18ad   : > { %7591 = vmatprep.subr.bf16.mxu1 %v8753_v36 }
0x197e   : > { %v7322_v9 = vpop.f32.mrb[92].mxu1 }
0x197f   : > { %v5077_v17 = vpop.f32.mrb[93].mxu1  ;;  %v9293_v12 = vadd.f32 %v7925_v61, %v7322_v9 }
0x1980   : > { %v9283_v33 = vadd.f32 %v7925_v61, %v5077_v17 }
0x1981   : > { %v5144_v60 = vrot.slane %v9293_v12, %v8567_v2  ;;  %v5137_v40 = vcombine.high %v9293_v12, %v9293_v12 }
0x1982   : > { %v5095_v1 = vrot.slane %v9283_v33, %v8567_v2  ;;  %v5088_v4 = vcombine.high %v9283_v33, %v9283_v33 }
0x1983   : > { %v5152_v54 = vcombine.high %v5144_v60, %v5144_v60  ;;  %v5160_v46 = vrot.slane %v5144_v60, %v8567_v2  ;;  %v5151_v6 = vrot.slane %v5137_v40, %v8567_v2 }
0x1984   : > { %v5111_v11 = vrot.slane %v5095_v1, %v8567_v2  ;;  %v5103_v59 = vcombine.high %v5095_v1, %v5095_v1  ;;  %v5102_v62 = vrot.slane %v5088_v4, %v8567_v2 }
0x1985   : > { %v5174_v14 = vrot.slane %v5152_v54, %v8567_v2  ;;  %v5221_v10 = vrot.slane %v5160_v46, %v8573_v8  ;;  %v5182_v49 = vcombine.high %v5160_v46, %v5160_v46  ;;  %v5153_v20 = vcombine.high %v5151_v6, %v5151_v6 }
0x1986   : > { %v5189_v35 = vrot.slane %v5111_v11, %v8573_v8  ;;  %v5125_v0 = vrot.slane %v5103_v59, %v8567_v2  ;;  %v5133_v47 = vcombine.high %v5111_v11, %v5111_v11  ;;  %v5104_v22 = vcombine.high %v5102_v62, %v5102_v62 }
0x1987   : > { %v5118_v56 = vrot.slane %v5102_v62, %v8567_v2  ;;  %v5225_v43 = vrot.slane %v5174_v14, %v8573_v8  ;;  %v5184_v45 = vcombine.high %v5174_v14, %v5174_v14  ;;  %v5229_v24 = vrot.slane %v5182_v49, %v8573_v8 }
0x1988   : > { %5250 = vrot.lane.b32.xlu0 %v5189_v35, %s8125_s10  ;;  %v5193_v13 = vrot.slane %v5125_v0, %v8573_v8  ;;  %v5135_v15 = vcombine.high %v5125_v0, %v5125_v0  ;;  %v5197_v19 = vrot.slane %v5133_v47, %v8573_v8  ;;  %v5132_v5 = vrot.slane %v5104_v22, %v8567_v2 }
0x1989   : > { %v5205_v21 = vrot.slane %v5118_v56, %v8573_v8  ;;  %v5134_v58 = vcombine.high %v5118_v56, %v5118_v56  ;;  %v5167_v27 = vrot.slane %v5151_v6, %v8567_v2  ;;  %v5233_v28 = vrot.slane %v5184_v45, %v8573_v8 }
0x198a   : > { %5252 = vrot.lane.b32.xlu1 %v5193_v13, %s8125_s10  ;;  %v5201_v44 = vrot.slane %v5135_v15, %v8573_v8  ;;  %v5209_v7 = vrot.slane %v5132_v5, %v8573_v8  ;;  %v5136_v51 = vcombine.high %v5132_v5, %v5132_v5  ;;  %v5181_v30 = vrot.slane %v5153_v20, %v8567_v2 }
0x198b   : > { %v5213_v63 = vrot.slane %v5134_v58, %v8573_v8  ;;  %v5237_v34 = vrot.slane %v5167_v27, %v8573_v8  ;;  %v5183_v37 = vcombine.high %v5167_v27, %v5167_v27 }
0x198c   : > { %5254 = vrot.lane.b32.xlu0 %v5197_v19, %s8125_s10  ;;  %v5217_v3 = vrot.slane %v5136_v51, %v8573_v8  ;;  %v5241_v39 = vrot.slane %v5181_v30, %v8573_v8  ;;  %v5185_v18 = vcombine.high %v5181_v30, %v5181_v30 }
0x198d   : > { %v5245_v41 = vrot.slane %v5183_v37, %v8573_v8 }
0x198e   : > { %5256 = vrot.lane.b32.xlu1 %v5201_v44, %s8125_s10  ;;  %v5249_v42 = vrot.slane %v5185_v18, %v8573_v8 }
0x1990   : > { %5258 = vrot.lane.b32.xlu0 %v5205_v21, %s8125_s10 }
0x1992   : > { %5260 = vrot.lane.b32.xlu1 %v5209_v7, %s8125_s10 }
0x1994   : > { %5262 = vrot.lane.b32.xlu0 %v5213_v63, %s8125_s10 }
0x1996   : > { %5264 = vrot.lane.b32.xlu1 %v5217_v3, %s8125_s10 }
0x1998   : > { %5266 = vrot.lane.b32.xlu0 %v5221_v10, %s8125_s10 }
0x199a   : > { %5268 = vrot.lane.b32.xlu1 %v5225_v43, %s8125_s10 }
0x199c   : > { %5270 = vrot.lane.b32.xlu0 %v5229_v24, %s8125_s10 }
0x199e   : > { %5272 = vrot.lane.b32.xlu1 %v5233_v28, %s8125_s10 }
0x19a0   : > { %5274 = vrot.lane.b32.xlu0 %v5237_v34, %s8125_s10 }
0x19a2   : > { %5276 = vrot.lane.b32.xlu1 %v5241_v39, %s8125_s10 }
0x19a4   : > { %5278 = vrot.lane.b32.xlu0 %v5245_v41, %s8125_s10 }
0x19a6   : > { %5280 = vrot.lane.b32.xlu1 %v5249_v42, %s8125_s10 }
0x19a8   : > { %5842 = vrot.lane.b32.xlu0 %v5189_v35, %s8127_s21 }
0x19aa   : > { %5844 = vrot.lane.b32.xlu1 %v5193_v13, %s8127_s21 }
0x19ac   : > { %5858 = vrot.lane.b32.xlu0 %v5221_v10, %s8127_s21 }
0x19ae   : > { %5860 = vrot.lane.b32.xlu1 %v5225_v43, %s8127_s21 }
0x19b0   : > { %5846 = vrot.lane.b32.xlu0 %v5197_v19, %s8127_s21 }
0x19b2   : > { %5862 = vrot.lane.b32.xlu1 %v5229_v24, %s8127_s21 }
0x19b4   : > { %5848 = vrot.lane.b32.xlu0 %v5201_v44, %s8127_s21 }
0x19b6   : > { %5864 = vrot.lane.b32.xlu1 %v5233_v28, %s8127_s21 }
0x19b8   : > { %5850 = vrot.lane.b32.xlu0 %v5205_v21, %s8127_s21 }
0x19ba   : > { %5866 = vrot.lane.b32.xlu1 %v5237_v34, %s8127_s21 }
0x19bc   : > { %5852 = vrot.lane.b32.xlu0 %v5209_v7, %s8127_s21 }
0x19be   : > { %5868 = vrot.lane.b32.xlu1 %v5241_v39, %s8127_s21 }
0x19c0   : > { %5854 = vrot.lane.b32.xlu0 %v5213_v63, %s8127_s21 }
0x19c2   : > { %5870 = vrot.lane.b32.xlu1 %v5245_v41, %s8127_s21 }
0x19c4   : > { %5856 = vrot.lane.b32.xlu0 %v5217_v3, %s8127_s21 }
0x19c6   : > { %5872 = vrot.lane.b32.xlu1 %v5249_v42, %s8127_s21  ;;  %s8043_s21 = scalar_lea.vmem %s9509_s30, 384 }
0x19c7   : > { %p8044_p10 = scmp.ne.s32.totalorder %s9509_s30, %s8043_s21  ;;  %p8051_p1 = scmp.lt.s32.totalorder %s8049_s24, %s8043_s21 }
0x19c9   : > { %p8045_p3 = pnand %p8044_p10, %p8340_p5  ;;  %p8052_p2 = por %p8051_p1, %p8050_p12 }
0x19cb   : > { %p8046_p7 = pneg %p8045_p3 }
0x19cd   : > { %p8053_p4 = pnand %p8052_p2, %p8046_p7 }
0x19fa   : > { %v5251_v2 = vpop.permute.xlu0 %5250 }
0x19fb   : > { %v5298_v8 = vmul.f32 %v5251_v2, %v9283_v33 }
0x19fc   : > { %v5253_v16 = vpop.permute.xlu1 %5252 }
0x19fd   : > { %v5299_v48 = vmul.f32 %v5253_v16, %v9283_v33  ;;  %7331 = vmatprep.mubr.msk.f32.mxu0 %vm489_vm0, %v5298_v8 }
0x19fe   : > { %v5255_v31 = vpop.permute.xlu0 %5254 }
0x19ff   : > { %v5300_v52 = vmul.f32 %v5255_v31, %v9283_v33  ;;  %7332 = vmatmul.mubr.msk.f32.vlgmr.msra.gmra.mrb[84].mxu0 %vm489_vm0, %v5299_v48 }
0x1a00   : > { %v5257_v50 = vpop.permute.xlu1 %5256  ;;  %7585 = vmatpush3.bf16.msra.mxu0 %v8745_v29 }
0x1a01   : > { %v5301_v53 = vmul.f32 %v5257_v50, %v9283_v33  ;;  %7334 = vmatprep.mubr.msk.f32.mxu0 %vm489_vm0, %v5300_v52  ;;  %7587 = vmatprep.subr.bf16.mxu0 %v8749_v32 }
0x1a02   : > { %v5259_v26 = vpop.permute.xlu0 %5258 }
0x1a03   : > { %v5302_v55 = vmul.f32 %v5259_v26, %v9283_v33  ;;  %7335 = vmatmul.mubr.msk.f32.gmra.mrb[86].mxu0 %vm489_vm0, %v5301_v53 }
0x1a04   : > { %v5261_v57 = vpop.permute.xlu1 %5260  ;;  %7589 = vmatpush3.bf16.msra.mxu0 %v8749_v32 }
0x1a05   : > { %v5303_v9 = vmul.f32 %v5261_v57, %v9283_v33  ;;  %7337 = vmatprep.mubr.msk.f32.mxu0 %vm489_vm0, %v5302_v55  ;;  %7599 = vmatprep.subr.bf16.mxu0 %v8789_v23 }
0x1a06   : > { %v5263_v29 = vpop.permute.xlu0 %5262 }
0x1a07   : > { %v5304_v17 = vmul.f32 %v5263_v29, %v9283_v33  ;;  %7338 = vmatmul.mubr.msk.f32.gmra.mrb[88].mxu0 %vm489_vm0, %v5303_v9 }
0x1a08   : > { %v5265_v61 = vpop.permute.xlu1 %5264 }
0x1a09   : > { %v5305_v1 = vmul.f32 %v5265_v61, %v9283_v33  ;;  %7340 = vmatprep.mubr.msk.f32.mxu0 %vm489_vm0, %v5304_v17 }
0x1a0a   : > { %v5267_v4 = vpop.permute.xlu0 %5266 }
0x1a0b   : > { %v5306_v11 = vmul.f32 %v5267_v4, %v9293_v12  ;;  %7341 = vmatmul.mubr.msk.f32.gmra.mrb[90].mxu0 %vm489_vm0, %v5305_v1 }
0x1a0c   : > { %v5269_v32 = vpop.permute.xlu1 %5268 }
0x1a0d   : > { %v5307_v59 = vmul.f32 %v5269_v32, %v9293_v12  ;;  %7343 = vmatprep.mubr.msk.f32.mxu0 %vm489_vm0, %v5306_v11 }
0x1a0e   : > { %v5271_v62 = vpop.permute.xlu0 %5270 }
0x1a0f   : > { %v5308_v35 = vmul.f32 %v5271_v62, %v9293_v12  ;;  %7344 = vmatmul.mubr.msk.f32.gmra.mrb[92].mxu0 %vm489_vm0, %v5307_v59 }
0x1a10   : > { %v5273_v0 = vpop.permute.xlu1 %5272 }
0x1a11   : > { %v5309_v33 = vmul.f32 %v5273_v0, %v9293_v12  ;;  %7346 = vmatprep.mubr.msk.f32.mxu0 %vm489_vm0, %v5308_v35 }
0x1a12   : > { %v5275_v47 = vpop.permute.xlu0 %5274 }
0x1a13   : > { %v5310_v13 = vmul.f32 %v5275_v47, %v9293_v12  ;;  %7347 = vmatmul.mubr.msk.f32.gmra.mrb[94].mxu0 %vm489_vm0, %v5309_v33 }
0x1a14   : > { %v5277_v15 = vpop.permute.xlu1 %5276 }
0x1a15   : > { %v5311_v22 = vmul.f32 %v5277_v15, %v9293_v12  ;;  %7349 = vmatprep.mubr.msk.f32.mxu0 %vm489_vm0, %v5310_v13 }
0x1a16   : > { %v5279_v19 = vpop.permute.xlu0 %5278 }
0x1a17   : > { %v5312_v56 = vmul.f32 %v5279_v19, %v9293_v12  ;;  %7350 = vmatmul.mubr.msk.f32.gmra.mrb[96].mxu0 %vm489_vm0, %v5311_v22 }
0x1a18   : > { %v5281_v44 = vpop.permute.xlu1 %5280 }
0x1a19   : > { %v5313_v5 = vmul.f32 %v5281_v44, %v9293_v12  ;;  %7352 = vmatprep.mubr.msk.f32.mxu0 %vm489_vm0, %v5312_v56 }
0x1a1b   : > { %7353 = vmatmul.mubr.msk.f32.gmra.mrb[98].mxu0 %vm489_vm0, %v5313_v5 }
0x1ad2   : > { %v7333_v60 = vpop.f32.mrb[84].mxu0 }
0x1ad3   : > { %v5428_v21 = vpop.f32.mrb[85].mxu0  ;;  %v5508_v58 = vmul.f32 0.5, %v7333_v60 }
0x1ad4   : > { %v5507_v7 = vmul.f32 0.5, %v5428_v21 }
0x1ad5   : > { %v5524_v46 = vsel %vm788_vm1, %v5508_v58, -inf }
0x1ad6   : > { %v7336_v51 = vpop.f32.mrb[86].mxu0  ;;  %v5523_v14 = vsel %vm788_vm1, %v5507_v7, -inf }
0x1ad7   : > { %v5510_v54 = vmul.f32 0.5, %v7336_v51  ;;  %v5438_v40 = vpop.f32.mrb[87].mxu0 }
0x1ad8   : > { %v5509_v63 = vmul.f32 0.5, %v5438_v40 }
0x1ad9   : > { %v5527_v3 = vsel %vm788_vm1, %v5510_v54, -inf }
0x1ada   : > { %v5528_v6 = vmax.f32 %v5524_v46, %v5527_v3  ;;  %v5525_v12 = vsel %vm788_vm1, %v5509_v63, -inf  ;;  %v7339_v10 = vpop.f32.mrb[88].mxu0 }
0x1adb   : > { %v5526_v49 = vmax.f32 %v5523_v14, %v5525_v12  ;;  %v5512_v43 = vmul.f32 0.5, %v7339_v10  ;;  %v5448_v45 = vpop.f32.mrb[89].mxu0 }
0x1adc   : > { %v5511_v20 = vmul.f32 0.5, %v5448_v45 }
0x1add   : > { %v5531_v24 = vsel %vm788_vm1, %v5512_v43, -inf }
0x1ade   : > { %v5532_v27 = vmax.f32 %v5528_v6, %v5531_v24  ;;  %v5529_v28 = vsel %vm788_vm1, %v5511_v20, -inf  ;;  %v7342_v30 = vpop.f32.mrb[90].mxu0 }
0x1adf   : > { %v5530_v34 = vmax.f32 %v5526_v49, %v5529_v28  ;;  %v5514_v37 = vmul.f32 0.5, %v7342_v30  ;;  %v5458_v39 = vpop.f32.mrb[91].mxu0 }
0x1ae0   : > { %v5513_v18 = vmul.f32 0.5, %v5458_v39 }
0x1ae1   : > { %v5535_v41 = vsel %vm788_vm1, %v5514_v37, -inf }
0x1ae2   : > { %v5536_v42 = vmax.f32 %v5532_v27, %v5535_v41  ;;  %v5533_v2 = vsel %vm788_vm1, %v5513_v18, -inf  ;;  %v7345_v8 = vpop.f32.mrb[92].mxu0 }
0x1ae3   : > { %v5534_v16 = vmax.f32 %v5530_v34, %v5533_v2  ;;  %v5468_v48 = vpop.f32.mrb[93].mxu0  ;;  %v9397_v52 = vmul.f32 0.5, %v7345_v8 }
0x1ae4   : > { %v9399_v50 = vmul.f32 0.5, %v5468_v48 }
0x1ae5   : > { %v5537_v31 = vmax.f32 %v5534_v16, %v5536_v42  ;;  %v5539_v35 = vsel %vm788_vm1, %v9397_v52, -inf }
0x1ae6   : > { %v7348_v53 = vpop.f32.mrb[94].mxu0  ;;  %v5538_v0 = vsel %vm788_vm1, %v9399_v50, -inf }
0x1ae7   : > { %v5553_v26 = vsub.f32 %v5507_v7, %v5537_v31  ;;  %v5554_v55 = vsub.f32 %v5508_v58, %v5537_v31  ;;  %v5555_v57 = vsub.f32 %v5509_v63, %v5537_v31  ;;  %v5556_v9 = vsub.f32 %v5510_v54, %v5537_v31  ;;  %v5478_v29 = vpop.f32.mrb[95].mxu0 }
0x1ae8   : > { %v5557_v17 = vsub.f32 %v5511_v20, %v5537_v31  ;;  %v5558_v61 = vsub.f32 %v5512_v43, %v5537_v31  ;;  %v5559_v1 = vsub.f32 %v5513_v18, %v5537_v31  ;;  %v5560_v4 = vsub.f32 %v5514_v37, %v5537_v31 }
0x1ae9   : > { %v5569_v11 = vmul.f32 1.442695, %v5553_v26  ;;  %v5571_v32 = vmul.f32 1.442695, %v5554_v55  ;;  %v5573_v59 = vmul.f32 1.442695, %v5555_v57 }
0x1aea   : > { %v5575_v62 = vmul.f32 1.442695, %v5556_v9  ;;  %v5518_v33 = vmul.f32 0.5, %v7348_v53  ;;  %v7351_v47 = vpop.f32.mrb[96].mxu0  ;;  %v5577_v13 = vmul.f32 1.442695, %v5557_v17 }
0x1aeb   : > { %7871 = vpow2.f32 %v5569_v11  ;;  %v5517_v15 = vmul.f32 0.5, %v5478_v29  ;;  %v5520_v22 = vmul.f32 0.5, %v7351_v47  ;;  %v5488_v19 = vpop.f32.mrb[97].mxu0  ;;  %v5579_v56 = vmul.f32 1.442695, %v5558_v61 }
0x1aec   : > { %7873 = vpow2.f32 %v5571_v32  ;;  %v5542_v44 = vsel %vm788_vm1, %v5518_v33, -inf  ;;  %v5519_v5 = vmul.f32 0.5, %v5488_v19  ;;  %v5581_v46 = vmul.f32 1.442695, %v5559_v1 }
0x1aed   : > { %7875 = vpow2.f32 %v5573_v59  ;;  %v5543_v60 = vmax.f32 %v5539_v35, %v5542_v44  ;;  %v5540_v21 = vsel %vm788_vm1, %v5517_v15, -inf  ;;  %v5546_v58 = vsel %vm788_vm1, %v5520_v22, -inf }
0x1aee   : > { %7877 = vpow2.f32 %v5575_v62  ;;  %v7354_v7 = vpop.f32.mrb[98].mxu0  ;;  %v5541_v51 = vmax.f32 %v5538_v0, %v5540_v21  ;;  %v5544_v54 = vsel %vm788_vm1, %v5519_v5, -inf  ;;  %v5583_v10 = vmul.f32 1.442695, %v5560_v4 }
0x1aef   : > { %v5522_v40 = vmul.f32 0.5, %v7354_v7  ;;  %v5498_v63 = vpop.f32.mrb[99].mxu0  ;;  %7879 = vpow2.f32 %v5577_v13  ;;  %v5547_v3 = vmax.f32 %v5543_v60, %v5546_v58 }
0x1af0   : > { %v5521_v14 = vmul.f32 0.5, %v5498_v63  ;;  %v5545_v6 = vmax.f32 %v5541_v51, %v5544_v54  ;;  %7881 = vpow2.f32 %v5579_v56 }
0x1af1   : > { %v5550_v12 = vsel %vm788_vm1, %v5522_v40, -inf  ;;  %7883 = vpow2.f32 %v5581_v46 }
0x1af2   : > { %v5551_v49 = vmax.f32 %v5547_v3, %v5550_v12  ;;  %v5548_v43 = vsel %vm788_vm1, %v5521_v14, -inf  ;;  %7885 = vpow2.f32 %v5583_v10 }
0x1af3   : > { %v5549_v45 = vmax.f32 %v5545_v6, %v5548_v43 }
0x1af5   : > { %v9411_v20 = vpop.eup %7871  ;;  %v5552_v24 = vmax.f32 %v5549_v45, %v5551_v49 }
0x1af6   : > { %v9413_v27 = vpop.eup %7873  ;;  %v5601_v28 = vsel %vm788_vm1, %v9411_v20, 0.0 }
0x1af7   : > { %v9417_v30 = vpop.eup %7875  ;;  %v5602_v34 = vsel %vm788_vm1, %v9413_v27, 0.0  ;;  %v5561_v37 = vsub.f32 %v9399_v50, %v5552_v24  ;;  %v5562_v39 = vsub.f32 %v9397_v52, %v5552_v24  ;;  %v5563_v18 = vsub.f32 %v5517_v15, %v5552_v24 }
0x1af8   : > { %v9423_v41 = vpop.eup %7877  ;;  %v5603_v42 = vadd.f32 %v5602_v34, %v5601_v28  ;;  %v5564_v2 = vsub.f32 %v5518_v33, %v5552_v24  ;;  %v5565_v8 = vsub.f32 %v5519_v5, %v5552_v24  ;;  %v5604_v16 = vsel %vm788_vm1, %v9417_v30, 0.0 }
0x1af9   : > { %v5566_v48 = vsub.f32 %v5520_v22, %v5552_v24  ;;  %v5567_v31 = vsub.f32 %v5521_v14, %v5552_v24  ;;  %v5568_v53 = vsub.f32 %v5522_v40, %v5552_v24  ;;  %v7880_v26 = vpop.eup %7879  ;;  %v5585_v57 = vmul.f32 1.442695, %v5561_v37 }
0x1afa   : > { %v5605_v55 = vadd.f32 %v5604_v16, %v5603_v42  ;;  %v5587_v9 = vmul.f32 1.442695, %v5562_v39  ;;  %v5606_v50 = vsel %vm788_vm1, %v9423_v41, 0.0  ;;  %v5589_v52 = vmul.f32 1.442695, %v5563_v18  ;;  %v7882_v17 = vpop.eup %7881 }
0x1afb   : > { %v5591_v29 = vmul.f32 1.442695, %v5564_v2  ;;  %7887 = vpow2.f32 %v5585_v57  ;;  %v5608_v1 = vsel %vm788_vm1, %v7880_v26, 0.0  ;;  %v5593_v4 = vmul.f32 1.442695, %v5565_v8  ;;  %v7884_v11 = vpop.eup %7883 }
0x1afc   : > { %v5607_v61 = vadd.f32 %v5606_v50, %v5605_v55  ;;  %7889 = vpow2.f32 %v5587_v9  ;;  %v5595_v59 = vmul.f32 1.442695, %v5566_v48  ;;  %v5610_v62 = vsel %vm788_vm1, %v7882_v17, 0.0  ;;  %v7886_v0 = vpop.eup %7885 }
0x1afd   : > { %7891 = vpow2.f32 %v5589_v52  ;;  %v5597_v35 = vmul.f32 1.442695, %v5567_v31  ;;  %v5612_v47 = vsel %vm788_vm1, %v7884_v11, 0.0  ;;  %v5614_v15 = vsel %vm788_vm1, %v7886_v0, 0.0  ;;  %v5845_v52 = vpop.permute.xlu1 %5844 }
0x1afe   : > { %v5609_v32 = vadd.f32 %v5608_v1, %v5607_v61  ;;  %7893 = vpow2.f32 %v5591_v29  ;;  %v5599_v22 = vmul.f32 1.442695, %v5568_v53 }
0x1aff   : > { %7895 = vpow2.f32 %v5593_v4 }
0x1b00   : > { %v5611_v33 = vadd.f32 %v5610_v62, %v5609_v32  ;;  %7897 = vpow2.f32 %v5595_v59 }
0x1b01   : > { %7899 = vpow2.f32 %v5597_v35 }
0x1b02   : > { %v5613_v13 = vadd.f32 %v5612_v47, %v5611_v33 }
0x1b04   : > { %v5615_v19 = vadd.f32 %v5614_v15, %v5613_v13 }
0x1b05   : > { %v7888_v56 = vpop.eup %7887 }
0x1b06   : > { %7901 = vrcp.f32 %v5615_v19  ;;  %v7890_v44 = vpop.eup %7889  ;;  %v5616_v5 = vsel %vm788_vm1, %v7888_v56, 0.0 }
0x1b07   : > { %7903 = vpow2.f32 %v5599_v22  ;;  %v7892_v60 = vpop.eup %7891  ;;  %v5617_v21 = vsel %vm788_vm1, %v7890_v44, 0.0 }
0x1b08   : > { %v7894_v58 = vpop.eup %7893  ;;  %v5618_v7 = vadd.f32 %v5617_v21, %v5616_v5  ;;  %v5619_v51 = vsel %vm788_vm1, %v7892_v60, 0.0 }
0x1b09   : > { %v7896_v54 = vpop.eup %7895  ;;  %v5621_v46 = vsel %vm788_vm1, %v7894_v58, 0.0 }
0x1b0a   : > { %v5620_v40 = vadd.f32 %v5619_v51, %v5618_v7  ;;  %v7898_v63 = vpop.eup %7897  ;;  %v5623_v6 = vsel %vm788_vm1, %v7896_v54, 0.0 }
0x1b0b   : > { %v7900_v3 = vpop.eup %7899  ;;  %v5625_v49 = vsel %vm788_vm1, %v7898_v63, 0.0 }
0x1b0c   : > { %v5622_v14 = vadd.f32 %v5621_v46, %v5620_v40  ;;  %v5627_v43 = vsel %vm788_vm1, %v7900_v3, 0.0 }
0x1b0e   : > { %v5624_v12 = vadd.f32 %v5623_v6, %v5622_v14 }
0x1b10   : > { %v7902_v10 = vpop.eup %7901  ;;  %v5626_v24 = vadd.f32 %v5625_v49, %v5624_v12 }
0x1b11   : > { %v7904_v45 = vpop.eup %7903  ;;  %v5633_v28 = vmul.f32 %v7902_v10, %v9411_v20  ;;  %v5634_v34 = vmul.f32 %v7902_v10, %v9413_v27  ;;  %v5635_v37 = vmul.f32 %v7902_v10, %v9417_v30  ;;  %v5636_v39 = vmul.f32 %v7902_v10, %v9423_v41 }
0x1b12   : > { %v5637_v18 = vmul.f32 %v7902_v10, %v7880_v26  ;;  %v5638_v42 = vmul.f32 %v7902_v10, %v7882_v17  ;;  %v5639_v2 = vmul.f32 %v7902_v10, %v7884_v11  ;;  %v5628_v8 = vadd.f32 %v5627_v43, %v5626_v24  ;;  %v5861_v17 = vpop.permute.xlu1 %5860 }
0x1b13   : > { %7357 = vmatprep.mubr.msk.f32.mxu1 %vm788_vm1, %v5633_v28  ;;  %v5640_v16 = vmul.f32 %v7902_v10, %v7886_v0  ;;  %v5629_v48 = vsel %vm788_vm1, %v7904_v45, 0.0 }
0x1b14   : > { %7358 = vmatmul.mubr.msk.f32.vlgmr.msra.gmra.mrb[94].mxu1 %vm788_vm1, %v5634_v34  ;;  %v5630_v31 = vadd.f32 %v5629_v48, %v5628_v8 }
0x1b15   : > { %7360 = vmatprep.mubr.msk.f32.mxu1 %vm788_vm1, %v5635_v37  ;;  %7593 = vmatpush3.bf16.msra.mxu1 %v8753_v36 }
0x1b16   : > { %7595 = vmatprep.subr.bf16.mxu1 %v8755_v38  ;;  %7905 = vrcp.f32 %v5630_v31  ;;  %v5863_v1 = vpop.permute.xlu1 %5862 }
0x1b18   : > { %7361 = vmatmul.mubr.msk.f32.gmra.mrb[96].mxu1 %vm788_vm1, %v5636_v39 }
0x1b19   : > { %7363 = vmatprep.mubr.msk.f32.mxu1 %vm788_vm1, %v5637_v18  ;;  %7597 = vmatpush3.bf16.msra.mxu1 %v8755_v38  ;;  %v5843_v38 = vpop.permute.xlu0 %5842 }
0x1b1a   : > { %v5865_v15 = vpop.permute.xlu1 %5864 }
0x1b1c   : > { %7364 = vmatmul.mubr.msk.f32.gmra.mrb[98].mxu1 %vm788_vm1, %v5638_v42 }
0x1b1d   : > { %7366 = vmatprep.mubr.msk.f32.mxu1 %vm788_vm1, %v5639_v2  ;;  %v5859_v9 = vpop.permute.xlu0 %5858 }
0x1b1e   : > { %v5867_v40 = vpop.permute.xlu1 %5866 }
0x1b20   : > { %7367 = vmatmul.mubr.msk.f32.gmra.mrb[100].mxu1 %vm788_vm1, %v5640_v16  ;;  %v7906_v20 = vpop.eup %7905 }
0x1b21   : > { %v5641_v27 = vmul.f32 %v7906_v20, %v7888_v56  ;;  %v5642_v30 = vmul.f32 %v7906_v20, %v7890_v44  ;;  %v5643_v41 = vmul.f32 %v7906_v20, %v7892_v60  ;;  %v5644_v36 = vmul.f32 %v7906_v20, %v7894_v58  ;;  %v5847_v50 = vpop.permute.xlu0 %5846 }
0x1b22   : > { %v5645_v53 = vmul.f32 %v7906_v20, %v7896_v54  ;;  %v5646_v26 = vmul.f32 %v7906_v20, %v7898_v63  ;;  %v5647_v55 = vmul.f32 %v7906_v20, %v7900_v3  ;;  %v5648_v57 = vmul.f32 %v7906_v20, %v7904_v45  ;;  %v5869_v34 = vpop.permute.xlu1 %5868 }
0x1b23   : > { %7369 = vmatprep.mubr.msk.f32.mxu1 %vm788_vm1, %v5641_v27 }
0x1b24   : > { %7370 = vmatmul.mubr.msk.f32.gmra.mrb[102].mxu1 %vm788_vm1, %v5642_v30 }
0x1b25   : > { %7372 = vmatprep.mubr.msk.f32.mxu1 %vm788_vm1, %v5643_v41  ;;  %v5849_v29 = vpop.permute.xlu0 %5848 }
0x1b26   : > { %v5871_v41 = vpop.permute.xlu1 %5870 }
0x1b28   : > { %7373 = vmatmul.mubr.msk.f32.gmra.mrb[104].mxu1 %vm788_vm1, %v5644_v36 }
0x1b29   : > { %7375 = vmatprep.mubr.msk.f32.mxu1 %vm788_vm1, %v5645_v53  ;;  %v5851_v61 = vpop.permute.xlu0 %5850 }
0x1b2c   : > { %7376 = vmatmul.mubr.msk.f32.gmra.mrb[106].mxu1 %vm788_vm1, %v5646_v26 }
0x1b2d   : > { %7378 = vmatprep.mubr.msk.f32.mxu1 %vm788_vm1, %v5647_v55  ;;  %v5853_v11 = vpop.permute.xlu0 %5852 }
0x1b30   : > { %7379 = vmatmul.mubr.msk.f32.gmra.mrb[108].mxu1 %vm788_vm1, %v5648_v57 }
0x1b31   : > { %v5855_v56 = vpop.permute.xlu0 %5854 }
0x1b35   : > { %v5857_v3 = vpop.permute.xlu0 %5856 }
0x1be7   : > { %v7359_v4 = vpop.f32.mrb[94].mxu1 }
0x1be8   : > { %v5891_v32 = vmul.f32 %v7359_v4, %v5845_v52  ;;  %v5763_v59 = vpop.f32.mrb[95].mxu1 }
0x1be9   : > { %v5890_v62 = vmul.f32 %v5843_v38, %v5763_v59 }
0x1bea   : > { %v5907_v35 = vsel %vm489_vm0, %v5891_v32, 0.0 }
0x1beb   : > { %v5906_v0 = vsel %vm489_vm0, %v5890_v62, 0.0  ;;  %v7362_v33 = vpop.f32.mrb[96].mxu1 }
0x1bec   : > { %v5908_v47 = vadd.f32 %v5907_v35, %v5906_v0  ;;  %v5773_v13 = vpop.f32.mrb[97].mxu1  ;;  %v5893_v22 = vmul.f32 %v7362_v33, %v5849_v29 }
0x1bed   : > { %v5892_v19 = vmul.f32 %v5847_v50, %v5773_v13  ;;  %v7926_v13 = vld [vmem:[%s9558_s3 + $0x1] ss:$0 sm:$0xff] }
0x1bee   : > { %v5911_v58 = vsel %vm489_vm0, %v5893_v22, 0.0 }
0x1bef   : > { %v5909_v44 = vsel %vm489_vm0, %v5892_v19, 0.0  ;;  %v7365_v5 = vpop.f32.mrb[98].mxu1 }
0x1bf0   : > { %v5910_v60 = vadd.f32 %v5909_v44, %v5908_v47  ;;  %v5783_v21 = vpop.f32.mrb[99].mxu1  ;;  %v5895_v7 = vmul.f32 %v7365_v5, %v5853_v11 }
0x1bf1   : > { %v5894_v51 = vmul.f32 %v5851_v61, %v5783_v21 }
0x1bf2   : > { %v5912_v54 = vadd.f32 %v5911_v58, %v5910_v60  ;;  %v5915_v12 = vsel %vm489_vm0, %v5895_v7, 0.0 }
0x1bf3   : > { %v5913_v63 = vsel %vm489_vm0, %v5894_v51, 0.0  ;;  %v7368_v46 = vpop.f32.mrb[100].mxu1 }
0x1bf4   : > { %v5914_v14 = vadd.f32 %v5913_v63, %v5912_v54  ;;  %v5793_v6 = vpop.f32.mrb[101].mxu1  ;;  %v5897_v10 = vmul.f32 %v7368_v46, %v5857_v3  ;;  %v7928_v63 = vld [vmem:[%s9558_s3 + $0x2] ss:$0 sm:$0xff] }
0x1bf5   : > { %v5896_v49 = vmul.f32 %v5855_v56, %v5793_v6 }
0x1bf6   : > { %v5916_v43 = vadd.f32 %v5915_v12, %v5914_v14  ;;  %v5919_v37 = vsel %vm489_vm0, %v5897_v10, 0.0 }
0x1bf7   : > { %v5917_v45 = vsel %vm489_vm0, %v5896_v49, 0.0  ;;  %v7371_v28 = vpop.f32.mrb[102].mxu1 }
0x1bf8   : > { %v5918_v24 = vadd.f32 %v5917_v45, %v5916_v43  ;;  %v5899_v39 = vmul.f32 %v7371_v28, %v5861_v17  ;;  %v5803_v18 = vpop.f32.mrb[103].mxu1  ;;  %v5873_v17 = vpop.permute.xlu1 %5872 }
0x1bf9   : > { %v5898_v2 = vmul.f32 %v5859_v9, %v5803_v18 }
0x1bfa   : > { %v5920_v42 = vadd.f32 %v5919_v37, %v5918_v24  ;;  %v5922_v8 = vsel %vm489_vm0, %v5899_v39, 0.0 }
0x1bfb   : > { %v5921_v16 = vsel %vm489_vm0, %v5898_v2, 0.0  ;;  %v7374_v48 = vpop.f32.mrb[104].mxu1 }
0x1bfc   : > { %7389 = vmatprep.mubr.msk.f32.mxu0 %vm489_vm0, %v5920_v42  ;;  %v5923_v31 = vadd.f32 %v5922_v8, %v5921_v16  ;;  %v5813_v20 = vpop.f32.mrb[105].mxu1  ;;  %v5901_v27 = vmul.f32 %v7374_v48, %v5865_v15 }
0x1bfd   : > { %v5900_v30 = vmul.f32 %v5863_v1, %v5813_v20 }
0x1bfe   : > { %v5926_v57 = vsel %vm489_vm0, %v5901_v27, 0.0 }
0x1bff   : > { %v5924_v36 = vsel %vm489_vm0, %v5900_v30, 0.0  ;;  %v7377_v53 = vpop.f32.mrb[106].mxu1 }
0x1c00   : > { %v5925_v26 = vadd.f32 %v5924_v36, %v5923_v31  ;;  %v5823_v55 = vpop.f32.mrb[107].mxu1  ;;  %v5903_v38 = vmul.f32 %v7377_v53, %v5869_v34 }
0x1c01   : > { %v5902_v9 = vmul.f32 %v5867_v40, %v5823_v55 }
0x1c02   : > { %v5927_v50 = vadd.f32 %v5926_v57, %v5925_v26  ;;  %v5930_v11 = vsel %vm489_vm0, %v5903_v38, 0.0 }
0x1c03   : > { %v5928_v52 = vsel %vm489_vm0, %v5902_v9, 0.0  ;;  %v7380_v29 = vpop.f32.mrb[108].mxu1 }
0x1c04   : > { %v5929_v61 = vadd.f32 %v5928_v52, %v5927_v50  ;;  %v5833_v4 = vpop.f32.mrb[109].mxu1  ;;  %v5905_v1 = vmul.f32 %v7380_v29, %v5873_v17 }
0x1c05   : > { %v5904_v32 = vmul.f32 %v5871_v41, %v5833_v4 }
0x1c06   : > { %v5931_v59 = vadd.f32 %v5930_v11, %v5929_v61  ;;  %v5934_v0 = vsel %vm489_vm0, %v5905_v1, 0.0 }
0x1c07   : > { %v5932_v62 = vsel %vm489_vm0, %v5904_v32, 0.0 }
0x1c08   : > { %v5933_v35 = vadd.f32 %v5932_v62, %v5931_v59 }
0x1c0a   : > { %v5935_v33 = vadd.f32 %v5934_v0, %v5933_v35 }
0x1c0c   : > { %7390 = vmatmul.mubr.msk.f32.vlgmr.msra.gmra.mrb[100].mxu0 %vm489_vm0, %v5935_v33 }
0x1c0d   : > { %7601 = vmatpush3.bf16.msra.mxu0 %v8789_v23  ;;  %v7927_v23 = vld [vmem:[%s9560_s5 + $0x1] ss:$0 sm:$0xff] }
0x1c0e   : > { %7603 = vmatprep.subr.bf16.mxu0 %v8791_v25 }
0x1c11   : > { %7605 = vmatpush3.bf16.msra.mxu0 %v8791_v25 }
0x1cdf   : > { %v7391_v47 = vpop.f32.mrb[100].mxu0 }
0x1ce0   : > { %v6014_v15 = vadd.f32 %v7926_v13, %v7391_v47  ;;  %v6008_v22 = vpop.f32.mrb[101].mxu0 }
0x1ce1   : > { %v6009_v19 = vadd.f32 %v7926_v13, %v6008_v22 }
0x1ce2   : > { %v6018_v44 = vmax.f32 %v6014_v15, 0.0 }
0x1ce3   : > { %v6017_v56 = vmax.f32 %v6009_v19, 0.0 }
0x1ce5   : > { %7400 = vmatprep.mubr.msk.f32.mxu1 %vm489_vm0, %v6017_v56 }
0x1ce6   : > { %7401 = vmatmul.mubr.msk.f32.vlgmr.msra.gmra.mrb[110].mxu1 %vm489_vm0, %v6018_v44 }
0x1db9   : > { %v7402_v5 = vpop.f32.mrb[110].mxu1 }
0x1dba   : > { %v6097_v25 = vadd.f32 %v7927_v23, %v7402_v5  ;;  %v6091_v60 = vpop.f32.mrb[111].mxu1 }
0x1dbb   : > { %v6092_v21 = vadd.f32 %v7927_v23, %v6091_v60 }
0x1dbc   : > { %v6101_v58 = vmax.f32 %v6097_v25, 0.0 }
0x1dbd   : > { %v6100_v7 = vmax.f32 %v6092_v21, 0.0 }
0x1dbe   : > { %6106 = vrot.lane.b32.xlu1 %v6101_v58, %s8125_s10 }
0x1dbf   : > { %6104 = vrot.lane.b32.xlu0 %v6100_v7, %s8125_s10  ;;  %s7614_s10 = smul.u32 384, %s8207_s17  ;;  %s6208_s17 = scalar_lea.sflag [#allocation4], %s8391_s18 }
0x1dc1   : > { %s9507_s25 = scalar_lea.hbm %s9596_s29, %s7614_s10 }
0x1e30   : > { %v6107_v54 = vpop.permute.xlu1 %6106 }
0x1e31   : > { %v6105_v51 = vpop.permute.xlu0 %6104 }
0x1e32   : > { %7411 = vmatprep.mubr.msk.f32.mxu0 %vm489_vm0, %v6105_v51 }
0x1e33   : > { %7412 = vmatmul.mubr.msk.f32.vlgmr.msra.gmra.mrb[102].mxu0 %vm489_vm0, %v6107_v54 }
0x1f06   : > { %v7413_v40 = vpop.f32.mrb[102].mxu0 }
0x1f07   : > { %v6184_v46 = vadd.f32 %v7928_v63, %v7413_v40  ;;  %v6178_v3 = vpop.f32.mrb[103].mxu0 }
0x1f08   : > { %v6179_v14 = vadd.f32 %v7928_v63, %v6178_v3 }
0x1f09   : > { %v6564_v6 = vmul.f32 -1.442695, %v6184_v46 }
0x1f0a   : > { %v6563_v12 = vmul.f32 -1.442695, %v6179_v14 }
0x1f0b   : > { %7907 = vpow2.f32 %v6564_v6 }
0x1f0c   : > { %7909 = vpow2.f32 %v6563_v12 }
0x1f15   : > { %v7908_v10 = vpop.eup %7907 }
0x1f16   : > { %v7910_v49 = vpop.eup %7909  ;;  %v6194_v43 = vadd.f32 1.0, %v7908_v10 }
0x1f17   : > { %v6193_v45 = vadd.f32 1.0, %v7910_v49 }
0x1f18   : > { %7911 = vrcp.f32 %v6194_v43 }
0x1f19   : > { %7913 = vrcp.f32 %v6193_v45 }
0x1f22   : > { %v7912_v24 = vpop.eup %7911 }
0x1f23   : > { %v7914_v28 = vpop.eup %7913  ;;  %v6200_v34 = vmul.f32 %v7912_v24, %v6097_v25 }
0x1f24   : > { %v6199_v37 = vmul.f32 %v7914_v28, %v6092_v21 }
0x1f25   : > { %v6202_v39 = vsel %vm489_vm0, %v6200_v34, 0.0 }
0x1f26   : > { %v6201_v18 = vsel %vm489_vm0, %v6199_v37, 0.0 }
0x1f27   : > { %v6203_v42 = vadd.f32 %v6202_v39, %v6201_v18 }
0x1f29   : > { %6206 = vst.msk [vmem:[%s8817_s11 + $0x10] sm:$0xff] %vm489_vm0, %v6203_v42 }
0x1f2a   : > { %8056 = shalt.err (!%p8053_p4)
}
0x1f2b   : > { %s8057_s11 = scalar_lea.hbm %s9507_s25, 384  ;;  %s8061_s10 = scalar_lea.hbm %s9596_s29, 768 }
0x1f2c   : > { %p8058_p9 = scmp.ne.s32.totalorder %s9507_s25, %s8057_s11  ;;  %p8062_p8 = scmp.lt.u32.totalorder %s9507_s25, %s9596_s29 }
0x1f2d   : > { %p8063_p13 = scmp.lt.u32.totalorder %s8061_s10, %s8057_s11  ;;  %p8065_p10 = scmp.lt.u32.totalorder %s8057_s11, %s9507_s25 }
0x1f2e   : > { %p8059_p0 = pnand %p8058_p9, %p8340_p5 }
0x1f2f   : > { %p8064_p6 = por %p8063_p13, %p8062_p8 }
0x1f30   : > { %p8060_p11 = pneg %p8059_p0 }
0x1f31   : > { %p8066_p3 = por %p8065_p10, %p8064_p6 }
0x1f33   : > { %p8067_p7 = pnand %p8066_p3, %p8060_p11 }
0x1f35   : > { %8070 = shalt.err (!%p8067_p7)
}
0x1f36   : > { %s8129_s21 = smov 128   ;;  %s8130_s23 = smov 8  }
0x1f37   : > { %7629 = dma.vmem_to_hbm [thread:$0]  (%p8340_p5), %s9509_s30, 384, %s9507_s25, %s6208_s17, %s8129_s21, %s8129_s21, %s8130_s23  }
0x1f38 PF: > { %s9597_s7 = sld [smem:[#allocation15_spill]]  ;;  %s9598_s24 = sld [smem:[#allocation16_spill]] }
0x1f39   : > { %p9600_p1 = scmp.ge.s32.totalorder %s8117_s16, 2 }
0x1f3e   : > { %s6236_s28 = sand.u32 1, %s9597_s7   ;;  %p9599_p12 = scmp.ne.s32.totalorder %s9598_s24, 0 }
0x1f3f   : > { %s6237_s11 = scalar_lea.sflag [#allocation4], %s6236_s28 }
0x1f40   : > { %p7646_p2 = pnand %p9600_p1, %p9599_p12 }
0x1f42   : > { %8100 = dma.done.wait (!%p7646_p2), %s6237_s11, 384  }
0x1f43   : > { %8102 = vsyncadd (!%p7646_p2), %s6237_s11, 4294966912  ;;  %s9601_s26 = smov %s8336_s13  ;;  %p25_p4 = scmp.ge.s32.totalorder %s8326_s22, 4  }
0x1f44   : > { %s9602_s13 = smov %s8109_s14  ;;  %s9603_s14 = smov %s8113_s15 }
0x1f45   : > { %s9604_s15 = smov %s9601_s26  ;;  %s9605_s16 = smov %s8326_s22 }
0x1f46   :  { %27 = sbr.rel (!%p25_p4) target bundleno = 10 (0xa), region = 123 }
0x1f4d   :  { %6242 = vsyncpa [#allocation3], 1 }
0x1f4e   :  { %6244 = vsyncpa [#allocation3 + $0x1], 1 }
0x1f4f   :  { %6245 = vsyncpa [#allocation6], 1 }
0x1f50   :  { %6246 = vsyncpa [#allocation9], 1 }
0x1f51   :  { %6247 = vsyncpa [#allocation4], 1 }
0x1f52   :  { %6249 = vsyncpa [#allocation4 + $0x1], 1 }

</bundles_post_ra>
